<compile_context>
chip_gen: v7x
topology: tpu7x:2x2x1
jax: 0.10.0
libtpu: 0.0.40
codegen_flags: <defaults>
</compile_context>

<pallas_src>
import jax
import jax.numpy as jnp
from jax import lax
from jax.experimental import pallas as pl
from jax.experimental.pallas import tpu as pltpu

GN_EPS = 1e-5
NUM_GROUPS = 32

# 3x3 tap offsets, ordered to match an (O,I,ky,kx) -> (ky,kx,I,O) -> (9*I, O) reshape.
_TAPS = tuple((dy, dx) for dy in (-1, 0, 1) for dx in (-1, 0, 1))


def _silu(x):
    return x * jax.nn.sigmoid(x)


def _is_pow2(n):
    return n > 0 and (n & (n - 1)) == 0


def _shift_rows(x, s, use_roll):
    """result[i] = x[(i + s) % M] along axis 0 (wrapped rows are masked by caller)."""
    m = x.shape[0]
    k = (-s) % m                      # np.roll amount giving result[i] = x[(i+s) % m]
    if k == 0:
        return x
    if use_roll:
        return pltpu.roll(x, k, axis=0)            # XLU sublane rotate, no VMEM copy
    return jnp.concatenate([x[m - k:], x[:m - k]], axis=0)


def _shift_lanes(x, s):
    """result[..., j] = x[..., (j + s) % C]; only used on tiny (nb, C) stats."""
    c = x.shape[-1]
    k = s % c
    if k == 0:
        return x
    return jnp.concatenate([x[:, k:], x[:, :k]], axis=1)


def _mod_vec(v, d):
    """v % d for a non-negative int32 vector and a positive Python int d."""
    if _is_pow2(d):
        return v & (d - 1)
    q = (v.astype(jnp.float32) * (1.0 / d)).astype(jnp.int32)   # ~floor(v/d), +/-1
    r = v - q * d
    r = jnp.where(r < 0, r + d, r)
    return jnp.where(r >= d, r - d, r)


def _make_tap_masks(m, h, w):
    """Per-destination-row validity ((M,1) bool or None) for each of the 9 taps."""
    hw = h * w
    r = lax.broadcasted_iota(jnp.int32, (m, 1), 0)
    q = _mod_vec(r, hw)              # within-image linear index
    xw = _mod_vec(r, w)              # within-row x coordinate (hw % w == 0)
    top_ok = q >= w                  # y - 1 >= 0
    bot_ok = q < (h - 1) * w         # y + 1 <  h
    left_ok = xw != 0                # x - 1 >= 0
    right_ok = xw != (w - 1)         # x + 1 <  w
    masks = []
    for dy, dx in _TAPS:
        v = None
        if dy == -1:
            v = top_ok
        elif dy == 1:
            v = bot_ok
        if dx == -1:
            v = left_ok if v is None else (v & left_ok)
        elif dx == 1:
            v = right_ok if v is None else (v & right_ok)
        masks.append(v)              # None => center tap, always valid
    return masks


def _group_norm(x3, gamma, beta, gmix_ref, num_groups):
    """GroupNorm over a (nb, HW, C) activation block; statistics kept in f32."""
    nb, hw, c = x3.shape
    cs = c // num_groups
    ch_sum = jnp.sum(x3, axis=1)                   # (nb, C)
    ch_sq = jnp.sum(x3 * x3, axis=1)               # (nb, C)
    if cs == 1:
        g_sum, g_sq = ch_sum, ch_sq
    elif _is_pow2(cs):
        # log2(cs) butterfly of masked lane shifts; groups are cs-aligned so the
        # XOR-partner always stays inside the group.
        lane = lax.broadcasted_iota(jnp.int32, (nb, c), 1)
        g_sum, g_sq = ch_sum, ch_sq
        o = 1
        while o < cs:
            low = (lane & o) == 0

            def _mix(v, _low=low, _o=o):
                return v + jnp.where(_low, _shift_lanes(v, _o), _shift_lanes(v, -_o))

            g_sum, g_sq = _mix(g_sum), _mix(g_sq)
            o *= 2
    else:
        # Rare fallback (non-power-of-two group size): block-diagonal (C, C) mix.
        stats = jnp.concatenate([ch_sum, ch_sq], axis=0)
        mixed = jnp.dot(stats, gmix_ref[...], preferred_element_type=jnp.float32,
                        precision=lax.Precision.HIGHEST)
        g_sum, g_sq = mixed[:nb], mixed[nb:]
    count = float(hw * cs)
    mean = g_sum / count
    var = jnp.maximum(g_sq / count - mean * mean, 0.0)
    inv = lax.rsqrt(var + GN_EPS)
    return (x3 - mean[:, None, :]) * inv[:, None, :] * gamma + beta


def _conv3x3_im2col(xf, masks, w_ref, b_ref, width, use_roll):
    """3x3 'same' conv as 3 accumulating im2col MXU dots (one per kernel row).

    xf:    (M, Cin) f32 flattened activations, M = nb*H*W
    masks: list of 9 ((M, 1) bool or None) boundary-validity masks
    w_ref: (9*Cin, Cout) bf16, rows ordered (ky, kx, i)
    """
    m, c = xf.shape
    w_all = w_ref[...]                              # (9*Cin, Cout) bf16
    acc = None
    for ky, dy in enumerate((-1, 0, 1)):
        slabs = []
        for kx, dx in enumerate((-1, 0, 1)):
            t = 3 * ky + kx
            shifted = _shift_rows(xf, dy * width + dx, use_roll)
            if masks[t] is not None:
                shifted = jnp.where(masks[t], shifted, 0.0)
            slabs.append(shifted.astype(jnp.bfloat16))
        slab = jnp.concatenate(slabs, axis=1)       # (M, 3*Cin) bf16
        part = jnp.dot(slab, w_all[3 * ky * c:3 * (ky + 1) * c, :],
                       preferred_element_type=jnp.float32)
        acc = part if acc is None else acc + part
    return acc + b_ref[...]


def residual_block_forward(x_nchw, temb, p, *, batch_block=None,
                           out_dtype=jnp.float32, use_roll=True,
                           buffered_consts=True):
    n, cin, h, w = x_nchw.shape
    cout = p["conv1_w"].shape[0]
    g = NUM_GROUPS
    hw = h * w
    use_res_conv = (cin != cout)

    # Images fused per grid step: target ~1024 MXU rows, but keep >= 2 grid steps
    # so both v7x TensorCores get work on the "parallel" batch axis.
    if batch_block is not None:
        nb = int(batch_block)
    else:
        nb = max(1, 1024 // hw)
        if n >= 2:
            nb = min(nb, n // 2)
    nb = max(1, min(nb, n))
    while n % nb:
        nb -= 1
    m = nb * hw

    # ---- host-side (XLA) preprocessing --------------------------------------
    # TODO(synk): if the surrounding model keeps activations NHWC, these two
    # transposes (and the matching one on the output) disappear.
    x_flat = jnp.transpose(x_nchw, (0, 2, 3, 1)).reshape(n, hw, cin).astype(jnp.float32)

    # Hoisted time-embedding projection: (N, Td) @ (Td, Cout) + b -> (N, 1, Cout).
    t_proj = (jnp.dot(temb.astype(jnp.float32), p["lin_w"].T.astype(jnp.float32),
                      precision=lax.Precision.HIGHEST)
              + p["lin_b"].astype(jnp.float32)).reshape(n, 1, cout)

    def flat_conv_w(wc):  # (O, I, 3, 3) -> (9*I, O) bf16, rows ordered (ky, kx, i)
        o_, i_ = wc.shape[0], wc.shape[1]
        return jnp.transpose(wc, (2, 3, 1, 0)).reshape(9 * i_, o_).astype(jnp.bfloat16)

    def group_mix_mat(c):
        cs = c // g
        if cs == 1 or _is_pow2(cs):          # handled with VPU lane ops in-kernel
            return jnp.zeros((1, 1), jnp.float32)
        grp = jnp.arange(c) // cs
        return (grp[:, None] == grp[None, :]).astype(jnp.float32)

    if use_res_conv:
        wres = p["res_w"][:, :, 0, 0].T.astype(jnp.bfloat16)       # (Cin, Cout)
        bres = p["res_b"].reshape(1, cout).astype(jnp.float32)
    else:
        wres = jnp.zeros((1, 1), jnp.bfloat16)
        bres = jnp.zeros((1, 1), jnp.float32)

    args = (
        x_flat, t_proj,
        p["gn1_g"].reshape(1, cin).astype(jnp.float32),
        p["gn1_b"].reshape(1, cin).astype(jnp.float32),
        group_mix_mat(cin),
        flat_conv_w(p["conv1_w"]),
        p["conv1_b"].reshape(1, cout).astype(jnp.float32),
        p["gn2_g"].reshape(1, cout).astype(jnp.float32),
        p["gn2_b"].reshape(1, cout).astype(jnp.float32),
        group_mix_mat(cout),
        flat_conv_w(p["conv2_w"]),
        p["conv2_b"].reshape(1, cout).astype(jnp.float32),
        wres, bres,
    )

    # ---- Pallas kernel (closure over static shape info) ---------------------
    def kernel(x_ref, t_ref,
               gn1_g_ref, gn1_b_ref, gmix1_ref, w1_ref, b1_ref,
               gn2_g_ref, gn2_b_ref, gmix2_ref, w2_ref, b2_ref,
               wres_ref, bres_ref, o_ref):
        x3 = x_ref[...]                                            # (nb, HW, Cin) f32
        masks = _make_tap_masks(m, h, w)                           # VPU iota compares

        # block1: GroupNorm(32, Cin) -> SiLU -> Conv3x3(pad=1)
        y3 = _silu(_group_norm(x3, gn1_g_ref[...], gn1_b_ref[...], gmix1_ref, g))
        y = _conv3x3_im2col(y3.reshape(m, cin), masks, w1_ref, b1_ref, w, use_roll)

        # + projected time embedding (Linear hoisted to the wrapper)
        y3 = y.reshape(nb, hw, cout) + t_ref[...]                  # (nb,1,Cout) bcast

        # block2: GroupNorm(32, Cout) -> SiLU -> Dropout -> Conv3x3(pad=1)
        # TODO(synk): Dropout(p=0.1) is treated as identity (inference mode).
        y3 = _silu(_group_norm(y3, gn2_g_ref[...], gn2_b_ref[...], gmix2_ref, g))
        y = _conv3x3_im2col(y3.reshape(m, cout), masks, w2_ref, b2_ref, w, use_roll)

        # residual connection: 1x1 conv iff in_ch != out_ch, else identity
        if use_res_conv:
            res = jnp.dot(x3.reshape(m, cin).astype(jnp.bfloat16), wres_ref[...],
                          preferred_element_type=jnp.float32) + bres_ref[...]
        else:
            res = x3.reshape(m, cout)
        o_ref[...] = (y + res).reshape(nb, hw, cout).astype(o_ref.dtype)

    def const_spec(a):
        nd = a.ndim
        if buffered_consts:   # grid-invariant: fetch once, single-buffered
            return pl.BlockSpec(a.shape, lambda i, _nd=nd: (0,) * _nd,
                                pipeline_mode=pl.Buffered(1))
        return pl.BlockSpec(a.shape, lambda i, _nd=nd: (0,) * _nd)

    in_specs = [
        pl.BlockSpec((nb, hw, cin), lambda i: (i, 0, 0)),
        pl.BlockSpec((nb, 1, cout), lambda i: (i, 0, 0)),
    ] + [const_spec(a) for a in args[2:]]

    # Scoped-VMEM budget: double-buffered activation blocks + single-buffered
    # constants + in-kernel temporaries (GN copy, bf16 im2col slabs, f32 accums).
    out_bytes = jnp.dtype(out_dtype).itemsize
    cmax = max(cin, cout)
    est = (2 * (nb * hw * cin * 4 + nb * cout * 4 + nb * hw * cout * out_bytes)
           + (9 * cin * cout + 9 * cout * cout + cin * cout) * 2
           + (2 * cin + 3 * cout) * 4
           + (cin * cin + cout * cout) * 4
           + m * cmax * 4 * 4            # f32 activation temporaries
           + m * 3 * cmax * 2 * 2        # bf16 im2col slabs (double-counted slack)
           + m * cout * 4 * 2)           # f32 conv accumulators
    vmem_limit = int(min(max(1.5 * est, 32 * 1024 * 1024), 100 * 1024 * 1024))

    out_flat = pl.pallas_call(
        kernel,
        out_shape=jax.ShapeDtypeStruct((n, hw, cout), out_dtype),
        grid=(n // nb,),
        in_specs=in_specs,
        out_specs=pl.BlockSpec((nb, hw, cout), lambda i: (i, 0, 0)),
        compiler_params=pltpu.CompilerParams(
            dimension_semantics=("parallel",),
            vmem_limit_bytes=vmem_limit),
    )(*args)

    return jnp.transpose(out_flat.reshape(n, h, w, cout), (0, 3, 1, 2))  # NCHW


def reference_forward(x, temb, p):
    """Plain-JAX reference reproducing the PyTorch forward (eval mode)."""
    def gn(v, gamma, beta):
        nb, c, hh, ww = v.shape
        gr = NUM_GROUPS
        vg = v.reshape(nb, gr, c // gr, hh, ww)
        mean = vg.mean(axis=(2, 3, 4), keepdims=True)
        var = vg.var(axis=(2, 3, 4), keepdims=True)
        vn = ((vg - mean) / jnp.sqrt(var + GN_EPS)).reshape(nb, c, hh, ww)
        return vn * gamma[None, :, None, None] + beta[None, :, None, None]

    def conv(v, wgt, b, pad):
        out = lax.conv_general_dilated(
            v, wgt, (1, 1), [(pad, pad), (pad, pad)],
            dimension_numbers=("NCHW", "OIHW", "NCHW"),
            precision=lax.Precision.HIGHEST)
        return out + b[None, :, None, None]

    hh = conv(_silu(gn(x, p["gn1_g"], p["gn1_b"])), p["conv1_w"], p["conv1_b"], 1)
    t = jnp.dot(temb, p["lin_w"].T, precision=lax.Precision.HIGHEST) + p["lin_b"]
    hh = hh + t[:, :, None, None]
    hh = conv(_silu(gn(hh, p["gn2_g"], p["gn2_b"])), p["conv2_w"], p["conv2_b"], 1)
    if x.shape[1] != p["conv1_w"].shape[0]:
        res = conv(x, p["res_w"], p["res_b"], 0)
    else:
        res = x
    return hh + res


def init_params(key, in_ch, out_ch, td):
    ks = jax.random.split(key, 12)
    s = 0.05
    return {
        "gn1_g": 1.0 + 0.1 * jax.random.normal(ks[0], (in_ch,), jnp.float32),
        "gn1_b": 0.1 * jax.random.normal(ks[1], (in_ch,), jnp.float32),
        "conv1_w": s * jax.random.normal(ks[2], (out_ch, in_ch, 3, 3), jnp.float32),
        "conv1_b": s * jax.random.normal(ks[3], (out_ch,), jnp.float32),
        "lin_w": s * jax.random.normal(ks[4], (out_ch, td), jnp.float32),
        "lin_b": s * jax.random.normal(ks[5], (out_ch,), jnp.float32),
        "gn2_g": 1.0 + 0.1 * jax.random.normal(ks[6], (out_ch,), jnp.float32),
        "gn2_b": 0.1 * jax.random.normal(ks[7], (out_ch,), jnp.float32),
        "conv2_w": s * jax.random.normal(ks[8], (out_ch, out_ch, 3, 3), jnp.float32),
        "conv2_b": s * jax.random.normal(ks[9], (out_ch,), jnp.float32),
        "res_w": s * jax.random.normal(ks[10], (out_ch, in_ch, 1, 1), jnp.float32),
        "res_b": s * jax.random.normal(ks[11], (out_ch,), jnp.float32),
    }


if __name__ == "__main__":
    # GroupNorm(num_groups=32) requires channel counts divisible by 32.
    N, IN_CH, OUT_CH, TD, H, W = 2, 32, 64, 32, 8, 8

    key = jax.random.PRNGKey(0)
    kx, kt, kp = jax.random.split(key, 3)
    x = jax.random.normal(kx, (N, IN_CH, H, W), jnp.float32)
    temb = jax.random.normal(kt, (N, TD), jnp.float32)
    params = init_params(kp, IN_CH, OUT_CH, TD)

    try:
        out = jax.block_until_ready(residual_block_forward(x, temb, params))
    except Exception:
        # Belt-and-braces fallback for older jaxlib (no pl.Buffered pipeline_mode /
        # pltpu.roll sublane rotate): concat shifts, default double buffering.
        out = jax.block_until_ready(
            residual_block_forward(x, temb, params,
                                   use_roll=False, buffered_consts=False))
    ref = jax.block_until_ready(reference_forward(x, temb, params))

    assert out.shape == (N, OUT_CH, H, W), out.shape
    max_err = float(jnp.max(jnp.abs(out - ref)))
    # bf16 MXU operands with f32 accumulation: tolerance loosened vs the f32 path.
    if not bool(jnp.allclose(out, ref, rtol=3e-2, atol=3e-2)):
        raise AssertionError(f"Pallas kernel mismatch vs reference, max abs err={max_err}")
    print("KERNEL_OK")
</pallas_src>

<mosaic_0001>
module attributes {stable_mosaic.version = 11 : i64} {
  func.func @kernel(%arg0: i32, %arg1: memref<1x64x32xf32, #tpu.memory_space<vmem>>, %arg2: memref<1x1x64xf32, #tpu.memory_space<vmem>>, %arg3: memref<1x32xf32, #tpu.memory_space<vmem>>, %arg4: memref<1x32xf32, #tpu.memory_space<vmem>>, %arg5: memref<1x1xf32, #tpu.memory_space<vmem>>, %arg6: memref<288x64xbf16, #tpu.memory_space<vmem>>, %arg7: memref<1x64xf32, #tpu.memory_space<vmem>>, %arg8: memref<1x64xf32, #tpu.memory_space<vmem>>, %arg9: memref<1x64xf32, #tpu.memory_space<vmem>>, %arg10: memref<1x1xf32, #tpu.memory_space<vmem>>, %arg11: memref<576x64xbf16, #tpu.memory_space<vmem>>, %arg12: memref<1x64xf32, #tpu.memory_space<vmem>>, %arg13: memref<32x64xbf16, #tpu.memory_space<vmem>>, %arg14: memref<1x64xf32, #tpu.memory_space<vmem>>, %arg15: memref<1x64x64xf32, #tpu.memory_space<vmem>>) attributes {dimension_semantics = [#tpu.dimension_semantics<parallel>], iteration_bounds = array<i64: 2>, scalar_prefetch = 0 : i64, scratch_operands = 0 : i64, tpu.core_type = #tpu.core_type<tc>, window_params = [{transform_indices = @transform_0, window_bounds = array<i64: 1, 64, 32>}, {transform_indices = @transform_1, window_bounds = array<i64: 1, 1, 64>}, {pipeline_mode = #tpu.pipeline_mode<synchronous>, transform_indices = @transform_2, window_bounds = array<i64: 1, 32>}, {pipeline_mode = #tpu.pipeline_mode<synchronous>, transform_indices = @transform_3, window_bounds = array<i64: 1, 32>}, {pipeline_mode = #tpu.pipeline_mode<synchronous>, transform_indices = @transform_4, window_bounds = array<i64: 1, 1>}, {pipeline_mode = #tpu.pipeline_mode<synchronous>, transform_indices = @transform_5, window_bounds = array<i64: 288, 64>}, {pipeline_mode = #tpu.pipeline_mode<synchronous>, transform_indices = @transform_6, window_bounds = array<i64: 1, 64>}, {pipeline_mode = #tpu.pipeline_mode<synchronous>, transform_indices = @transform_7, window_bounds = array<i64: 1, 64>}, {pipeline_mode = #tpu.pipeline_mode<synchronous>, transform_indices = @transform_8, window_bounds = array<i64: 1, 64>}, {pipeline_mode = #tpu.pipeline_mode<synchronous>, transform_indices = @transform_9, window_bounds = array<i64: 1, 1>}, {pipeline_mode = #tpu.pipeline_mode<synchronous>, transform_indices = @transform_10, window_bounds = array<i64: 576, 64>}, {pipeline_mode = #tpu.pipeline_mode<synchronous>, transform_indices = @transform_11, window_bounds = array<i64: 1, 64>}, {pipeline_mode = #tpu.pipeline_mode<synchronous>, transform_indices = @transform_12, window_bounds = array<i64: 32, 64>}, {pipeline_mode = #tpu.pipeline_mode<synchronous>, transform_indices = @transform_13, window_bounds = array<i64: 1, 64>}, {transform_indices = @transform_14, window_bounds = array<i64: 1, 64, 64>}]} {
    %c0 = arith.constant 0 : index
    %c0_0 = arith.constant 0 : index
    %c0_1 = arith.constant 0 : index
    %0 = vector.load %arg1[%c0, %c0_0, %c0_1] : memref<1x64x32xf32, #tpu.memory_space<vmem>>, vector<1x64x32xf32>
    %1 = tpu.iota {dimensions = array<i32: 0>} : vector<64x1xi32>
    %c63_i32 = arith.constant 63 : i32
    %2 = vector.broadcast %c63_i32 : i32 to vector<64x1xi32>
    %3 = arith.andi %1, %2 : vector<64x1xi32>
    %c7_i32 = arith.constant 7 : i32
    %4 = vector.broadcast %c7_i32 : i32 to vector<64x1xi32>
    %5 = arith.andi %1, %4 : vector<64x1xi32>
    %c8_i32 = arith.constant 8 : i32
    %6 = vector.broadcast %c8_i32 : i32 to vector<64x1xi32>
    %7 = arith.cmpi sge, %3, %6 : vector<64x1xi32>
    %c56_i32 = arith.constant 56 : i32
    %8 = vector.broadcast %c56_i32 : i32 to vector<64x1xi32>
    %9 = arith.cmpi slt, %3, %8 : vector<64x1xi32>
    %c0_i32 = arith.constant 0 : i32
    %10 = vector.broadcast %c0_i32 : i32 to vector<64x1xi32>
    %11 = arith.cmpi ne, %5, %10 : vector<64x1xi32>
    %c7_i32_2 = arith.constant 7 : i32
    %12 = vector.broadcast %c7_i32_2 : i32 to vector<64x1xi32>
    %13 = arith.cmpi ne, %5, %12 : vector<64x1xi32>
    %14 = arith.andi %7, %11 : vector<64x1xi1>
    %15 = arith.andi %7, %13 : vector<64x1xi1>
    %16 = arith.andi %9, %11 : vector<64x1xi1>
    %17 = arith.andi %9, %13 : vector<64x1xi1>
    %c0_3 = arith.constant 0 : index
    %c0_4 = arith.constant 0 : index
    %18 = vector.load %arg3[%c0_3, %c0_4] : memref<1x32xf32, #tpu.memory_space<vmem>>, vector<1x32xf32>
    %c0_5 = arith.constant 0 : index
    %c0_6 = arith.constant 0 : index
    %19 = vector.load %arg4[%c0_5, %c0_6] : memref<1x32xf32, #tpu.memory_space<vmem>>, vector<1x32xf32>
    %cst = arith.constant dense<0.000000e+00> : vector<1x32xf32>
    %20 = vector.multi_reduction <add>, %0, %cst [1] : vector<1x64x32xf32> to vector<1x32xf32>
    %21 = arith.mulf %0, %0 : vector<1x64x32xf32>
    %cst_7 = arith.constant dense<0.000000e+00> : vector<1x32xf32>
    %22 = vector.multi_reduction <add>, %21, %cst_7 [1] : vector<1x64x32xf32> to vector<1x32xf32>
    %cst_8 = arith.constant 6.400000e+01 : f32
    %23 = vector.broadcast %cst_8 : f32 to vector<1x32xf32>
    %24 = arith.divf %20, %23 : vector<1x32xf32>
    %cst_9 = arith.constant 6.400000e+01 : f32
    %25 = vector.broadcast %cst_9 : f32 to vector<1x32xf32>
    %26 = arith.divf %22, %25 : vector<1x32xf32>
    %27 = arith.mulf %24, %24 : vector<1x32xf32>
    %28 = arith.subf %26, %27 : vector<1x32xf32>
    %cst_10 = arith.constant 0.000000e+00 : f32
    %29 = vector.broadcast %cst_10 : f32 to vector<1x32xf32>
    %30 = arith.maximumf %28, %29 : vector<1x32xf32>
    %cst_11 = arith.constant 9.99999974E-6 : f32
    %31 = vector.broadcast %cst_11 : f32 to vector<1x32xf32>
    %32 = arith.addf %30, %31 : vector<1x32xf32>
    %33 = math.rsqrt %32 : vector<1x32xf32>
    %34 = vector.shape_cast %24 : vector<1x32xf32> to vector<1x1x32xf32>
    %35 = vector.broadcast %34 : vector<1x1x32xf32> to vector<1x64x32xf32>
    %36 = arith.subf %0, %35 : vector<1x64x32xf32>
    %37 = vector.shape_cast %33 : vector<1x32xf32> to vector<1x1x32xf32>
    %38 = vector.broadcast %37 : vector<1x1x32xf32> to vector<1x64x32xf32>
    %39 = arith.mulf %36, %38 : vector<1x64x32xf32>
    %40 = vector.shape_cast %18 : vector<1x32xf32> to vector<1x1x32xf32>
    %41 = vector.broadcast %40 : vector<1x1x32xf32> to vector<1x64x32xf32>
    %42 = arith.mulf %39, %41 : vector<1x64x32xf32>
    %43 = vector.shape_cast %19 : vector<1x32xf32> to vector<1x1x32xf32>
    %44 = vector.broadcast %43 : vector<1x1x32xf32> to vector<1x64x32xf32>
    %45 = arith.addf %42, %44 : vector<1x64x32xf32>
    %46 = arith.negf %45 : vector<1x64x32xf32>
    %47 = math.exp %46 : vector<1x64x32xf32>
    %cst_12 = arith.constant 1.000000e+00 : f32
    %48 = vector.broadcast %cst_12 : f32 to vector<1x64x32xf32>
    %49 = arith.addf %48, %47 : vector<1x64x32xf32>
    %50 = arith.divf %48, %49 : vector<1x64x32xf32>
    %51 = arith.mulf %45, %50 : vector<1x64x32xf32>
    %52 = vector.shape_cast %51 : vector<1x64x32xf32> to vector<64x32xf32>
    %c0_13 = arith.constant 0 : index
    %c0_14 = arith.constant 0 : index
    %53 = vector.load %arg6[%c0_13, %c0_14] : memref<288x64xbf16, #tpu.memory_space<vmem>>, vector<288x64xbf16>
    %c9_i32 = arith.constant 9 : i32
    %54 = tpu.dynamic_rotate %52 by %c9_i32 dim 0 : vector<64x32xf32>, i32 -> vector<64x32xf32>
    %cst_15 = arith.constant 0.000000e+00 : f32
    %55 = vector.shape_cast %14 : vector<64x1xi1> to vector<64x1xi1>
    %56 = vector.broadcast %55 : vector<64x1xi1> to vector<64x32xi1>
    %57 = vector.broadcast %cst_15 : f32 to vector<64x32xf32>
    %58 = arith.select %56, %54, %57 : vector<64x32xi1>, vector<64x32xf32>
    %59 = arith.truncf %58 : vector<64x32xf32> to vector<64x32xbf16>
    %c8_i32_16 = arith.constant 8 : i32
    %60 = tpu.dynamic_rotate %52 by %c8_i32_16 dim 0 : vector<64x32xf32>, i32 -> vector<64x32xf32>
    %cst_17 = arith.constant 0.000000e+00 : f32
    %61 = vector.shape_cast %7 : vector<64x1xi1> to vector<64x1xi1>
    %62 = vector.broadcast %61 : vector<64x1xi1> to vector<64x32xi1>
    %63 = vector.broadcast %cst_17 : f32 to vector<64x32xf32>
    %64 = arith.select %62, %60, %63 : vector<64x32xi1>, vector<64x32xf32>
    %65 = arith.truncf %64 : vector<64x32xf32> to vector<64x32xbf16>
    %c7_i32_18 = arith.constant 7 : i32
    %66 = tpu.dynamic_rotate %52 by %c7_i32_18 dim 0 : vector<64x32xf32>, i32 -> vector<64x32xf32>
    %cst_19 = arith.constant 0.000000e+00 : f32
    %67 = vector.shape_cast %15 : vector<64x1xi1> to vector<64x1xi1>
    %68 = vector.broadcast %67 : vector<64x1xi1> to vector<64x32xi1>
    %69 = vector.broadcast %cst_19 : f32 to vector<64x32xf32>
    %70 = arith.select %68, %66, %69 : vector<64x32xi1>, vector<64x32xf32>
    %71 = arith.truncf %70 : vector<64x32xf32> to vector<64x32xbf16>
    %72 = tpu.concatenate %59, %65, %71 in 1 : vector<64x32xbf16>, vector<64x32xbf16>, vector<64x32xbf16> -> vector<64x96xbf16>
    %73 = vector.extract_strided_slice %53 {offsets = [0, 0], sizes = [96, 64], strides = [1, 1]} : vector<288x64xbf16> to vector<96x64xbf16>
    %cst_20 = arith.constant dense<0.000000e+00> : vector<64x64xf32>
    %74 = tpu.matmul %72, %73, %cst_20 {dimension_numbers = #tpu.dot_dimension_numbers<[1], [0], [0], [1], [0, 0, 1, 1], [], []>} : vector<64x96xbf16>, vector<96x64xbf16>, vector<64x64xf32> -> vector<64x64xf32>
    %c1_i32 = arith.constant 1 : i32
    %75 = tpu.dynamic_rotate %52 by %c1_i32 dim 0 : vector<64x32xf32>, i32 -> vector<64x32xf32>
    %cst_21 = arith.constant 0.000000e+00 : f32
    %76 = vector.shape_cast %11 : vector<64x1xi1> to vector<64x1xi1>
    %77 = vector.broadcast %76 : vector<64x1xi1> to vector<64x32xi1>
    %78 = vector.broadcast %cst_21 : f32 to vector<64x32xf32>
    %79 = arith.select %77, %75, %78 : vector<64x32xi1>, vector<64x32xf32>
    %80 = arith.truncf %79 : vector<64x32xf32> to vector<64x32xbf16>
    %81 = arith.truncf %52 : vector<64x32xf32> to vector<64x32xbf16>
    %c63_i32_22 = arith.constant 63 : i32
    %82 = tpu.dynamic_rotate %52 by %c63_i32_22 dim 0 : vector<64x32xf32>, i32 -> vector<64x32xf32>
    %cst_23 = arith.constant 0.000000e+00 : f32
    %83 = vector.shape_cast %13 : vector<64x1xi1> to vector<64x1xi1>
    %84 = vector.broadcast %83 : vector<64x1xi1> to vector<64x32xi1>
    %85 = vector.broadcast %cst_23 : f32 to vector<64x32xf32>
    %86 = arith.select %84, %82, %85 : vector<64x32xi1>, vector<64x32xf32>
    %87 = arith.truncf %86 : vector<64x32xf32> to vector<64x32xbf16>
    %88 = tpu.concatenate %80, %81, %87 in 1 : vector<64x32xbf16>, vector<64x32xbf16>, vector<64x32xbf16> -> vector<64x96xbf16>
    %89 = vector.extract_strided_slice %53 {offsets = [96, 0], sizes = [96, 64], strides = [1, 1]} : vector<288x64xbf16> to vector<96x64xbf16>
    %cst_24 = arith.constant dense<0.000000e+00> : vector<64x64xf32>
    %90 = tpu.matmul %88, %89, %cst_24 {dimension_numbers = #tpu.dot_dimension_numbers<[1], [0], [0], [1], [0, 0, 1, 1], [], []>} : vector<64x96xbf16>, vector<96x64xbf16>, vector<64x64xf32> -> vector<64x64xf32>
    %91 = arith.addf %74, %90 : vector<64x64xf32>
    %c57_i32 = arith.constant 57 : i32
    %92 = tpu.dynamic_rotate %52 by %c57_i32 dim 0 : vector<64x32xf32>, i32 -> vector<64x32xf32>
    %cst_25 = arith.constant 0.000000e+00 : f32
    %93 = vector.shape_cast %16 : vector<64x1xi1> to vector<64x1xi1>
    %94 = vector.broadcast %93 : vector<64x1xi1> to vector<64x32xi1>
    %95 = vector.broadcast %cst_25 : f32 to vector<64x32xf32>
    %96 = arith.select %94, %92, %95 : vector<64x32xi1>, vector<64x32xf32>
    %97 = arith.truncf %96 : vector<64x32xf32> to vector<64x32xbf16>
    %c56_i32_26 = arith.constant 56 : i32
    %98 = tpu.dynamic_rotate %52 by %c56_i32_26 dim 0 : vector<64x32xf32>, i32 -> vector<64x32xf32>
    %cst_27 = arith.constant 0.000000e+00 : f32
    %99 = vector.shape_cast %9 : vector<64x1xi1> to vector<64x1xi1>
    %100 = vector.broadcast %99 : vector<64x1xi1> to vector<64x32xi1>
    %101 = vector.broadcast %cst_27 : f32 to vector<64x32xf32>
    %102 = arith.select %100, %98, %101 : vector<64x32xi1>, vector<64x32xf32>
    %103 = arith.truncf %102 : vector<64x32xf32> to vector<64x32xbf16>
    %c55_i32 = arith.constant 55 : i32
    %104 = tpu.dynamic_rotate %52 by %c55_i32 dim 0 : vector<64x32xf32>, i32 -> vector<64x32xf32>
    %cst_28 = arith.constant 0.000000e+00 : f32
    %105 = vector.shape_cast %17 : vector<64x1xi1> to vector<64x1xi1>
    %106 = vector.broadcast %105 : vector<64x1xi1> to vector<64x32xi1>
    %107 = vector.broadcast %cst_28 : f32 to vector<64x32xf32>
    %108 = arith.select %106, %104, %107 : vector<64x32xi1>, vector<64x32xf32>
    %109 = arith.truncf %108 : vector<64x32xf32> to vector<64x32xbf16>
    %110 = tpu.concatenate %97, %103, %109 in 1 : vector<64x32xbf16>, vector<64x32xbf16>, vector<64x32xbf16> -> vector<64x96xbf16>
    %111 = vector.extract_strided_slice %53 {offsets = [192, 0], sizes = [96, 64], strides = [1, 1]} : vector<288x64xbf16> to vector<96x64xbf16>
    %cst_29 = arith.constant dense<0.000000e+00> : vector<64x64xf32>
    %112 = tpu.matmul %110, %111, %cst_29 {dimension_numbers = #tpu.dot_dimension_numbers<[1], [0], [0], [1], [0, 0, 1, 1], [], []>} : vector<64x96xbf16>, vector<96x64xbf16>, vector<64x64xf32> -> vector<64x64xf32>
    %113 = arith.addf %91, %112 : vector<64x64xf32>
    %c0_30 = arith.constant 0 : index
    %c0_31 = arith.constant 0 : index
    %114 = vector.load %arg7[%c0_30, %c0_31] : memref<1x64xf32, #tpu.memory_space<vmem>>, vector<1x64xf32>
    %115 = vector.broadcast %114 : vector<1x64xf32> to vector<64x64xf32>
    %116 = arith.addf %113, %115 : vector<64x64xf32>
    %117 = vector.shape_cast %116 : vector<64x64xf32> to vector<1x64x64xf32>
    %c0_32 = arith.constant 0 : index
    %c0_33 = arith.constant 0 : index
    %c0_34 = arith.constant 0 : index
    %118 = vector.load %arg2[%c0_32, %c0_33, %c0_34] : memref<1x1x64xf32, #tpu.memory_space<vmem>>, vector<1x1x64xf32>
    %119 = vector.broadcast %118 : vector<1x1x64xf32> to vector<1x64x64xf32>
    %120 = arith.addf %117, %119 : vector<1x64x64xf32>
    %c0_35 = arith.constant 0 : index
    %c0_36 = arith.constant 0 : index
    %121 = vector.load %arg8[%c0_35, %c0_36] : memref<1x64xf32, #tpu.memory_space<vmem>>, vector<1x64xf32>
    %c0_37 = arith.constant 0 : index
    %c0_38 = arith.constant 0 : index
    %122 = vector.load %arg9[%c0_37, %c0_38] : memref<1x64xf32, #tpu.memory_space<vmem>>, vector<1x64xf32>
    %cst_39 = arith.constant dense<0.000000e+00> : vector<1x64xf32>
    %123 = vector.multi_reduction <add>, %120, %cst_39 [1] : vector<1x64x64xf32> to vector<1x64xf32>
    %124 = arith.mulf %120, %120 : vector<1x64x64xf32>
    %cst_40 = arith.constant dense<0.000000e+00> : vector<1x64xf32>
    %125 = vector.multi_reduction <add>, %124, %cst_40 [1] : vector<1x64x64xf32> to vector<1x64xf32>
    %126 = tpu.iota {dimensions = array<i32: 1>} : vector<1x64xi32>
    %c1_i32_41 = arith.constant 1 : i32
    %127 = vector.broadcast %c1_i32_41 : i32 to vector<1x64xi32>
    %128 = arith.andi %126, %127 : vector<1x64xi32>
    %c0_i32_42 = arith.constant 0 : i32
    %129 = vector.broadcast %c0_i32_42 : i32 to vector<1x64xi32>
    %130 = arith.cmpi eq, %128, %129 : vector<1x64xi32>
    %131 = vector.extract_strided_slice %123 {offsets = [0, 1], sizes = [1, 63], strides = [1, 1]} : vector<1x64xf32> to vector<1x63xf32>
    %132 = vector.extract_strided_slice %123 {offsets = [0, 0], sizes = [1, 1], strides = [1, 1]} : vector<1x64xf32> to vector<1x1xf32>
    %133 = tpu.concatenate %131, %132 in 1 : vector<1x63xf32>, vector<1x1xf32> -> vector<1x64xf32>
    %134 = vector.extract_strided_slice %123 {offsets = [0, 63], sizes = [1, 1], strides = [1, 1]} : vector<1x64xf32> to vector<1x1xf32>
    %135 = vector.extract_strided_slice %123 {offsets = [0, 0], sizes = [1, 63], strides = [1, 1]} : vector<1x64xf32> to vector<1x63xf32>
    %136 = tpu.concatenate %134, %135 in 1 : vector<1x1xf32>, vector<1x63xf32> -> vector<1x64xf32>
    %137 = arith.select %130, %133, %136 : vector<1x64xi1>, vector<1x64xf32>
    %138 = arith.addf %123, %137 : vector<1x64xf32>
    %139 = vector.extract_strided_slice %125 {offsets = [0, 1], sizes = [1, 63], strides = [1, 1]} : vector<1x64xf32> to vector<1x63xf32>
    %140 = vector.extract_strided_slice %125 {offsets = [0, 0], sizes = [1, 1], strides = [1, 1]} : vector<1x64xf32> to vector<1x1xf32>
    %141 = tpu.concatenate %139, %140 in 1 : vector<1x63xf32>, vector<1x1xf32> -> vector<1x64xf32>
    %142 = vector.extract_strided_slice %125 {offsets = [0, 63], sizes = [1, 1], strides = [1, 1]} : vector<1x64xf32> to vector<1x1xf32>
    %143 = vector.extract_strided_slice %125 {offsets = [0, 0], sizes = [1, 63], strides = [1, 1]} : vector<1x64xf32> to vector<1x63xf32>
    %144 = tpu.concatenate %142, %143 in 1 : vector<1x1xf32>, vector<1x63xf32> -> vector<1x64xf32>
    %145 = arith.select %130, %141, %144 : vector<1x64xi1>, vector<1x64xf32>
    %146 = arith.addf %125, %145 : vector<1x64xf32>
    %cst_43 = arith.constant 1.280000e+02 : f32
    %147 = vector.broadcast %cst_43 : f32 to vector<1x64xf32>
    %148 = arith.divf %138, %147 : vector<1x64xf32>
    %cst_44 = arith.constant 1.280000e+02 : f32
    %149 = vector.broadcast %cst_44 : f32 to vector<1x64xf32>
    %150 = arith.divf %146, %149 : vector<1x64xf32>
    %151 = arith.mulf %148, %148 : vector<1x64xf32>
    %152 = arith.subf %150, %151 : vector<1x64xf32>
    %cst_45 = arith.constant 0.000000e+00 : f32
    %153 = vector.broadcast %cst_45 : f32 to vector<1x64xf32>
    %154 = arith.maximumf %152, %153 : vector<1x64xf32>
    %cst_46 = arith.constant 9.99999974E-6 : f32
    %155 = vector.broadcast %cst_46 : f32 to vector<1x64xf32>
    %156 = arith.addf %154, %155 : vector<1x64xf32>
    %157 = math.rsqrt %156 : vector<1x64xf32>
    %158 = vector.shape_cast %148 : vector<1x64xf32> to vector<1x1x64xf32>
    %159 = vector.broadcast %158 : vector<1x1x64xf32> to vector<1x64x64xf32>
    %160 = arith.subf %120, %159 : vector<1x64x64xf32>
    %161 = vector.shape_cast %157 : vector<1x64xf32> to vector<1x1x64xf32>
    %162 = vector.broadcast %161 : vector<1x1x64xf32> to vector<1x64x64xf32>
    %163 = arith.mulf %160, %162 : vector<1x64x64xf32>
    %164 = vector.shape_cast %121 : vector<1x64xf32> to vector<1x1x64xf32>
    %165 = vector.broadcast %164 : vector<1x1x64xf32> to vector<1x64x64xf32>
    %166 = arith.mulf %163, %165 : vector<1x64x64xf32>
    %167 = vector.shape_cast %122 : vector<1x64xf32> to vector<1x1x64xf32>
    %168 = vector.broadcast %167 : vector<1x1x64xf32> to vector<1x64x64xf32>
    %169 = arith.addf %166, %168 : vector<1x64x64xf32>
    %170 = arith.negf %169 : vector<1x64x64xf32>
    %171 = math.exp %170 : vector<1x64x64xf32>
    %cst_47 = arith.constant 1.000000e+00 : f32
    %172 = vector.broadcast %cst_47 : f32 to vector<1x64x64xf32>
    %173 = arith.addf %172, %171 : vector<1x64x64xf32>
    %174 = arith.divf %172, %173 : vector<1x64x64xf32>
    %175 = arith.mulf %169, %174 : vector<1x64x64xf32>
    %176 = vector.shape_cast %175 : vector<1x64x64xf32> to vector<64x64xf32>
    %c0_48 = arith.constant 0 : index
    %c0_49 = arith.constant 0 : index
    %177 = vector.load %arg11[%c0_48, %c0_49] : memref<576x64xbf16, #tpu.memory_space<vmem>>, vector<576x64xbf16>
    %c9_i32_50 = arith.constant 9 : i32
    %178 = tpu.dynamic_rotate %176 by %c9_i32_50 dim 0 : vector<64x64xf32>, i32 -> vector<64x64xf32>
    %cst_51 = arith.constant 0.000000e+00 : f32
    %179 = vector.shape_cast %14 : vector<64x1xi1> to vector<64x1xi1>
    %180 = vector.broadcast %179 : vector<64x1xi1> to vector<64x64xi1>
    %181 = vector.broadcast %cst_51 : f32 to vector<64x64xf32>
    %182 = arith.select %180, %178, %181 : vector<64x64xi1>, vector<64x64xf32>
    %183 = arith.truncf %182 : vector<64x64xf32> to vector<64x64xbf16>
    %c8_i32_52 = arith.constant 8 : i32
    %184 = tpu.dynamic_rotate %176 by %c8_i32_52 dim 0 : vector<64x64xf32>, i32 -> vector<64x64xf32>
    %cst_53 = arith.constant 0.000000e+00 : f32
    %185 = vector.shape_cast %7 : vector<64x1xi1> to vector<64x1xi1>
    %186 = vector.broadcast %185 : vector<64x1xi1> to vector<64x64xi1>
    %187 = vector.broadcast %cst_53 : f32 to vector<64x64xf32>
    %188 = arith.select %186, %184, %187 : vector<64x64xi1>, vector<64x64xf32>
    %189 = arith.truncf %188 : vector<64x64xf32> to vector<64x64xbf16>
    %c7_i32_54 = arith.constant 7 : i32
    %190 = tpu.dynamic_rotate %176 by %c7_i32_54 dim 0 : vector<64x64xf32>, i32 -> vector<64x64xf32>
    %cst_55 = arith.constant 0.000000e+00 : f32
    %191 = vector.shape_cast %15 : vector<64x1xi1> to vector<64x1xi1>
    %192 = vector.broadcast %191 : vector<64x1xi1> to vector<64x64xi1>
    %193 = vector.broadcast %cst_55 : f32 to vector<64x64xf32>
    %194 = arith.select %192, %190, %193 : vector<64x64xi1>, vector<64x64xf32>
    %195 = arith.truncf %194 : vector<64x64xf32> to vector<64x64xbf16>
    %196 = tpu.concatenate %183, %189, %195 in 1 : vector<64x64xbf16>, vector<64x64xbf16>, vector<64x64xbf16> -> vector<64x192xbf16>
    %197 = vector.extract_strided_slice %177 {offsets = [0, 0], sizes = [192, 64], strides = [1, 1]} : vector<576x64xbf16> to vector<192x64xbf16>
    %cst_56 = arith.constant dense<0.000000e+00> : vector<64x64xf32>
    %198 = tpu.matmul %196, %197, %cst_56 {dimension_numbers = #tpu.dot_dimension_numbers<[1], [0], [0], [1], [0, 0, 1, 1], [], []>} : vector<64x192xbf16>, vector<192x64xbf16>, vector<64x64xf32> -> vector<64x64xf32>
    %c1_i32_57 = arith.constant 1 : i32
    %199 = tpu.dynamic_rotate %176 by %c1_i32_57 dim 0 : vector<64x64xf32>, i32 -> vector<64x64xf32>
    %cst_58 = arith.constant 0.000000e+00 : f32
    %200 = vector.shape_cast %11 : vector<64x1xi1> to vector<64x1xi1>
    %201 = vector.broadcast %200 : vector<64x1xi1> to vector<64x64xi1>
    %202 = vector.broadcast %cst_58 : f32 to vector<64x64xf32>
    %203 = arith.select %201, %199, %202 : vector<64x64xi1>, vector<64x64xf32>
    %204 = arith.truncf %203 : vector<64x64xf32> to vector<64x64xbf16>
    %205 = arith.truncf %176 : vector<64x64xf32> to vector<64x64xbf16>
    %c63_i32_59 = arith.constant 63 : i32
    %206 = tpu.dynamic_rotate %176 by %c63_i32_59 dim 0 : vector<64x64xf32>, i32 -> vector<64x64xf32>
    %cst_60 = arith.constant 0.000000e+00 : f32
    %207 = vector.shape_cast %13 : vector<64x1xi1> to vector<64x1xi1>
    %208 = vector.broadcast %207 : vector<64x1xi1> to vector<64x64xi1>
    %209 = vector.broadcast %cst_60 : f32 to vector<64x64xf32>
    %210 = arith.select %208, %206, %209 : vector<64x64xi1>, vector<64x64xf32>
    %211 = arith.truncf %210 : vector<64x64xf32> to vector<64x64xbf16>
    %212 = tpu.concatenate %204, %205, %211 in 1 : vector<64x64xbf16>, vector<64x64xbf16>, vector<64x64xbf16> -> vector<64x192xbf16>
    %213 = vector.extract_strided_slice %177 {offsets = [192, 0], sizes = [192, 64], strides = [1, 1]} : vector<576x64xbf16> to vector<192x64xbf16>
    %cst_61 = arith.constant dense<0.000000e+00> : vector<64x64xf32>
    %214 = tpu.matmul %212, %213, %cst_61 {dimension_numbers = #tpu.dot_dimension_numbers<[1], [0], [0], [1], [0, 0, 1, 1], [], []>} : vector<64x192xbf16>, vector<192x64xbf16>, vector<64x64xf32> -> vector<64x64xf32>
    %215 = arith.addf %198, %214 : vector<64x64xf32>
    %c57_i32_62 = arith.constant 57 : i32
    %216 = tpu.dynamic_rotate %176 by %c57_i32_62 dim 0 : vector<64x64xf32>, i32 -> vector<64x64xf32>
    %cst_63 = arith.constant 0.000000e+00 : f32
    %217 = vector.shape_cast %16 : vector<64x1xi1> to vector<64x1xi1>
    %218 = vector.broadcast %217 : vector<64x1xi1> to vector<64x64xi1>
    %219 = vector.broadcast %cst_63 : f32 to vector<64x64xf32>
    %220 = arith.select %218, %216, %219 : vector<64x64xi1>, vector<64x64xf32>
    %221 = arith.truncf %220 : vector<64x64xf32> to vector<64x64xbf16>
    %c56_i32_64 = arith.constant 56 : i32
    %222 = tpu.dynamic_rotate %176 by %c56_i32_64 dim 0 : vector<64x64xf32>, i32 -> vector<64x64xf32>
    %cst_65 = arith.constant 0.000000e+00 : f32
    %223 = vector.shape_cast %9 : vector<64x1xi1> to vector<64x1xi1>
    %224 = vector.broadcast %223 : vector<64x1xi1> to vector<64x64xi1>
    %225 = vector.broadcast %cst_65 : f32 to vector<64x64xf32>
    %226 = arith.select %224, %222, %225 : vector<64x64xi1>, vector<64x64xf32>
    %227 = arith.truncf %226 : vector<64x64xf32> to vector<64x64xbf16>
    %c55_i32_66 = arith.constant 55 : i32
    %228 = tpu.dynamic_rotate %176 by %c55_i32_66 dim 0 : vector<64x64xf32>, i32 -> vector<64x64xf32>
    %cst_67 = arith.constant 0.000000e+00 : f32
    %229 = vector.shape_cast %17 : vector<64x1xi1> to vector<64x1xi1>
    %230 = vector.broadcast %229 : vector<64x1xi1> to vector<64x64xi1>
    %231 = vector.broadcast %cst_67 : f32 to vector<64x64xf32>
    %232 = arith.select %230, %228, %231 : vector<64x64xi1>, vector<64x64xf32>
    %233 = arith.truncf %232 : vector<64x64xf32> to vector<64x64xbf16>
    %234 = tpu.concatenate %221, %227, %233 in 1 : vector<64x64xbf16>, vector<64x64xbf16>, vector<64x64xbf16> -> vector<64x192xbf16>
    %235 = vector.extract_strided_slice %177 {offsets = [384, 0], sizes = [192, 64], strides = [1, 1]} : vector<576x64xbf16> to vector<192x64xbf16>
    %cst_68 = arith.constant dense<0.000000e+00> : vector<64x64xf32>
    %236 = tpu.matmul %234, %235, %cst_68 {dimension_numbers = #tpu.dot_dimension_numbers<[1], [0], [0], [1], [0, 0, 1, 1], [], []>} : vector<64x192xbf16>, vector<192x64xbf16>, vector<64x64xf32> -> vector<64x64xf32>
    %237 = arith.addf %215, %236 : vector<64x64xf32>
    %c0_69 = arith.constant 0 : index
    %c0_70 = arith.constant 0 : index
    %238 = vector.load %arg12[%c0_69, %c0_70] : memref<1x64xf32, #tpu.memory_space<vmem>>, vector<1x64xf32>
    %239 = vector.broadcast %238 : vector<1x64xf32> to vector<64x64xf32>
    %240 = arith.addf %237, %239 : vector<64x64xf32>
    %241 = vector.shape_cast %0 : vector<1x64x32xf32> to vector<64x32xf32>
    %242 = arith.truncf %241 : vector<64x32xf32> to vector<64x32xbf16>
    %c0_71 = arith.constant 0 : index
    %c0_72 = arith.constant 0 : index
    %243 = vector.load %arg13[%c0_71, %c0_72] : memref<32x64xbf16, #tpu.memory_space<vmem>>, vector<32x64xbf16>
    %cst_73 = arith.constant dense<0.000000e+00> : vector<64x64xf32>
    %244 = tpu.matmul %242, %243, %cst_73 {dimension_numbers = #tpu.dot_dimension_numbers<[1], [0], [0], [1], [0, 0, 1, 1], [], []>} : vector<64x32xbf16>, vector<32x64xbf16>, vector<64x64xf32> -> vector<64x64xf32>
    %c0_74 = arith.constant 0 : index
    %c0_75 = arith.constant 0 : index
    %245 = vector.load %arg14[%c0_74, %c0_75] : memref<1x64xf32, #tpu.memory_space<vmem>>, vector<1x64xf32>
    %246 = vector.broadcast %245 : vector<1x64xf32> to vector<64x64xf32>
    %247 = arith.addf %244, %246 : vector<64x64xf32>
    %248 = arith.addf %240, %247 : vector<64x64xf32>
    %249 = vector.shape_cast %248 : vector<64x64xf32> to vector<1x64x64xf32>
    %c0_76 = arith.constant 0 : index
    %c0_77 = arith.constant 0 : index
    %c0_78 = arith.constant 0 : index
    %250 = vector.load %arg15[%c0_76, %c0_77, %c0_78] : memref<1x64x64xf32, #tpu.memory_space<vmem>>, vector<1x64x64xf32>
    tpu.vector_store %arg15[%c0_76, %c0_77, %c0_78], %249 {strides = array<i32>} : memref<1x64x64xf32, #tpu.memory_space<vmem>>, vector<1x64x64xf32>,
    return
  }
  func.func @transform_0(%arg0: i32) -> (i32, i32, i32) {
    %c0_i32 = arith.constant 0 : i32
    %c0_i32_0 = arith.constant 0 : i32
    %c0_i32_1 = arith.constant 0 : i32
    return %arg0, %c0_i32, %c0_i32_0 : i32, i32, i32
  }
  func.func @transform_1(%arg0: i32) -> (i32, i32, i32) {
    %c0_i32 = arith.constant 0 : i32
    %c0_i32_0 = arith.constant 0 : i32
    %c0_i32_1 = arith.constant 0 : i32
    return %arg0, %c0_i32, %c0_i32_0 : i32, i32, i32
  }
  func.func @transform_2(%arg0: i32) -> (i32, i32) {
    %c0_i32 = arith.constant 0 : i32
    %c0_i32_0 = arith.constant 0 : i32
    %c0_i32_1 = arith.constant 0 : i32
    return %c0_i32, %c0_i32_0 : i32, i32
  }
  func.func @transform_3(%arg0: i32) -> (i32, i32) {
    %c0_i32 = arith.constant 0 : i32
    %c0_i32_0 = arith.constant 0 : i32
    %c0_i32_1 = arith.constant 0 : i32
    return %c0_i32, %c0_i32_0 : i32, i32
  }
  func.func @transform_4(%arg0: i32) -> (i32, i32) {
    %c0_i32 = arith.constant 0 : i32
    %c0_i32_0 = arith.constant 0 : i32
    %c0_i32_1 = arith.constant 0 : i32
    return %c0_i32, %c0_i32_0 : i32, i32
  }
  func.func @transform_5(%arg0: i32) -> (i32, i32) {
    %c0_i32 = arith.constant 0 : i32
    %c0_i32_0 = arith.constant 0 : i32
    %c0_i32_1 = arith.constant 0 : i32
    return %c0_i32, %c0_i32_0 : i32, i32
  }
  func.func @transform_6(%arg0: i32) -> (i32, i32) {
    %c0_i32 = arith.constant 0 : i32
    %c0_i32_0 = arith.constant 0 : i32
    %c0_i32_1 = arith.constant 0 : i32
    return %c0_i32, %c0_i32_0 : i32, i32
  }
  func.func @transform_7(%arg0: i32) -> (i32, i32) {
    %c0_i32 = arith.constant 0 : i32
    %c0_i32_0 = arith.constant 0 : i32
    %c0_i32_1 = arith.constant 0 : i32
    return %c0_i32, %c0_i32_0 : i32, i32
  }
  func.func @transform_8(%arg0: i32) -> (i32, i32) {
    %c0_i32 = arith.constant 0 : i32
    %c0_i32_0 = arith.constant 0 : i32
    %c0_i32_1 = arith.constant 0 : i32
    return %c0_i32, %c0_i32_0 : i32, i32
  }
  func.func @transform_9(%arg0: i32) -> (i32, i32) {
    %c0_i32 = arith.constant 0 : i32
    %c0_i32_0 = arith.constant 0 : i32
    %c0_i32_1 = arith.constant 0 : i32
    return %c0_i32, %c0_i32_0 : i32, i32
  }
  func.func @transform_10(%arg0: i32) -> (i32, i32) {
    %c0_i32 = arith.constant 0 : i32
    %c0_i32_0 = arith.constant 0 : i32
    %c0_i32_1 = arith.constant 0 : i32
    return %c0_i32, %c0_i32_0 : i32, i32
  }
  func.func @transform_11(%arg0: i32) -> (i32, i32) {
    %c0_i32 = arith.constant 0 : i32
    %c0_i32_0 = arith.constant 0 : i32
    %c0_i32_1 = arith.constant 0 : i32
    return %c0_i32, %c0_i32_0 : i32, i32
  }
  func.func @transform_12(%arg0: i32) -> (i32, i32) {
    %c0_i32 = arith.constant 0 : i32
    %c0_i32_0 = arith.constant 0 : i32
    %c0_i32_1 = arith.constant 0 : i32
    return %c0_i32, %c0_i32_0 : i32, i32
  }
  func.func @transform_13(%arg0: i32) -> (i32, i32) {
    %c0_i32 = arith.constant 0 : i32
    %c0_i32_0 = arith.constant 0 : i32
    %c0_i32_1 = arith.constant 0 : i32
    return %c0_i32, %c0_i32_0 : i32, i32
  }
  func.func @transform_14(%arg0: i32) -> (i32, i32, i32) {
    %c0_i32 = arith.constant 0 : i32
    %c0_i32_0 = arith.constant 0 : i32
    %c0_i32_1 = arith.constant 0 : i32
    return %arg0, %c0_i32, %c0_i32_0 : i32, i32, i32
  }
}

module attributes {stable_mosaic.version = 11 : i64} {
  func.func @kernel(%arg0: i32, %arg1: memref<1x64x32xf32, #tpu.memory_space<vmem>>, %arg2: memref<1x1x64xf32, #tpu.memory_space<vmem>>, %arg3: memref<1x32xf32, #tpu.memory_space<vmem>>, %arg4: memref<1x32xf32, #tpu.memory_space<vmem>>, %arg5: memref<1x1xf32, #tpu.memory_space<vmem>>, %arg6: memref<288x64xbf16, #tpu.memory_space<vmem>>, %arg7: memref<1x64xf32, #tpu.memory_space<vmem>>, %arg8: memref<1x64xf32, #tpu.memory_space<vmem>>, %arg9: memref<1x64xf32, #tpu.memory_space<vmem>>, %arg10: memref<1x1xf32, #tpu.memory_space<vmem>>, %arg11: memref<576x64xbf16, #tpu.memory_space<vmem>>, %arg12: memref<1x64xf32, #tpu.memory_space<vmem>>, %arg13: memref<32x64xbf16, #tpu.memory_space<vmem>>, %arg14: memref<1x64xf32, #tpu.memory_space<vmem>>, %arg15: memref<1x64x64xf32, #tpu.memory_space<vmem>>) attributes {dimension_semantics = [#tpu.dimension_semantics<parallel>], iteration_bounds = array<i64: 2>, scalar_prefetch = 0 : i64, scratch_operands = 0 : i64, tpu.core_type = #tpu.core_type<tc>, window_params = [{transform_indices = @transform_0, window_bounds = array<i64: 1, 64, 32>}, {transform_indices = @transform_1, window_bounds = array<i64: 1, 1, 64>}, {pipeline_mode = #tpu.pipeline_mode<synchronous>, transform_indices = @transform_2, window_bounds = array<i64: 1, 32>}, {pipeline_mode = #tpu.pipeline_mode<synchronous>, transform_indices = @transform_3, window_bounds = array<i64: 1, 32>}, {pipeline_mode = #tpu.pipeline_mode<synchronous>, transform_indices = @transform_4, window_bounds = array<i64: 1, 1>}, {pipeline_mode = #tpu.pipeline_mode<synchronous>, transform_indices = @transform_5, window_bounds = array<i64: 288, 64>}, {pipeline_mode = #tpu.pipeline_mode<synchronous>, transform_indices = @transform_6, window_bounds = array<i64: 1, 64>}, {pipeline_mode = #tpu.pipeline_mode<synchronous>, transform_indices = @transform_7, window_bounds = array<i64: 1, 64>}, {pipeline_mode = #tpu.pipeline_mode<synchronous>, transform_indices = @transform_8, window_bounds = array<i64: 1, 64>}, {pipeline_mode = #tpu.pipeline_mode<synchronous>, transform_indices = @transform_9, window_bounds = array<i64: 1, 1>}, {pipeline_mode = #tpu.pipeline_mode<synchronous>, transform_indices = @transform_10, window_bounds = array<i64: 576, 64>}, {pipeline_mode = #tpu.pipeline_mode<synchronous>, transform_indices = @transform_11, window_bounds = array<i64: 1, 64>}, {pipeline_mode = #tpu.pipeline_mode<synchronous>, transform_indices = @transform_12, window_bounds = array<i64: 32, 64>}, {pipeline_mode = #tpu.pipeline_mode<synchronous>, transform_indices = @transform_13, window_bounds = array<i64: 1, 64>}, {transform_indices = @transform_14, window_bounds = array<i64: 1, 64, 64>}]} {
    %c0 = arith.constant 0 : index
    %c0_0 = arith.constant 0 : index
    %c0_1 = arith.constant 0 : index
    %0 = vector.load %arg1[%c0, %c0_0, %c0_1] : memref<1x64x32xf32, #tpu.memory_space<vmem>>, vector<1x64x32xf32>
    %1 = tpu.iota {dimensions = array<i32: 0>} : vector<64x1xi32>
    %c63_i32 = arith.constant 63 : i32
    %2 = vector.broadcast %c63_i32 : i32 to vector<64x1xi32>
    %3 = arith.andi %1, %2 : vector<64x1xi32>
    %c7_i32 = arith.constant 7 : i32
    %4 = vector.broadcast %c7_i32 : i32 to vector<64x1xi32>
    %5 = arith.andi %1, %4 : vector<64x1xi32>
    %c8_i32 = arith.constant 8 : i32
    %6 = vector.broadcast %c8_i32 : i32 to vector<64x1xi32>
    %7 = arith.cmpi sge, %3, %6 : vector<64x1xi32>
    %c56_i32 = arith.constant 56 : i32
    %8 = vector.broadcast %c56_i32 : i32 to vector<64x1xi32>
    %9 = arith.cmpi slt, %3, %8 : vector<64x1xi32>
    %c0_i32 = arith.constant 0 : i32
    %10 = vector.broadcast %c0_i32 : i32 to vector<64x1xi32>
    %11 = arith.cmpi ne, %5, %10 : vector<64x1xi32>
    %c7_i32_2 = arith.constant 7 : i32
    %12 = vector.broadcast %c7_i32_2 : i32 to vector<64x1xi32>
    %13 = arith.cmpi ne, %5, %12 : vector<64x1xi32>
    %14 = arith.andi %7, %11 : vector<64x1xi1>
    %15 = arith.andi %7, %13 : vector<64x1xi1>
    %16 = arith.andi %9, %11 : vector<64x1xi1>
    %17 = arith.andi %9, %13 : vector<64x1xi1>
    %c0_3 = arith.constant 0 : index
    %c0_4 = arith.constant 0 : index
    %18 = vector.load %arg3[%c0_3, %c0_4] : memref<1x32xf32, #tpu.memory_space<vmem>>, vector<1x32xf32>
    %c0_5 = arith.constant 0 : index
    %c0_6 = arith.constant 0 : index
    %19 = vector.load %arg4[%c0_5, %c0_6] : memref<1x32xf32, #tpu.memory_space<vmem>>, vector<1x32xf32>
    %cst = arith.constant dense<0.000000e+00> : vector<1x32xf32>
    %20 = vector.multi_reduction <add>, %0, %cst [1] : vector<1x64x32xf32> to vector<1x32xf32>
    %21 = arith.mulf %0, %0 : vector<1x64x32xf32>
    %cst_7 = arith.constant dense<0.000000e+00> : vector<1x32xf32>
    %22 = vector.multi_reduction <add>, %21, %cst_7 [1] : vector<1x64x32xf32> to vector<1x32xf32>
    %cst_8 = arith.constant 6.400000e+01 : f32
    %23 = vector.broadcast %cst_8 : f32 to vector<1x32xf32>
    %24 = arith.divf %20, %23 : vector<1x32xf32>
    %cst_9 = arith.constant 6.400000e+01 : f32
    %25 = vector.broadcast %cst_9 : f32 to vector<1x32xf32>
    %26 = arith.divf %22, %25 : vector<1x32xf32>
    %27 = arith.mulf %24, %24 : vector<1x32xf32>
    %28 = arith.subf %26, %27 : vector<1x32xf32>
    %cst_10 = arith.constant 0.000000e+00 : f32
    %29 = vector.broadcast %cst_10 : f32 to vector<1x32xf32>
    %30 = arith.maximumf %28, %29 : vector<1x32xf32>
    %cst_11 = arith.constant 9.99999974E-6 : f32
    %31 = vector.broadcast %cst_11 : f32 to vector<1x32xf32>
    %32 = arith.addf %30, %31 : vector<1x32xf32>
    %33 = math.rsqrt %32 : vector<1x32xf32>
    %34 = vector.shape_cast %24 : vector<1x32xf32> to vector<1x1x32xf32>
    %35 = vector.broadcast %34 : vector<1x1x32xf32> to vector<1x64x32xf32>
    %36 = arith.subf %0, %35 : vector<1x64x32xf32>
    %37 = vector.shape_cast %33 : vector<1x32xf32> to vector<1x1x32xf32>
    %38 = vector.broadcast %37 : vector<1x1x32xf32> to vector<1x64x32xf32>
    %39 = arith.mulf %36, %38 : vector<1x64x32xf32>
    %40 = vector.shape_cast %18 : vector<1x32xf32> to vector<1x1x32xf32>
    %41 = vector.broadcast %40 : vector<1x1x32xf32> to vector<1x64x32xf32>
    %42 = arith.mulf %39, %41 : vector<1x64x32xf32>
    %43 = vector.shape_cast %19 : vector<1x32xf32> to vector<1x1x32xf32>
    %44 = vector.broadcast %43 : vector<1x1x32xf32> to vector<1x64x32xf32>
    %45 = arith.addf %42, %44 : vector<1x64x32xf32>
    %46 = arith.negf %45 : vector<1x64x32xf32>
    %47 = math.exp %46 : vector<1x64x32xf32>
    %cst_12 = arith.constant 1.000000e+00 : f32
    %48 = vector.broadcast %cst_12 : f32 to vector<1x64x32xf32>
    %49 = arith.addf %48, %47 : vector<1x64x32xf32>
    %50 = arith.divf %48, %49 : vector<1x64x32xf32>
    %51 = arith.mulf %45, %50 : vector<1x64x32xf32>
    %52 = vector.shape_cast %51 : vector<1x64x32xf32> to vector<64x32xf32>
    %c0_13 = arith.constant 0 : index
    %c0_14 = arith.constant 0 : index
    %53 = vector.load %arg6[%c0_13, %c0_14] : memref<288x64xbf16, #tpu.memory_space<vmem>>, vector<288x64xbf16>
    %54 = vector.extract_strided_slice %52 {offsets = [55, 0], sizes = [9, 32], strides = [1, 1]} : vector<64x32xf32> to vector<9x32xf32>
    %55 = vector.extract_strided_slice %52 {offsets = [0, 0], sizes = [55, 32], strides = [1, 1]} : vector<64x32xf32> to vector<55x32xf32>
    %56 = tpu.concatenate %54, %55 in 0 : vector<9x32xf32>, vector<55x32xf32> -> vector<64x32xf32>
    %cst_15 = arith.constant 0.000000e+00 : f32
    %57 = vector.shape_cast %14 : vector<64x1xi1> to vector<64x1xi1>
    %58 = vector.broadcast %57 : vector<64x1xi1> to vector<64x32xi1>
    %59 = vector.broadcast %cst_15 : f32 to vector<64x32xf32>
    %60 = arith.select %58, %56, %59 : vector<64x32xi1>, vector<64x32xf32>
    %61 = arith.truncf %60 : vector<64x32xf32> to vector<64x32xbf16>
    %62 = vector.extract_strided_slice %52 {offsets = [56, 0], sizes = [8, 32], strides = [1, 1]} : vector<64x32xf32> to vector<8x32xf32>
    %63 = vector.extract_strided_slice %52 {offsets = [0, 0], sizes = [56, 32], strides = [1, 1]} : vector<64x32xf32> to vector<56x32xf32>
    %64 = tpu.concatenate %62, %63 in 0 : vector<8x32xf32>, vector<56x32xf32> -> vector<64x32xf32>
    %cst_16 = arith.constant 0.000000e+00 : f32
    %65 = vector.shape_cast %7 : vector<64x1xi1> to vector<64x1xi1>
    %66 = vector.broadcast %65 : vector<64x1xi1> to vector<64x32xi1>
    %67 = vector.broadcast %cst_16 : f32 to vector<64x32xf32>
    %68 = arith.select %66, %64, %67 : vector<64x32xi1>, vector<64x32xf32>
    %69 = arith.truncf %68 : vector<64x32xf32> to vector<64x32xbf16>
    %70 = vector.extract_strided_slice %52 {offsets = [57, 0], sizes = [7, 32], strides = [1, 1]} : vector<64x32xf32> to vector<7x32xf32>
    %71 = vector.extract_strided_slice %52 {offsets = [0, 0], sizes = [57, 32], strides = [1, 1]} : vector<64x32xf32> to vector<57x32xf32>
    %72 = tpu.concatenate %70, %71 in 0 : vector<7x32xf32>, vector<57x32xf32> -> vector<64x32xf32>
    %cst_17 = arith.constant 0.000000e+00 : f32
    %73 = vector.shape_cast %15 : vector<64x1xi1> to vector<64x1xi1>
    %74 = vector.broadcast %73 : vector<64x1xi1> to vector<64x32xi1>
    %75 = vector.broadcast %cst_17 : f32 to vector<64x32xf32>
    %76 = arith.select %74, %72, %75 : vector<64x32xi1>, vector<64x32xf32>
    %77 = arith.truncf %76 : vector<64x32xf32> to vector<64x32xbf16>
    %78 = tpu.concatenate %61, %69, %77 in 1 : vector<64x32xbf16>, vector<64x32xbf16>, vector<64x32xbf16> -> vector<64x96xbf16>
    %79 = vector.extract_strided_slice %53 {offsets = [0, 0], sizes = [96, 64], strides = [1, 1]} : vector<288x64xbf16> to vector<96x64xbf16>
    %cst_18 = arith.constant dense<0.000000e+00> : vector<64x64xf32>
    %80 = tpu.matmul %78, %79, %cst_18 {dimension_numbers = #tpu.dot_dimension_numbers<[1], [0], [0], [1], [0, 0, 1, 1], [], []>} : vector<64x96xbf16>, vector<96x64xbf16>, vector<64x64xf32> -> vector<64x64xf32>
    %81 = vector.extract_strided_slice %52 {offsets = [63, 0], sizes = [1, 32], strides = [1, 1]} : vector<64x32xf32> to vector<1x32xf32>
    %82 = vector.extract_strided_slice %52 {offsets = [0, 0], sizes = [63, 32], strides = [1, 1]} : vector<64x32xf32> to vector<63x32xf32>
    %83 = tpu.concatenate %81, %82 in 0 : vector<1x32xf32>, vector<63x32xf32> -> vector<64x32xf32>
    %cst_19 = arith.constant 0.000000e+00 : f32
    %84 = vector.shape_cast %11 : vector<64x1xi1> to vector<64x1xi1>
    %85 = vector.broadcast %84 : vector<64x1xi1> to vector<64x32xi1>
    %86 = vector.broadcast %cst_19 : f32 to vector<64x32xf32>
    %87 = arith.select %85, %83, %86 : vector<64x32xi1>, vector<64x32xf32>
    %88 = arith.truncf %87 : vector<64x32xf32> to vector<64x32xbf16>
    %89 = arith.truncf %52 : vector<64x32xf32> to vector<64x32xbf16>
    %90 = vector.extract_strided_slice %52 {offsets = [1, 0], sizes = [63, 32], strides = [1, 1]} : vector<64x32xf32> to vector<63x32xf32>
    %91 = vector.extract_strided_slice %52 {offsets = [0, 0], sizes = [1, 32], strides = [1, 1]} : vector<64x32xf32> to vector<1x32xf32>
    %92 = tpu.concatenate %90, %91 in 0 : vector<63x32xf32>, vector<1x32xf32> -> vector<64x32xf32>
    %cst_20 = arith.constant 0.000000e+00 : f32
    %93 = vector.shape_cast %13 : vector<64x1xi1> to vector<64x1xi1>
    %94 = vector.broadcast %93 : vector<64x1xi1> to vector<64x32xi1>
    %95 = vector.broadcast %cst_20 : f32 to vector<64x32xf32>
    %96 = arith.select %94, %92, %95 : vector<64x32xi1>, vector<64x32xf32>
    %97 = arith.truncf %96 : vector<64x32xf32> to vector<64x32xbf16>
    %98 = tpu.concatenate %88, %89, %97 in 1 : vector<64x32xbf16>, vector<64x32xbf16>, vector<64x32xbf16> -> vector<64x96xbf16>
    %99 = vector.extract_strided_slice %53 {offsets = [96, 0], sizes = [96, 64], strides = [1, 1]} : vector<288x64xbf16> to vector<96x64xbf16>
    %cst_21 = arith.constant dense<0.000000e+00> : vector<64x64xf32>
    %100 = tpu.matmul %98, %99, %cst_21 {dimension_numbers = #tpu.dot_dimension_numbers<[1], [0], [0], [1], [0, 0, 1, 1], [], []>} : vector<64x96xbf16>, vector<96x64xbf16>, vector<64x64xf32> -> vector<64x64xf32>
    %101 = arith.addf %80, %100 : vector<64x64xf32>
    %102 = vector.extract_strided_slice %52 {offsets = [7, 0], sizes = [57, 32], strides = [1, 1]} : vector<64x32xf32> to vector<57x32xf32>
    %103 = vector.extract_strided_slice %52 {offsets = [0, 0], sizes = [7, 32], strides = [1, 1]} : vector<64x32xf32> to vector<7x32xf32>
    %104 = tpu.concatenate %102, %103 in 0 : vector<57x32xf32>, vector<7x32xf32> -> vector<64x32xf32>
    %cst_22 = arith.constant 0.000000e+00 : f32
    %105 = vector.shape_cast %16 : vector<64x1xi1> to vector<64x1xi1>
    %106 = vector.broadcast %105 : vector<64x1xi1> to vector<64x32xi1>
    %107 = vector.broadcast %cst_22 : f32 to vector<64x32xf32>
    %108 = arith.select %106, %104, %107 : vector<64x32xi1>, vector<64x32xf32>
    %109 = arith.truncf %108 : vector<64x32xf32> to vector<64x32xbf16>
    %110 = vector.extract_strided_slice %52 {offsets = [8, 0], sizes = [56, 32], strides = [1, 1]} : vector<64x32xf32> to vector<56x32xf32>
    %111 = vector.extract_strided_slice %52 {offsets = [0, 0], sizes = [8, 32], strides = [1, 1]} : vector<64x32xf32> to vector<8x32xf32>
    %112 = tpu.concatenate %110, %111 in 0 : vector<56x32xf32>, vector<8x32xf32> -> vector<64x32xf32>
    %cst_23 = arith.constant 0.000000e+00 : f32
    %113 = vector.shape_cast %9 : vector<64x1xi1> to vector<64x1xi1>
    %114 = vector.broadcast %113 : vector<64x1xi1> to vector<64x32xi1>
    %115 = vector.broadcast %cst_23 : f32 to vector<64x32xf32>
    %116 = arith.select %114, %112, %115 : vector<64x32xi1>, vector<64x32xf32>
    %117 = arith.truncf %116 : vector<64x32xf32> to vector<64x32xbf16>
    %118 = vector.extract_strided_slice %52 {offsets = [9, 0], sizes = [55, 32], strides = [1, 1]} : vector<64x32xf32> to vector<55x32xf32>
    %119 = vector.extract_strided_slice %52 {offsets = [0, 0], sizes = [9, 32], strides = [1, 1]} : vector<64x32xf32> to vector<9x32xf32>
    %120 = tpu.concatenate %118, %119 in 0 : vector<55x32xf32>, vector<9x32xf32> -> vector<64x32xf32>
    %cst_24 = arith.constant 0.000000e+00 : f32
    %121 = vector.shape_cast %17 : vector<64x1xi1> to vector<64x1xi1>
    %122 = vector.broadcast %121 : vector<64x1xi1> to vector<64x32xi1>
    %123 = vector.broadcast %cst_24 : f32 to vector<64x32xf32>
    %124 = arith.select %122, %120, %123 : vector<64x32xi1>, vector<64x32xf32>
    %125 = arith.truncf %124 : vector<64x32xf32> to vector<64x32xbf16>
    %126 = tpu.concatenate %109, %117, %125 in 1 : vector<64x32xbf16>, vector<64x32xbf16>, vector<64x32xbf16> -> vector<64x96xbf16>
    %127 = vector.extract_strided_slice %53 {offsets = [192, 0], sizes = [96, 64], strides = [1, 1]} : vector<288x64xbf16> to vector<96x64xbf16>
    %cst_25 = arith.constant dense<0.000000e+00> : vector<64x64xf32>
    %128 = tpu.matmul %126, %127, %cst_25 {dimension_numbers = #tpu.dot_dimension_numbers<[1], [0], [0], [1], [0, 0, 1, 1], [], []>} : vector<64x96xbf16>, vector<96x64xbf16>, vector<64x64xf32> -> vector<64x64xf32>
    %129 = arith.addf %101, %128 : vector<64x64xf32>
    %c0_26 = arith.constant 0 : index
    %c0_27 = arith.constant 0 : index
    %130 = vector.load %arg7[%c0_26, %c0_27] : memref<1x64xf32, #tpu.memory_space<vmem>>, vector<1x64xf32>
    %131 = vector.broadcast %130 : vector<1x64xf32> to vector<64x64xf32>
    %132 = arith.addf %129, %131 : vector<64x64xf32>
    %133 = vector.shape_cast %132 : vector<64x64xf32> to vector<1x64x64xf32>
    %c0_28 = arith.constant 0 : index
    %c0_29 = arith.constant 0 : index
    %c0_30 = arith.constant 0 : index
    %134 = vector.load %arg2[%c0_28, %c0_29, %c0_30] : memref<1x1x64xf32, #tpu.memory_space<vmem>>, vector<1x1x64xf32>
    %135 = vector.broadcast %134 : vector<1x1x64xf32> to vector<1x64x64xf32>
    %136 = arith.addf %133, %135 : vector<1x64x64xf32>
    %c0_31 = arith.constant 0 : index
    %c0_32 = arith.constant 0 : index
    %137 = vector.load %arg8[%c0_31, %c0_32] : memref<1x64xf32, #tpu.memory_space<vmem>>, vector<1x64xf32>
    %c0_33 = arith.constant 0 : index
    %c0_34 = arith.constant 0 : index
    %138 = vector.load %arg9[%c0_33, %c0_34] : memref<1x64xf32, #tpu.memory_space<vmem>>, vector<1x64xf32>
    %cst_35 = arith.constant dense<0.000000e+00> : vector<1x64xf32>
    %139 = vector.multi_reduction <add>, %136, %cst_35 [1] : vector<1x64x64xf32> to vector<1x64xf32>
    %140 = arith.mulf %136, %136 : vector<1x64x64xf32>
    %cst_36 = arith.constant dense<0.000000e+00> : vector<1x64xf32>
    %141 = vector.multi_reduction <add>, %140, %cst_36 [1] : vector<1x64x64xf32> to vector<1x64xf32>
    %142 = tpu.iota {dimensions = array<i32: 1>} : vector<1x64xi32>
    %c1_i32 = arith.constant 1 : i32
    %143 = vector.broadcast %c1_i32 : i32 to vector<1x64xi32>
    %144 = arith.andi %142, %143 : vector<1x64xi32>
    %c0_i32_37 = arith.constant 0 : i32
    %145 = vector.broadcast %c0_i32_37 : i32 to vector<1x64xi32>
    %146 = arith.cmpi eq, %144, %145 : vector<1x64xi32>
    %147 = vector.extract_strided_slice %139 {offsets = [0, 1], sizes = [1, 63], strides = [1, 1]} : vector<1x64xf32> to vector<1x63xf32>
    %148 = vector.extract_strided_slice %139 {offsets = [0, 0], sizes = [1, 1], strides = [1, 1]} : vector<1x64xf32> to vector<1x1xf32>
    %149 = tpu.concatenate %147, %148 in 1 : vector<1x63xf32>, vector<1x1xf32> -> vector<1x64xf32>
    %150 = vector.extract_strided_slice %139 {offsets = [0, 63], sizes = [1, 1], strides = [1, 1]} : vector<1x64xf32> to vector<1x1xf32>
    %151 = vector.extract_strided_slice %139 {offsets = [0, 0], sizes = [1, 63], strides = [1, 1]} : vector<1x64xf32> to vector<1x63xf32>
    %152 = tpu.concatenate %150, %151 in 1 : vector<1x1xf32>, vector<1x63xf32> -> vector<1x64xf32>
    %153 = arith.select %146, %149, %152 : vector<1x64xi1>, vector<1x64xf32>
    %154 = arith.addf %139, %153 : vector<1x64xf32>
    %155 = vector.extract_strided_slice %141 {offsets = [0, 1], sizes = [1, 63], strides = [1, 1]} : vector<1x64xf32> to vector<1x63xf32>
    %156 = vector.extract_strided_slice %141 {offsets = [0, 0], sizes = [1, 1], strides = [1, 1]} : vector<1x64xf32> to vector<1x1xf32>
    %157 = tpu.concatenate %155, %156 in 1 : vector<1x63xf32>, vector<1x1xf32> -> vector<1x64xf32>
    %158 = vector.extract_strided_slice %141 {offsets = [0, 63], sizes = [1, 1], strides = [1, 1]} : vector<1x64xf32> to vector<1x1xf32>
    %159 = vector.extract_strided_slice %141 {offsets = [0, 0], sizes = [1, 63], strides = [1, 1]} : vector<1x64xf32> to vector<1x63xf32>
    %160 = tpu.concatenate %158, %159 in 1 : vector<1x1xf32>, vector<1x63xf32> -> vector<1x64xf32>
    %161 = arith.select %146, %157, %160 : vector<1x64xi1>, vector<1x64xf32>
    %162 = arith.addf %141, %161 : vector<1x64xf32>
    %cst_38 = arith.constant 1.280000e+02 : f32
    %163 = vector.broadcast %cst_38 : f32 to vector<1x64xf32>
    %164 = arith.divf %154, %163 : vector<1x64xf32>
    %cst_39 = arith.constant 1.280000e+02 : f32
    %165 = vector.broadcast %cst_39 : f32 to vector<1x64xf32>
    %166 = arith.divf %162, %165 : vector<1x64xf32>
    %167 = arith.mulf %164, %164 : vector<1x64xf32>
    %168 = arith.subf %166, %167 : vector<1x64xf32>
    %cst_40 = arith.constant 0.000000e+00 : f32
    %169 = vector.broadcast %cst_40 : f32 to vector<1x64xf32>
    %170 = arith.maximumf %168, %169 : vector<1x64xf32>
    %cst_41 = arith.constant 9.99999974E-6 : f32
    %171 = vector.broadcast %cst_41 : f32 to vector<1x64xf32>
    %172 = arith.addf %170, %171 : vector<1x64xf32>
    %173 = math.rsqrt %172 : vector<1x64xf32>
    %174 = vector.shape_cast %164 : vector<1x64xf32> to vector<1x1x64xf32>
    %175 = vector.broadcast %174 : vector<1x1x64xf32> to vector<1x64x64xf32>
    %176 = arith.subf %136, %175 : vector<1x64x64xf32>
    %177 = vector.shape_cast %173 : vector<1x64xf32> to vector<1x1x64xf32>
    %178 = vector.broadcast %177 : vector<1x1x64xf32> to vector<1x64x64xf32>
    %179 = arith.mulf %176, %178 : vector<1x64x64xf32>
    %180 = vector.shape_cast %137 : vector<1x64xf32> to vector<1x1x64xf32>
    %181 = vector.broadcast %180 : vector<1x1x64xf32> to vector<1x64x64xf32>
    %182 = arith.mulf %179, %181 : vector<1x64x64xf32>
    %183 = vector.shape_cast %138 : vector<1x64xf32> to vector<1x1x64xf32>
    %184 = vector.broadcast %183 : vector<1x1x64xf32> to vector<1x64x64xf32>
    %185 = arith.addf %182, %184 : vector<1x64x64xf32>
    %186 = arith.negf %185 : vector<1x64x64xf32>
    %187 = math.exp %186 : vector<1x64x64xf32>
    %cst_42 = arith.constant 1.000000e+00 : f32
    %188 = vector.broadcast %cst_42 : f32 to vector<1x64x64xf32>
    %189 = arith.addf %188, %187 : vector<1x64x64xf32>
    %190 = arith.divf %188, %189 : vector<1x64x64xf32>
    %191 = arith.mulf %185, %190 : vector<1x64x64xf32>
    %192 = vector.shape_cast %191 : vector<1x64x64xf32> to vector<64x64xf32>
    %c0_43 = arith.constant 0 : index
    %c0_44 = arith.constant 0 : index
    %193 = vector.load %arg11[%c0_43, %c0_44] : memref<576x64xbf16, #tpu.memory_space<vmem>>, vector<576x64xbf16>
    %194 = vector.extract_strided_slice %192 {offsets = [55, 0], sizes = [9, 64], strides = [1, 1]} : vector<64x64xf32> to vector<9x64xf32>
    %195 = vector.extract_strided_slice %192 {offsets = [0, 0], sizes = [55, 64], strides = [1, 1]} : vector<64x64xf32> to vector<55x64xf32>
    %196 = tpu.concatenate %194, %195 in 0 : vector<9x64xf32>, vector<55x64xf32> -> vector<64x64xf32>
    %cst_45 = arith.constant 0.000000e+00 : f32
    %197 = vector.shape_cast %14 : vector<64x1xi1> to vector<64x1xi1>
    %198 = vector.broadcast %197 : vector<64x1xi1> to vector<64x64xi1>
    %199 = vector.broadcast %cst_45 : f32 to vector<64x64xf32>
    %200 = arith.select %198, %196, %199 : vector<64x64xi1>, vector<64x64xf32>
    %201 = arith.truncf %200 : vector<64x64xf32> to vector<64x64xbf16>
    %202 = vector.extract_strided_slice %192 {offsets = [56, 0], sizes = [8, 64], strides = [1, 1]} : vector<64x64xf32> to vector<8x64xf32>
    %203 = vector.extract_strided_slice %192 {offsets = [0, 0], sizes = [56, 64], strides = [1, 1]} : vector<64x64xf32> to vector<56x64xf32>
    %204 = tpu.concatenate %202, %203 in 0 : vector<8x64xf32>, vector<56x64xf32> -> vector<64x64xf32>
    %cst_46 = arith.constant 0.000000e+00 : f32
    %205 = vector.shape_cast %7 : vector<64x1xi1> to vector<64x1xi1>
    %206 = vector.broadcast %205 : vector<64x1xi1> to vector<64x64xi1>
    %207 = vector.broadcast %cst_46 : f32 to vector<64x64xf32>
    %208 = arith.select %206, %204, %207 : vector<64x64xi1>, vector<64x64xf32>
    %209 = arith.truncf %208 : vector<64x64xf32> to vector<64x64xbf16>
    %210 = vector.extract_strided_slice %192 {offsets = [57, 0], sizes = [7, 64], strides = [1, 1]} : vector<64x64xf32> to vector<7x64xf32>
    %211 = vector.extract_strided_slice %192 {offsets = [0, 0], sizes = [57, 64], strides = [1, 1]} : vector<64x64xf32> to vector<57x64xf32>
    %212 = tpu.concatenate %210, %211 in 0 : vector<7x64xf32>, vector<57x64xf32> -> vector<64x64xf32>
    %cst_47 = arith.constant 0.000000e+00 : f32
    %213 = vector.shape_cast %15 : vector<64x1xi1> to vector<64x1xi1>
    %214 = vector.broadcast %213 : vector<64x1xi1> to vector<64x64xi1>
    %215 = vector.broadcast %cst_47 : f32 to vector<64x64xf32>
    %216 = arith.select %214, %212, %215 : vector<64x64xi1>, vector<64x64xf32>
    %217 = arith.truncf %216 : vector<64x64xf32> to vector<64x64xbf16>
    %218 = tpu.concatenate %201, %209, %217 in 1 : vector<64x64xbf16>, vector<64x64xbf16>, vector<64x64xbf16> -> vector<64x192xbf16>
    %219 = vector.extract_strided_slice %193 {offsets = [0, 0], sizes = [192, 64], strides = [1, 1]} : vector<576x64xbf16> to vector<192x64xbf16>
    %cst_48 = arith.constant dense<0.000000e+00> : vector<64x64xf32>
    %220 = tpu.matmul %218, %219, %cst_48 {dimension_numbers = #tpu.dot_dimension_numbers<[1], [0], [0], [1], [0, 0, 1, 1], [], []>} : vector<64x192xbf16>, vector<192x64xbf16>, vector<64x64xf32> -> vector<64x64xf32>
    %221 = vector.extract_strided_slice %192 {offsets = [63, 0], sizes = [1, 64], strides = [1, 1]} : vector<64x64xf32> to vector<1x64xf32>
    %222 = vector.extract_strided_slice %192 {offsets = [0, 0], sizes = [63, 64], strides = [1, 1]} : vector<64x64xf32> to vector<63x64xf32>
    %223 = tpu.concatenate %221, %222 in 0 : vector<1x64xf32>, vector<63x64xf32> -> vector<64x64xf32>
    %cst_49 = arith.constant 0.000000e+00 : f32
    %224 = vector.shape_cast %11 : vector<64x1xi1> to vector<64x1xi1>
    %225 = vector.broadcast %224 : vector<64x1xi1> to vector<64x64xi1>
    %226 = vector.broadcast %cst_49 : f32 to vector<64x64xf32>
    %227 = arith.select %225, %223, %226 : vector<64x64xi1>, vector<64x64xf32>
    %228 = arith.truncf %227 : vector<64x64xf32> to vector<64x64xbf16>
    %229 = arith.truncf %192 : vector<64x64xf32> to vector<64x64xbf16>
    %230 = vector.extract_strided_slice %192 {offsets = [1, 0], sizes = [63, 64], strides = [1, 1]} : vector<64x64xf32> to vector<63x64xf32>
    %231 = vector.extract_strided_slice %192 {offsets = [0, 0], sizes = [1, 64], strides = [1, 1]} : vector<64x64xf32> to vector<1x64xf32>
    %232 = tpu.concatenate %230, %231 in 0 : vector<63x64xf32>, vector<1x64xf32> -> vector<64x64xf32>
    %cst_50 = arith.constant 0.000000e+00 : f32
    %233 = vector.shape_cast %13 : vector<64x1xi1> to vector<64x1xi1>
    %234 = vector.broadcast %233 : vector<64x1xi1> to vector<64x64xi1>
    %235 = vector.broadcast %cst_50 : f32 to vector<64x64xf32>
    %236 = arith.select %234, %232, %235 : vector<64x64xi1>, vector<64x64xf32>
    %237 = arith.truncf %236 : vector<64x64xf32> to vector<64x64xbf16>
    %238 = tpu.concatenate %228, %229, %237 in 1 : vector<64x64xbf16>, vector<64x64xbf16>, vector<64x64xbf16> -> vector<64x192xbf16>
    %239 = vector.extract_strided_slice %193 {offsets = [192, 0], sizes = [192, 64], strides = [1, 1]} : vector<576x64xbf16> to vector<192x64xbf16>
    %cst_51 = arith.constant dense<0.000000e+00> : vector<64x64xf32>
    %240 = tpu.matmul %238, %239, %cst_51 {dimension_numbers = #tpu.dot_dimension_numbers<[1], [0], [0], [1], [0, 0, 1, 1], [], []>} : vector<64x192xbf16>, vector<192x64xbf16>, vector<64x64xf32> -> vector<64x64xf32>
    %241 = arith.addf %220, %240 : vector<64x64xf32>
    %242 = vector.extract_strided_slice %192 {offsets = [7, 0], sizes = [57, 64], strides = [1, 1]} : vector<64x64xf32> to vector<57x64xf32>
    %243 = vector.extract_strided_slice %192 {offsets = [0, 0], sizes = [7, 64], strides = [1, 1]} : vector<64x64xf32> to vector<7x64xf32>
    %244 = tpu.concatenate %242, %243 in 0 : vector<57x64xf32>, vector<7x64xf32> -> vector<64x64xf32>
    %cst_52 = arith.constant 0.000000e+00 : f32
    %245 = vector.shape_cast %16 : vector<64x1xi1> to vector<64x1xi1>
    %246 = vector.broadcast %245 : vector<64x1xi1> to vector<64x64xi1>
    %247 = vector.broadcast %cst_52 : f32 to vector<64x64xf32>
    %248 = arith.select %246, %244, %247 : vector<64x64xi1>, vector<64x64xf32>
    %249 = arith.truncf %248 : vector<64x64xf32> to vector<64x64xbf16>
    %250 = vector.extract_strided_slice %192 {offsets = [8, 0], sizes = [56, 64], strides = [1, 1]} : vector<64x64xf32> to vector<56x64xf32>
    %251 = vector.extract_strided_slice %192 {offsets = [0, 0], sizes = [8, 64], strides = [1, 1]} : vector<64x64xf32> to vector<8x64xf32>
    %252 = tpu.concatenate %250, %251 in 0 : vector<56x64xf32>, vector<8x64xf32> -> vector<64x64xf32>
    %cst_53 = arith.constant 0.000000e+00 : f32
    %253 = vector.shape_cast %9 : vector<64x1xi1> to vector<64x1xi1>
    %254 = vector.broadcast %253 : vector<64x1xi1> to vector<64x64xi1>
    %255 = vector.broadcast %cst_53 : f32 to vector<64x64xf32>
    %256 = arith.select %254, %252, %255 : vector<64x64xi1>, vector<64x64xf32>
    %257 = arith.truncf %256 : vector<64x64xf32> to vector<64x64xbf16>
    %258 = vector.extract_strided_slice %192 {offsets = [9, 0], sizes = [55, 64], strides = [1, 1]} : vector<64x64xf32> to vector<55x64xf32>
    %259 = vector.extract_strided_slice %192 {offsets = [0, 0], sizes = [9, 64], strides = [1, 1]} : vector<64x64xf32> to vector<9x64xf32>
    %260 = tpu.concatenate %258, %259 in 0 : vector<55x64xf32>, vector<9x64xf32> -> vector<64x64xf32>
    %cst_54 = arith.constant 0.000000e+00 : f32
    %261 = vector.shape_cast %17 : vector<64x1xi1> to vector<64x1xi1>
    %262 = vector.broadcast %261 : vector<64x1xi1> to vector<64x64xi1>
    %263 = vector.broadcast %cst_54 : f32 to vector<64x64xf32>
    %264 = arith.select %262, %260, %263 : vector<64x64xi1>, vector<64x64xf32>
    %265 = arith.truncf %264 : vector<64x64xf32> to vector<64x64xbf16>
    %266 = tpu.concatenate %249, %257, %265 in 1 : vector<64x64xbf16>, vector<64x64xbf16>, vector<64x64xbf16> -> vector<64x192xbf16>
    %267 = vector.extract_strided_slice %193 {offsets = [384, 0], sizes = [192, 64], strides = [1, 1]} : vector<576x64xbf16> to vector<192x64xbf16>
    %cst_55 = arith.constant dense<0.000000e+00> : vector<64x64xf32>
    %268 = tpu.matmul %266, %267, %cst_55 {dimension_numbers = #tpu.dot_dimension_numbers<[1], [0], [0], [1], [0, 0, 1, 1], [], []>} : vector<64x192xbf16>, vector<192x64xbf16>, vector<64x64xf32> -> vector<64x64xf32>
    %269 = arith.addf %241, %268 : vector<64x64xf32>
    %c0_56 = arith.constant 0 : index
    %c0_57 = arith.constant 0 : index
    %270 = vector.load %arg12[%c0_56, %c0_57] : memref<1x64xf32, #tpu.memory_space<vmem>>, vector<1x64xf32>
    %271 = vector.broadcast %270 : vector<1x64xf32> to vector<64x64xf32>
    %272 = arith.addf %269, %271 : vector<64x64xf32>
    %273 = vector.shape_cast %0 : vector<1x64x32xf32> to vector<64x32xf32>
    %274 = arith.truncf %273 : vector<64x32xf32> to vector<64x32xbf16>
    %c0_58 = arith.constant 0 : index
    %c0_59 = arith.constant 0 : index
    %275 = vector.load %arg13[%c0_58, %c0_59] : memref<32x64xbf16, #tpu.memory_space<vmem>>, vector<32x64xbf16>
    %cst_60 = arith.constant dense<0.000000e+00> : vector<64x64xf32>
    %276 = tpu.matmul %274, %275, %cst_60 {dimension_numbers = #tpu.dot_dimension_numbers<[1], [0], [0], [1], [0, 0, 1, 1], [], []>} : vector<64x32xbf16>, vector<32x64xbf16>, vector<64x64xf32> -> vector<64x64xf32>
    %c0_61 = arith.constant 0 : index
    %c0_62 = arith.constant 0 : index
    %277 = vector.load %arg14[%c0_61, %c0_62] : memref<1x64xf32, #tpu.memory_space<vmem>>, vector<1x64xf32>
    %278 = vector.broadcast %277 : vector<1x64xf32> to vector<64x64xf32>
    %279 = arith.addf %276, %278 : vector<64x64xf32>
    %280 = arith.addf %272, %279 : vector<64x64xf32>
    %281 = vector.shape_cast %280 : vector<64x64xf32> to vector<1x64x64xf32>
    %c0_63 = arith.constant 0 : index
    %c0_64 = arith.constant 0 : index
    %c0_65 = arith.constant 0 : index
    %282 = vector.load %arg15[%c0_63, %c0_64, %c0_65] : memref<1x64x64xf32, #tpu.memory_space<vmem>>, vector<1x64x64xf32>
    tpu.vector_store %arg15[%c0_63, %c0_64, %c0_65], %281 {strides = array<i32>} : memref<1x64x64xf32, #tpu.memory_space<vmem>>, vector<1x64x64xf32>,
    return
  }
  func.func @transform_0(%arg0: i32) -> (i32, i32, i32) {
    %c0_i32 = arith.constant 0 : i32
    %c0_i32_0 = arith.constant 0 : i32
    %c0_i32_1 = arith.constant 0 : i32
    return %arg0, %c0_i32, %c0_i32_0 : i32, i32, i32
  }
  func.func @transform_1(%arg0: i32) -> (i32, i32, i32) {
    %c0_i32 = arith.constant 0 : i32
    %c0_i32_0 = arith.constant 0 : i32
    %c0_i32_1 = arith.constant 0 : i32
    return %arg0, %c0_i32, %c0_i32_0 : i32, i32, i32
  }
  func.func @transform_2(%arg0: i32) -> (i32, i32) {
    %c0_i32 = arith.constant 0 : i32
    %c0_i32_0 = arith.constant 0 : i32
    %c0_i32_1 = arith.constant 0 : i32
    return %c0_i32, %c0_i32_0 : i32, i32
  }
  func.func @transform_3(%arg0: i32) -> (i32, i32) {
    %c0_i32 = arith.constant 0 : i32
    %c0_i32_0 = arith.constant 0 : i32
    %c0_i32_1 = arith.constant 0 : i32
    return %c0_i32, %c0_i32_0 : i32, i32
  }
  func.func @transform_4(%arg0: i32) -> (i32, i32) {
    %c0_i32 = arith.constant 0 : i32
    %c0_i32_0 = arith.constant 0 : i32
    %c0_i32_1 = arith.constant 0 : i32
    return %c0_i32, %c0_i32_0 : i32, i32
  }
  func.func @transform_5(%arg0: i32) -> (i32, i32) {
    %c0_i32 = arith.constant 0 : i32
    %c0_i32_0 = arith.constant 0 : i32
    %c0_i32_1 = arith.constant 0 : i32
    return %c0_i32, %c0_i32_0 : i32, i32
  }
  func.func @transform_6(%arg0: i32) -> (i32, i32) {
    %c0_i32 = arith.constant 0 : i32
    %c0_i32_0 = arith.constant 0 : i32
    %c0_i32_1 = arith.constant 0 : i32
    return %c0_i32, %c0_i32_0 : i32, i32
  }
  func.func @transform_7(%arg0: i32) -> (i32, i32) {
    %c0_i32 = arith.constant 0 : i32
    %c0_i32_0 = arith.constant 0 : i32
    %c0_i32_1 = arith.constant 0 : i32
    return %c0_i32, %c0_i32_0 : i32, i32
  }
  func.func @transform_8(%arg0: i32) -> (i32, i32) {
    %c0_i32 = arith.constant 0 : i32
    %c0_i32_0 = arith.constant 0 : i32
    %c0_i32_1 = arith.constant 0 : i32
    return %c0_i32, %c0_i32_0 : i32, i32
  }
  func.func @transform_9(%arg0: i32) -> (i32, i32) {
    %c0_i32 = arith.constant 0 : i32
    %c0_i32_0 = arith.constant 0 : i32
    %c0_i32_1 = arith.constant 0 : i32
    return %c0_i32, %c0_i32_0 : i32, i32
  }
  func.func @transform_10(%arg0: i32) -> (i32, i32) {
    %c0_i32 = arith.constant 0 : i32
    %c0_i32_0 = arith.constant 0 : i32
    %c0_i32_1 = arith.constant 0 : i32
    return %c0_i32, %c0_i32_0 : i32, i32
  }
  func.func @transform_11(%arg0: i32) -> (i32, i32) {
    %c0_i32 = arith.constant 0 : i32
    %c0_i32_0 = arith.constant 0 : i32
    %c0_i32_1 = arith.constant 0 : i32
    return %c0_i32, %c0_i32_0 : i32, i32
  }
  func.func @transform_12(%arg0: i32) -> (i32, i32) {
    %c0_i32 = arith.constant 0 : i32
    %c0_i32_0 = arith.constant 0 : i32
    %c0_i32_1 = arith.constant 0 : i32
    return %c0_i32, %c0_i32_0 : i32, i32
  }
  func.func @transform_13(%arg0: i32) -> (i32, i32) {
    %c0_i32 = arith.constant 0 : i32
    %c0_i32_0 = arith.constant 0 : i32
    %c0_i32_1 = arith.constant 0 : i32
    return %c0_i32, %c0_i32_0 : i32, i32
  }
  func.func @transform_14(%arg0: i32) -> (i32, i32, i32) {
    %c0_i32 = arith.constant 0 : i32
    %c0_i32_0 = arith.constant 0 : i32
    %c0_i32_1 = arith.constant 0 : i32
    return %arg0, %c0_i32, %c0_i32_0 : i32, i32, i32
  }
}

</mosaic_0001>

<bundles_post_ra>
// kernel: tpu_custom_call.1
= control target key start
LH: loop header
LB: loop body
LE: loop exit
PB: predicated region body
PF: predicated region fallthrough
CT: control target
= control target key end

     0   :  { %s4618_s0 = inlined_call_operand.vmem [shape: f32[2,64,32], index: 0, kind: input, shape index: {}]   ;;  %s4619_s1 = inlined_call_operand.vmem [shape: f32[2,1,64], index: 1, kind: input, shape index: {}]   ;;  %s4620_s2 = inlined_call_operand.vmem [shape: f32[1,32], index: 2, kind: input, shape index: {}]   ;;  %s4621_s3 = inlined_call_operand.vmem [shape: f32[1,32], index: 3, kind: input, shape index: {}]   ;;  %s4622_s4 = inlined_call_operand.<no memory space> [shape: f32[1,1], index: 4, kind: input, shape index: {}]   ;;  %s4623_s5 = inlined_call_operand.vmem [shape: bf16[288,64], index: 5, kind: input, shape index: {}]   ;;  %s4624_s6 = inlined_call_operand.vmem [shape: f32[1,64], index: 6, kind: input, shape index: {}]   ;;  %s4625_s7 = inlined_call_operand.vmem [shape: f32[1,64], index: 7, kind: input, shape index: {}]   ;;  %s4626_s8 = inlined_call_operand.vmem [shape: f32[1,64], index: 8, kind: input, shape index: {}]   ;;  %s4627_s10 = inlined_call_operand.vmem [shape: bf16[576,64], index: 10, kind: input, shape index: {}]   ;;  %s4628_s11 = inlined_call_operand.vmem [shape: f32[1,64], index: 11, kind: input, shape index: {}]   ;;  %s4629_s12 = inlined_call_operand.vmem [shape: bf16[32,64], index: 12, kind: input, shape index: {}]   ;;  %s4630_s13 = inlined_call_operand.vmem [shape: f32[1,64], index: 13, kind: input, shape index: {}]   ;;  %s4631_s14 = inlined_call_operand.hbm [shape: f32[2,64,64], index: 14, kind: output, shape index: {}]   ;;  %s4632_s9 = inlined_call_operand.<no memory space> [shape: f32[1,1], index: 9, kind: input, shape index: {}]  }
   0x1   :  { %4648 = sst [smem:[#allocation7_spill]] %s4618_s0 }
   0x2   :  { %23 = vsyncpa [#allocation5], 0 }
   0x3   :  { %25 = vsyncpa [#allocation5 + $0x1], 0  ;;  %s3288_s28 = smov 0   ;;  %s3290_s29 = smov 0  }
   0x4   :  { %s3292_s30 = smov 0   ;;  %s3294_s15 = smov 0  }
   0x5 LB: > { %s3309_s9 = sadd.s32 4294967295, %s3200_s15   ;;  %s2711_s16 = sadd.s32 4294967294, %s3200_s15   ;;  %s3200_s15 = sphi %s3294_s15, %s4721_s15   ;;  %s3196_s30 = sphi %s3292_s30, %s4720_s30   ;;  %s3192_s29 = sphi %s3290_s29, %s4719_s29   ;;  %s3188_s28 = sphi %s3288_s28, %s4718_s28  }
   0x6   : > { %s3313_s17 = sadd.s32 1, %s3200_s15   ;;  %s342_s18 = sadd.s32 1, %s3196_s30 }
   0x7   : > { %s339_s19 = ssub.s32 %s3200_s15, %s3313_s17  ;;  %p352_p0 = scmp.ne.s32.totalorder %s3196_s30, %s3192_s29 }
   0x8   : > { %p340_p1 = scmp.eq.s32.totalorder %s339_s19, 0  ;;  %p353_p2 = scmp.eq.s32.totalorder %s3309_s9, 1 }
   0x9   : > { %p358_p3 = scmp.ne.s32.totalorder %s3192_s29, %s3188_s28  ;;  %p359_p4 = scmp.eq.s32.totalorder %s2711_s16, 1 }
   0xa   : > { %s3324_s20 = scalar_select %p340_p1, %s3196_s30, %s342_s18  }
   0xb   : > { %p3326_p5 = por %p353_p2, %p352_p0  ;;  %p3330_p6 = por %p359_p4, %p358_p3 }
   0xc   : > { %p2714_p7 = scmp.ge.s32.totalorder %s3200_s15, 1  ;;  %p427_p8 = scmp.lt.s32.totalorder %s3200_s15, 3 }
   0xe   : > { %p428_p9 = pnand %p2714_p7, %p427_p8 }
   0xf   : > { %p476_p10 = scmp.lt.s32.totalorder (!%p428_p9), %s3309_s9, 1  ;;  %vm4634_vm0 = vcmask (!%p428_p9), 261120   ;;  %s4651_s0 = sld [smem:[#allocation7_spill]] (!%p428_p9)  ;;  %v3006_v33 = vld [vmem:[%s4623_s5 + $0x30] sm:$0xff] (!%p428_p9)   ;;  %v3007_v34 = vld [vmem:[%s4623_s5 + $0x38] sm:$0xff] (!%p428_p9)   ;;  %v3008_v43 = vld [vmem:[%s4623_s5 + $0x40] sm:$0xff] (!%p428_p9)  }
  0x10   : > { %431 = sbr.rel (%p428_p9) target bundleno = 1162 (0x48a), region = 76  ;;  %2869 = vmatprep.subr.bf16.mxu0 (!%p428_p9), %v3006_v33  ;;  %v3009_v49 = vld [vmem:[%s4623_s5 + $0x48] sm:$0xff] (!%p428_p9)   ;;  %v3010_v52 = vld [vmem:[%s4623_s5 + $0x50] sm:$0xff] (!%p428_p9)   ;;  %s4646_s24 = smov (!%p428_p9), 64  }
  0x11   : > { %2870 = vmatpush3.bf16.msra.mxu0 (!%p428_p9), %v3006_v33  ;;  %s3206_s18 = smov (!%p428_p9), 127   ;;  %s3207_s19 = smov (!%p428_p9), 1  }
  0x12   : > { %2871 = vmatprep.subr.bf16.mxu0 (!%p428_p9), %v3007_v34 }
  0x15   : > { %2872 = vmatpush3.bf16.msra.mxu0 (!%p428_p9), %v3007_v34 }
  0x16   : > { %2873 = vmatprep.subr.bf16.mxu0 (!%p428_p9), %v3008_v43 }
  0x17   : > { %s3338_s22 = scalar_select %p476_p10, %s3309_s9, 1 }
  0x19   : > { %s2831_s23 = sshll.u32 %s3338_s22, 6  ;;  %2874 = vmatpush3.bf16.msra.mxu0 %v3008_v43  ;;  %s483_s25 = scalar_lea.vmem %s4619_s1, %s3338_s22 }
  0x1a   : > { %s3344_s26 = scalar_lea.vmem %s4651_s0, %s2831_s23  ;;  %2875 = vmatprep.subr.bf16.mxu0 %v3009_v49  ;;  %s3202_s23 = smov 32  }
  0x1b   : > { %v3347_v0 = vld [vmem:[%s3344_s26] sm:$0xff]  ;;  %v3350_v1 = vld [vmem:[%s3344_s26 + $0x8] sm:$0xff]  ;;  %v3353_v2 = vld [vmem:[%s3344_s26 + $0x10] sm:$0xff]  ;;  %s3205_s22 = smov 63  }
  0x1c   : > { %v3356_v3 = vld [vmem:[%s3344_s26 + $0x18] sm:$0xff]  ;;  %v3359_v4 = vld [vmem:[%s3344_s26 + $0x20] sm:$0xff]  ;;  %v585_v5 = vsel %vm4634_vm0, %v3347_v0, 0.0  ;;  %v586_v6 = vsel %vm4634_vm0, %v3350_v1, 0.0  ;;  %v588_v7 = vsel %vm4634_vm0, %v3353_v2, 0.0  ;;  %v606_v8 = vmul.f32 %v3347_v0, %v3347_v0  ;;  %v3370_v9 = vld [vmem:[%s3344_s26 + $0x28] sm:$0xff] }
  0x1d   : > { %v587_v10 = vadd.f32 %v586_v6, %v585_v5  ;;  %v590_v11 = vsel %vm4634_vm0, %v3356_v3, 0.0  ;;  %v592_v12 = vsel %vm4634_vm0, %v3359_v4, 0.0  ;;  %v607_v13 = vmul.f32 %v3350_v1, %v3350_v1  ;;  %v3387_v20 = vld [vmem:[%s3344_s26 + $0x30] sm:$0xff]  ;;  %v3391_v24 = vld [vmem:[%s3344_s26 + $0x38] sm:$0xff]  ;;  %2876 = vmatpush3.bf16.msra.mxu0 %v3009_v49 }
  0x1e   : > { %v608_v14 = vmul.f32 %v3353_v2, %v3353_v2  ;;  %v609_v16 = vmul.f32 %v3356_v3, %v3356_v3  ;;  %v610_v17 = vmul.f32 %v3359_v4, %v3359_v4  ;;  %v614_v18 = vsel %vm4634_vm0, %v606_v8, 0.0  ;;  %2877 = vmatprep.subr.bf16.mxu0 %v3010_v52 }
  0x1f   : > { %v589_v15 = vadd.f32 %v588_v7, %v587_v10  ;;  %v615_v19 = vsel %vm4634_vm0, %v607_v13, 0.0  ;;  %v594_v25 = vsel %vm4634_vm0, %v3370_v9, 0.0  ;;  %v611_v26 = vmul.f32 %v3370_v9, %v3370_v9 }
  0x20   : > { %v616_v22 = vadd.f32 %v615_v19, %v614_v18  ;;  %v617_v23 = vsel %vm4634_vm0, %v608_v14, 0.0  ;;  %v619_v27 = vsel %vm4634_vm0, %v609_v16, 0.0  ;;  %v596_v30 = vsel %vm4634_vm0, %v3387_v20, 0.0 }
  0x21   : > { %v591_v21 = vadd.f32 %v590_v11, %v589_v15  ;;  %v612_v31 = vmul.f32 %v3387_v20, %v3387_v20  ;;  %v621_v32 = vsel %vm4634_vm0, %v610_v17, 0.0  ;;  %v613_v36 = vmul.f32 %v3391_v24, %v3391_v24  ;;  %2878 = vmatpush3.bf16.msra.mxu0 %v3010_v52 }
  0x22   : > { %v618_v29 = vadd.f32 %v617_v23, %v616_v22  ;;  %v598_v38 = vsel %vm4634_vm0, %v3391_v24, 0.0  ;;  %v623_v39 = vsel %vm4634_vm0, %v611_v26, 0.0 }
  0x23   : > { %v593_v28 = vadd.f32 %v592_v12, %v591_v21  ;;  %v625_v42 = vsel %vm4634_vm0, %v612_v31, 0.0  ;;  %v627_v46 = vsel %vm4634_vm0, %v613_v36, 0.0  ;;  %v2718_v21 = vld [vmem:[%s4620_s2] ss:$0 sm:$0xff] }
  0x24   : > { %v620_v37 = vadd.f32 %v619_v27, %v618_v29 }
  0x25   : > { %v595_v35 = vadd.f32 %v594_v25, %v593_v28 }
  0x26   : > { %v622_v41 = vadd.f32 %v621_v32, %v620_v37 }
  0x27   : > { %v597_v40 = vadd.f32 %v596_v30, %v595_v35 }
  0x28   : > { %v624_v45 = vadd.f32 %v623_v39, %v622_v41 }
  0x29   : > { %v599_v44 = vadd.f32 %v598_v38, %v597_v40 }
  0x2a   : > { %v626_v48 = vadd.f32 %v625_v42, %v624_v45 }
  0x2b   : > { %v600_v47 = vrot.slane %v599_v44, 4 }
  0x2c   : > { %v628_v51 = vadd.f32 %v627_v46, %v626_v48  ;;  %v493_v48 = vlaneseq }
  0x2d   : > { %v601_v50 = vadd.f32 %v600_v47, %v599_v44 }
  0x2e   : > { %v629_v54 = vrot.slane %v628_v51, 4 }
  0x2f   : > { %v602_v53 = vrot.slane %v601_v50, 2 }
  0x30   : > { %v630_v56 = vadd.f32 %v629_v54, %v628_v51 }
  0x31   : > { %v603_v55 = vadd.f32 %v602_v53, %v601_v50 }
  0x32   : > { %v631_v58 = vrot.slane %v630_v56, 2 }
  0x33   : > { %v604_v57 = vrot.slane %v603_v55, 1 }
  0x34   : > { %v632_v60 = vadd.f32 %v631_v58, %v630_v56 }
  0x35   : > { %v605_v59 = vadd.f32 %v604_v57, %v603_v55  ;;  %v3464_v55 = vshrl.u32 %v493_v48, 7 }
  0x36   : > { %v633_v61 = vrot.slane %v632_v60, 1 }
  0x37   : > { %v636_v62 = vmul.f32 0.015625, %v605_v59  ;;  %vm4633_vm1 = vcmp.lt.s32.totalorder %v3464_v55, 7  ;;  %vm4637_vm11 = vcmp.lt.s32.totalorder %v3464_v55, 1 }
  0x38   : > { %v634_v63 = vadd.f32 %v633_v61, %v632_v60 }
  0x39   : > { %v638_v5 = vmul.f32 %v636_v62, %v636_v62  ;;  %v643_v11 = vsub.f32 %v3347_v0, %v636_v62  ;;  %v644_v12 = vsub.f32 %v3350_v1, %v636_v62  ;;  %v645_v13 = vsub.f32 %v3353_v2, %v636_v62  ;;  %v2719_v2 = vld [vmem:[%s4621_s3] ss:$0 sm:$0xff] }
  0x3a   : > { %v637_v6 = vmul.f32 0.015625, %v634_v63  ;;  %v646_v14 = vsub.f32 %v3356_v3, %v636_v62  ;;  %v647_v15 = vsub.f32 %v3359_v4, %v636_v62  ;;  %v648_v16 = vsub.f32 %v3370_v9, %v636_v62 }
  0x3b   : > { %v649_v17 = vsub.f32 %v3387_v20, %v636_v62  ;;  %v650_v18 = vsub.f32 %v3391_v24, %v636_v62 }
  0x3c   : > { %v639_v7 = vsub.f32 %v637_v6, %v638_v5  ;;  %v3467_v5 = vadd.s32 8, %v3464_v55 }
  0x3e   : > { %v640_v8 = vmax.f32 %v639_v7, 0.0 }
  0x40   : > { %v641_v10 = vadd.f32 1e-05, %v640_v8  ;;  %v3470_v8 = vadd.s32 16, %v3464_v55 }
  0x42   : > { %3062 = vrsqrt.f32 %v641_v10  ;;  %v3011_v10 = vld [vmem:[%s4623_s5 + $0x58] sm:$0xff]  }
  0x43   : > { %2879 = vmatprep.subr.bf16.mxu0 %v3011_v10 }
  0x44   : > { %2880 = vmatpush3.bf16.msra.mxu0 %v3011_v10  ;;  %v4664_v10 = vmov 0 }
  0x4c   : > { %v3063_v19 = vpop.eup %3062 }
  0x4d   : > { %v651_v0 = vmul.f32 %v3063_v19, %v643_v11  ;;  %v652_v22 = vmul.f32 %v3063_v19, %v644_v12  ;;  %v653_v1 = vmul.f32 %v3063_v19, %v645_v13  ;;  %v654_v23 = vmul.f32 %v3063_v19, %v646_v14 }
  0x4e   : > { %v655_v3 = vmul.f32 %v3063_v19, %v647_v15  ;;  %v656_v4 = vmul.f32 %v3063_v19, %v648_v16  ;;  %v657_v9 = vmul.f32 %v3063_v19, %v649_v17  ;;  %v658_v25 = vmul.f32 %v3063_v19, %v650_v18  ;;  %v3493_v19 = vld [vmem:[%s4623_s5] sm:$0xff]  }
  0x4f   : > { %v665_v20 = vmul.f32 %v2718_v21, %v651_v0  ;;  %v666_v26 = vmul.f32 %v2718_v21, %v652_v22  ;;  %v667_v24 = vmul.f32 %v2718_v21, %v653_v1  ;;  %v668_v27 = vmul.f32 %v2718_v21, %v654_v23  ;;  %2889 = vmatprep.subr.bf16.mxu0 %v3493_v19 }
  0x50   : > { %v669_v28 = vmul.f32 %v2718_v21, %v655_v3  ;;  %v670_v29 = vmul.f32 %v2718_v21, %v656_v4  ;;  %v671_v30 = vmul.f32 %v2718_v21, %v657_v9  ;;  %v672_v31 = vmul.f32 %v2718_v21, %v658_v25 }
  0x51   : > { %v3439_v32 = vadd.f32 %v2719_v2, %v665_v20  ;;  %v3441_v33 = vadd.f32 %v2719_v2, %v666_v26  ;;  %v3443_v34 = vadd.f32 %v2719_v2, %v667_v24  ;;  %v3445_v35 = vadd.f32 %v2719_v2, %v668_v27 }
  0x52   : > { %v3447_v36 = vadd.f32 %v2719_v2, %v669_v28  ;;  %v3449_v37 = vadd.f32 %v2719_v2, %v670_v29  ;;  %v3454_v41 = vadd.f32 %v2719_v2, %v671_v30  ;;  %v3457_v43 = vadd.f32 %v2719_v2, %v672_v31 }
  0x53   : > { %v2720_v38 = vmul.f32 -1.442695, %v3439_v32  ;;  %v2721_v39 = vmul.f32 -1.442695, %v3441_v33  ;;  %v2722_v40 = vmul.f32 -1.442695, %v3443_v34 }
  0x54   : > { %v2723_v42 = vmul.f32 -1.442695, %v3445_v35  ;;  %v2724_v44 = vmul.f32 -1.442695, %v3447_v36  ;;  %v2725_v45 = vmul.f32 -1.442695, %v3449_v37 }
  0x55   : > { %3064 = vpow2.f32 %v2720_v38  ;;  %v2726_v46 = vmul.f32 -1.442695, %v3454_v41  ;;  %v2727_v47 = vmul.f32 -1.442695, %v3457_v43  ;;  %v3476_v11 = vadd.s32 24, %v3464_v55 }
  0x56   : > { %3066 = vpow2.f32 %v2721_v39  ;;  %v3479_v12 = vadd.s32 32, %v3464_v55  ;;  %v510_v13 = vand.u32 7, %v3464_v55  ;;  %v511_v14 = vand.u32 7, %v3467_v5 }
  0x57   : > { %3068 = vpow2.f32 %v2722_v40  ;;  %v3484_v15 = vadd.s32 40, %v3464_v55  ;;  %v3487_v16 = vadd.s32 48, %v3464_v55  ;;  %v512_v18 = vand.u32 7, %v3470_v8 }
  0x58   : > { %3070 = vpow2.f32 %v2723_v42  ;;  %v513_v22 = vand.u32 7, %v3476_v11  ;;  %v514_v1 = vand.u32 7, %v3479_v12  ;;  %vm3506_vm2 = vcmp.ne.s32.totalorder %v510_v13, 7 }
  0x59   : > { %3072 = vpow2.f32 %v2724_v44  ;;  %vm3512_vm3 = vcmp.ne.s32.totalorder %v511_v14, 7  ;;  %v515_v9 = vand.u32 7, %v3484_v15  ;;  %v3523_v24 = vadd.s32 56, %v3464_v55 }
  0x5a   : > { %3074 = vpow2.f32 %v2725_v45  ;;  %v516_v27 = vand.u32 7, %v3487_v16  ;;  %vm3534_vm4 = vcmp.ne.s32.totalorder %v512_v18, 7  ;;  %vm3541_vm5 = vcmp.ne.s32.totalorder %v513_v22, 7 }
  0x5b   : > { %3076 = vpow2.f32 %v2726_v46  ;;  %vm3550_vm6 = vcmp.ne.s32.totalorder %v514_v1, 7  ;;  %vm3572_vm7 = vcmp.ne.s32.totalorder %v515_v9, 7  ;;  %vm3644_vm10 = vcmp.ne.s32.totalorder %v510_v13, 0 }
  0x5c   : > { %3078 = vpow2.f32 %v2727_v47  ;;  %vm3617_vm8 = vcmp.ne.s32.totalorder %v516_v27, 7  ;;  %vm3664_vm12 = vcmp.ne.s32.totalorder %v511_v14, 0  ;;  %vm3684_vm13 = vcmp.ne.s32.totalorder %v512_v18, 0 }
  0x5d   : > { %v4665_v10 = vsel %vm3617_vm8, 4294967295, %v4664_v10  ;;  %vm3690_vm14 = vcmp.ne.s32.totalorder %v513_v22, 0  ;;  %vm3717_vm15 = vcmp.ne.s32.totalorder %v514_v1, 0  ;;  %vm3744_vm0 = vcmp.ne.s32.totalorder %v516_v27, 0 }
  0x5f   : > { %v3065_v49 = vpop.eup %3064 }
  0x60   : > { %v3067_v50 = vpop.eup %3066  ;;  %v711_v51 = vadd.f32 1.0, %v3065_v49 }
  0x61   : > { %v3069_v52 = vpop.eup %3068  ;;  %v712_v53 = vadd.f32 1.0, %v3067_v50 }
  0x62   : > { %v3071_v54 = vpop.eup %3070  ;;  %3080 = vrcp.f32 %v711_v51  ;;  %v713_v56 = vadd.f32 1.0, %v3069_v52 }
  0x63   : > { %v3073_v57 = vpop.eup %3072  ;;  %3082 = vrcp.f32 %v712_v53  ;;  %v714_v58 = vadd.f32 1.0, %v3071_v54  ;;  %v517_v54 = vand.u32 7, %v3523_v24 }
  0x64   : > { %v3075_v59 = vpop.eup %3074  ;;  %3084 = vrcp.f32 %v713_v56  ;;  %v715_v60 = vadd.f32 1.0, %v3073_v57 }
  0x65   : > { %v3077_v61 = vpop.eup %3076  ;;  %3086 = vrcp.f32 %v714_v58  ;;  %v716_v62 = vadd.f32 1.0, %v3075_v59  ;;  %vm3623_vm9 = vcmp.ne.s32.totalorder %v517_v54, 7 }
  0x66   : > { %v3079_v63 = vpop.eup %3078  ;;  %3088 = vrcp.f32 %v715_v60  ;;  %v717_v6 = vadd.f32 1.0, %v3077_v61 }
  0x67   : > { %3090 = vrcp.f32 %v716_v62  ;;  %v718_v7 = vadd.f32 1.0, %v3079_v63 }
  0x68   : > { %3092 = vrcp.f32 %v717_v6 }
  0x69   : > { %3094 = vrcp.f32 %v718_v7 }
  0x6c   : > { %v3081_v17 = vpop.eup %3080 }
  0x6d   : > { %v3083_v21 = vpop.eup %3082  ;;  %v3496_v0 = vmul.f32 %v3081_v17, %v3439_v32  ;;  %v4666_v17 = vmov 0 }
  0x6e   : > { %v3085_v23 = vpop.eup %3084  ;;  %v3502_v2 = vmul.f32 %v3083_v21, %v3441_v33  ;;  %v4667_v17 = vsel %vm3623_vm9, 4294967295, %v4666_v17 }
  0x6f   : > { %v3087_v25 = vpop.eup %3086  ;;  %v3519_v20 = vmul.f32 %v3085_v23, %v3443_v34  ;;  %v852_v26 = vrot.slane %v3496_v0, 1 }
  0x70   : > { %v3089_v28 = vpop.eup %3088  ;;  %v970_v29 = vpack.c.bf16 %v3502_v2, %v3496_v0  ;;  %v853_v30 = vrot.slane %v3502_v2, 1  ;;  %v3530_v31 = vmul.f32 %v3087_v25, %v3445_v35 }
  0x71   : > { %v3091_v33 = vpop.eup %3090  ;;  %v854_v34 = vrot.slane %v3519_v20, 1  ;;  %v3546_v39 = vmul.f32 %v3089_v28, %v3447_v36  ;;  %v3680_v14 = vpack.c.bf16 %v3519_v20, %v3502_v2 }
  0x72   : > { %v3093_v40 = vpop.eup %3092  ;;  %1006 = vrot.lane.b32.xlu0 %v970_v29, %s3202_s23  ;;  %v867_v42 = vsel %vm4633_vm1, %v852_v26, %v853_v30  ;;  %v971_v44 = vpack.c.bf16 %v3530_v31, %v3519_v20  ;;  %v855_v45 = vrot.slane %v3530_v31, 1  ;;  %v3561_v36 = vmul.f32 %v3091_v33, %v3449_v37 }
  0x73   : > { %v3095_v46 = vpop.eup %3094  ;;  %v3565_v47 = vsel %vm4633_vm1, %v853_v30, %v854_v34  ;;  %v990_v49 = vsel %vm3506_vm2, %v867_v42, 0.0  ;;  %v856_v50 = vrot.slane %v3546_v39, 1  ;;  %v3584_v53 = vmul.f32 %v3093_v40, %v3454_v41 }
  0x74   : > { %v991_v37 = vsel %vm3512_vm3, %v3565_v47, 0.0  ;;  %v3581_v52 = vsel %vm4633_vm1, %v854_v34, %v855_v45  ;;  %v3595_v59 = vmul.f32 %v3095_v46, %v3457_v43  ;;  %v972_v60 = vpack.c.bf16 %v3561_v36, %v3546_v39 }
  0x75   : > { %v998_v56 = vpack.c.bf16 %v991_v37, %v990_v49  ;;  %v3589_v57 = vsel %vm4633_vm1, %v855_v45, %v856_v50  ;;  %v992_v58 = vsel %vm3534_vm4, %v3581_v52, 0.0  ;;  %v857_v61 = vrot.slane %v3561_v36, 1 }
  0x76   : > { %1008 = vrot.lane.b32.xlu0 %v971_v44, %s3202_s23  ;;  %v993_v41 = vsel %vm3541_vm5, %v3589_v57, 0.0  ;;  %v858_v62 = vrot.slane %v3584_v53, 1  ;;  %v859_v43 = vrot.slane %v3595_v59, 1  ;;  %v4668_v30 = vmov 0 }
  0x77   : > { %1018 = vrot.lane.b32.xlu1 %v998_v56, %s4646_s24  ;;  %v999_v63 = vpack.c.bf16 %v993_v41, %v992_v58  ;;  %v3613_v7 = vsel %vm4633_vm1, %v856_v50, %v857_v61  ;;  %v4669_v30 = vsel %vm3644_vm10, 4294967295, %v4668_v30  ;;  %v973_v33 = vpack.c.bf16 %v3595_v59, %v3584_v53 }
  0x78   : > { %v3609_v6 = vsel %vm4633_vm1, %v857_v61, %v858_v62  ;;  %v994_v21 = vsel %vm3550_vm6, %v3613_v7, 0.0  ;;  %v3635_v25 = vsel %vm4633_vm1, %v858_v62, %v859_v43  ;;  %v3639_v28 = vsel %vm4633_vm1, %v859_v43, %v852_v26 }
  0x79   : > { %v995_v23 = vsel %vm3572_vm7, %v3609_v6, 0.0  ;;  %v780_v34 = vrot.slane %v3502_v2, 7  ;;  %v779_v40 = vrot.slane %v3496_v0, 7  ;;  %v886_v26 = vsel %vm3512_vm3, %v867_v42, 0.0 }
  0x7a   : > { %1010 = vrot.lane.b32.xlu0 %v972_v60, %s3202_s23  ;;  %v1000_v29 = vpack.c.bf16 %v995_v23, %v994_v21  ;;  %v996_v44 = vsel %vm3617_vm8, %v3635_v25, 0.0  ;;  %v997_v13 = vsel %vm3623_vm9, %v3639_v28, 0.0  ;;  %v887_v42 = vsel %vm3534_vm4, %v3565_v47, 0.0  ;;  %v3059_v21 = vld [vmem:[%s4627_s10 + $0x58] sm:$0xff]  }
  0x7b   : > { %1020 = vrot.lane.b32.xlu1 %v999_v63, %s4646_s24  ;;  %v888_v46 = vsel %vm3541_vm5, %v3581_v52, 0.0  ;;  %v781_v49 = vrot.slane %v3519_v20, 7  ;;  %v3204_v50 = vmov 0.0   ;;  %v1001_v58 = vpack.c.bf16 %v997_v13, %v996_v44 }
  0x7c   : > { %v848_v5 = vpack.c.bf16 %v3496_v0, %v3204_v50  ;;  %v893_v0 = vpack.c.bf16 %v886_v26, %v3204_v50  ;;  %v786_v2 = vrot.slane %v3595_v59, 7  ;;  %v3699_v8 = vsel %vm4637_vm11, %v779_v40, %v780_v34 }
  0x7d   : > { %v894_v18 = vpack.c.bf16 %v888_v46, %v887_v42  ;;  %v3703_v20 = vpack.c.bf16 %v3546_v39, %v3530_v31  ;;  %v959_v11 = vsel %vm3664_vm12, %v3699_v8, 0.0  ;;  %v782_v22 = vrot.slane %v3530_v31, 7 }
  0x7e   : > { %1022 = vrot.lane.b32.xlu0 %v1000_v29, %s4646_s24  ;;  %v3711_v41 = vsel %vm4637_vm11, %v786_v2, %v779_v40  ;;  %v793_v60 = vsel %vm4637_vm11, %v780_v34, %v781_v49  ;;  %v4676_v61 = vmov 0  ;;  %vm3723_vm1 = vcmp.ne.s32.totalorder %v515_v9, 0 }
  0x7f   : > { %1012 = vrot.lane.b32.xlu1 %v973_v33, %s3202_s23  ;;  %v4677_v61 = vsel %vm3717_vm15, 4294967295, %v4676_v61  ;;  %v958_v31 = vsel %vm3644_vm10, %v3711_v41, 0.0  ;;  %v792_v63 = vsel %vm4637_vm11, %v781_v49, %v782_v22  ;;  %v960_v12 = vsel %vm3684_vm13, %v793_v60, 0.0 }
  0x80   : > { %v783_v1 = vrot.slane %v3546_v39, 7  ;;  %v3737_v15 = vpack.c.bf16 %v959_v11, %v958_v31  ;;  %v961_v9 = vsel %vm3690_vm14, %v792_v63, 0.0  ;;  %v784_v43 = vrot.slane %v3561_v36, 7 }
  0x81   : > { %v3748_v23 = vpack.c.bf16 %v961_v9, %v960_v12  ;;  %vm3754_vm10 = vcmp.ne.s32.totalorder %v517_v54, 0  ;;  %v4682_v29 = vmov 0  ;;  %v785_v33 = vrot.slane %v3584_v53, 7 }
  0x82   : > { %901 = vrot.lane.b32.xlu0 %v848_v5, %s3202_s23  ;;  %v791_v39 = vsel %vm4637_vm11, %v782_v22, %v783_v1  ;;  %v4683_v29 = vsel %vm3754_vm10, 4294967295, %v4682_v29  ;;  %v889_v16 = vsel %vm3550_vm6, %v3589_v57, 0.0  ;;  %v790_v27 = vsel %vm4637_vm11, %v783_v1, %v784_v43 }
  0x83   : > { %1024 = vrot.lane.b32.xlu1 %v1001_v58, %s4646_s24  ;;  %v962_v34 = vsel %vm3717_vm15, %v791_v39, 0.0  ;;  %v815_v40 = vsel %vm3690_vm14, %v793_v60, 0.0  ;;  %v890_v24 = vsel %vm3572_vm7, %v3613_v7, 0.0  ;;  %v963_v54 = vsel %vm3723_vm1, %v790_v27, 0.0 }
  0x84   : > { %v3776_v26 = vsel %vm4637_vm11, %v785_v33, %v786_v2  ;;  %v789_v44 = vsel %vm4637_vm11, %v784_v43, %v785_v33  ;;  %v3782_v13 = vpack.c.bf16 %v963_v54, %v962_v34  ;;  %v814_v49 = vsel %vm3684_vm13, %v3699_v8, 0.0 }
  0x85   : > { %v964_v42 = vsel %vm3744_vm0, %v789_v44, 0.0  ;;  %v965_v46 = vsel %vm3754_vm10, %v3776_v26, 0.0  ;;  %v3794_v58 = vpack.c.bf16 %v815_v40, %v814_v49  ;;  %v851_v2 = vpack.c.bf16 %v3584_v53, %v3561_v36 }
  0x86   : > { %913 = vrot.lane.b32.xlu0 %v893_v0, %s4646_s24  ;;  %v3792_v5 = vpack.c.bf16 %v965_v46, %v964_v42  ;;  %v895_v0 = vpack.c.bf16 %v890_v24, %v889_v16  ;;  %v891_v11 = vsel %vm3617_vm8, %v3609_v6, 0.0  ;;  %v892_v22 = vsel %vm3623_vm9, %v3635_v25, 0.0 }
  0x87   : > { %903 = vrot.lane.b32.xlu1 %v3680_v14, %s3202_s23  ;;  %v816_v31 = vsel %vm3717_vm15, %v792_v63, 0.0  ;;  %v817_v12 = vsel %vm3723_vm1, %v791_v39, 0.0  ;;  %v819_v36 = vsel %vm3754_vm10, %v789_v44, 0.0  ;;  %v896_v9 = vpack.c.bf16 %v892_v22, %v891_v11  ;;  %v3013_v22 = vld [vmem:[%s4623_s5 + $0x8] sm:$0xff]  }
  0x88   : > { %v3815_v53 = vpack.c.bf16 %v817_v12, %v816_v31  ;;  %v1337_v43 = vsel %vm3506_vm2, %v3565_v47, 0.0  ;;  %v1338_v33 = vsel %vm3512_vm3, %v3581_v52, 0.0  ;;  %v1339_v34 = vsel %vm3534_vm4, %v3589_v57, 0.0 }
  0x89   : > { %v1345_v16 = vpack.c.bf16 %v1338_v33, %v1337_v43  ;;  %v1340_v40 = vsel %vm3541_vm5, %v3613_v7, 0.0  ;;  %v1282_v47 = vsel %vm3664_vm12, %v793_v60, 0.0  ;;  %vm4684_vm11 = vnez %v4669_v30  ;;  %v3015_v33 = vld [vmem:[%s4623_s5 + $0x18] sm:$0xff]  }
  0x8a   : > { %905 = vrot.lane.b32.xlu0 %v3703_v20, %s3202_s23  ;;  %v1281_v52 = vsel %vm4684_vm11, %v3699_v8, 0.0  ;;  %v1284_v24 = vsel %vm3690_vm14, %v791_v39, 0.0  ;;  %v1346_v7 = vpack.c.bf16 %v1340_v40, %v1339_v34  ;;  %v1341_v8 = vsel %vm3550_vm6, %v3609_v6, 0.0 }
  0x8b   : > { %915 = vrot.lane.b32.xlu1 %v894_v18, %s4646_s24  ;;  %v818_v18 = vsel %vm3744_vm0, %v790_v27, 0.0  ;;  %v3845_v54 = vpack.c.bf16 %v1282_v47, %v1281_v52  ;;  %v1342_v60 = vsel %vm3572_vm7, %v3635_v25, 0.0  ;;  %v1320_v39 = vpack.c.bf16 %v3204_v50, %v3595_v59 }
  0x8c   : > { %v3817_v1 = vpack.c.bf16 %v819_v36, %v818_v18  ;;  %v1285_v42 = vsel %vm3717_vm15, %v790_v27, 0.0  ;;  %v1286_v6 = vsel %vm3723_vm1, %v789_v44, 0.0  ;;  %vm4685_vm10 = vcmask 261120   ;;  %v3014_v36 = vld [vmem:[%s4623_s5 + $0x10] sm:$0xff]  }
  0x8d   : > { %v3869_v46 = vpack.c.bf16 %v1286_v6, %v1285_v42  ;;  %vm933_vm9 = vcmask 523264   ;;  %vm4686_vm15 = vmmov %vm4685_vm10  ;;  %v813_v12 = vsel %vm3664_vm12, %v3711_v41, 0.0  ;;  %v3019_v6 = vld [vmem:[%s4623_s5 + $0x68] sm:$0xff]  }
  0x8e   : > { %917 = vrot.lane.b32.xlu0 %v895_v0, %s4646_s24 }
  0x8f   : > { %907 = vrot.lane.b32.xlu1 %v851_v2, %s3202_s23 }
  0x92   : > { %1353 = vrot.lane.b32.xlu0 %v3680_v14, %s3202_s23  ;;  %v1283_v14 = vsel %vm3684_vm13, %v792_v63, 0.0  ;;  %v1347_v63 = vpack.c.bf16 %v1342_v60, %v1341_v8  ;;  %v3018_v60 = vld [vmem:[%s4623_s5 + $0x60] sm:$0xff]  }
  0x93   : > { %919 = vrot.lane.b32.xlu1 %v896_v9, %s4646_s24  ;;  %v3847_v57 = vpack.c.bf16 %v1284_v24, %v1283_v14  ;;  %v3017_v24 = vld [vmem:[%s4623_s5 + $0x28] sm:$0xff]  }
  0x96   : > { %1365 = vrot.lane.b32.xlu0 %v1345_v16, %s4646_s24 }
  0x97   : > { %1355 = vrot.lane.b32.xlu1 %v3703_v20, %s3202_s23  ;;  %v1343_v20 = vsel %vm3617_vm8, %v3639_v28, 0.0  ;;  %vm1082_vm8 = vcmask 785408  }
  0x98   : > { %v1348_v25 = vpack.c.bf16 %v3204_v50, %v1343_v20 }
  0x9a   : > { %1357 = vrot.lane.b32.xlu0 %v851_v2, %s3202_s23 }
  0x9b   : > { %1367 = vrot.lane.b32.xlu1 %v1346_v7, %s4646_s24 }
  0x9e   : > { %1369 = vrot.lane.b32.xlu0 %v1347_v63, %s4646_s24 }
  0x9f   : > { %1359 = vrot.lane.b32.xlu1 %v1320_v39, %s3202_s23  ;;  %s3208_s23 = smov 65  }
  0xa3   : > { %1371 = vrot.lane.b32.xlu1 %v1348_v25, %s4646_s24 }
  0xe4   : > { %v1007_v59 = vpop.permute.xlu0 %1006 }
  0xe5   : > { %v1028_v28 = vsel %vm4685_vm10, %v3737_v15, %v1007_v59 }
  0xe8   : > { %v1009_v27 = vpop.permute.xlu0 %1008 }
  0xe9   : > { %v1019_v49 = vpop.permute.xlu1 %1018  ;;  %v1031_v0 = vsel %vm4686_vm15, %v3748_v23, %v1009_v27  ;;  %vm4687_vm15 = vmmov %vm4685_vm10 }
  0xea   : > { %v1039_v44 = vsel %vm933_vm9, %v1028_v28, %v1019_v49 }
  0xeb   : > { %2881 = vmatprep.mubr.msk.bf16.mxu0 %vm1082_vm8, %v1039_v44 }
  0xec   : > { %v1011_v2 = vpop.permute.xlu0 %1010 }
  0xed   : > { %v1021_v11 = vpop.permute.xlu1 %1020  ;;  %v1034_v15 = vsel %vm4685_vm10, %v3782_v13, %v1011_v2  ;;  %v820_v13 = vpack.c.bf16 %v813_v12, %v3204_v50 }
  0xee   : > { %v1041_v31 = vsel %vm933_vm9, %v1031_v0, %v1021_v11  ;;  %v3021_v0 = vld [vmem:[%s4623_s5 + $0x78] sm:$0xff]  }
  0xef   : > { %2882 = vmatmul.mubr.msk.bf16.vlgmr.msra.gmra.mrb[0].mxu0 %vm1082_vm8, %v1041_v31 }
  0xf0   : > { %2890 = vmatpush3.bf16.msra.mxu0 %v3493_v19  ;;  %v1023_v23 = vpop.permute.xlu0 %1022 }
  0xf1   : > { %2891 = vmatprep.subr.bf16.mxu0 %v3013_v22  ;;  %v1013_v18 = vpop.permute.xlu1 %1012  ;;  %v1043_v9 = vsel %vm933_vm9, %v1034_v15, %v1023_v23 }
  0xf2   : > { %2885 = vmatprep.mubr.msk.bf16.mxu0 %vm1082_vm8, %v1043_v9  ;;  %v1037_v43 = vsel %vm4687_vm15, %v3792_v5, %v1013_v18  ;;  %v3016_v5 = vld [vmem:[%s4623_s5 + $0x20] sm:$0xff]   ;;  %vm4688_vm15 = vmmov %vm4685_vm10  ;;  %v1287_v18 = vsel %vm3744_vm0, %v3776_v26, 0.0 }
  0xf3   : > { %v2758_v26 = vld [vmem:[%s4624_s6] ss:$0 sm:$0xff] }
  0xf4   : > { %2892 = vmatpush3.bf16.msra.mxu0 %v3013_v22  ;;  %v902_v41 = vpop.permute.xlu0 %901  ;;  %v3023_v22 = vld [vmem:[%s4623_s5 + $0x88] sm:$0xff]  }
  0xf5   : > { %2893 = vmatprep.subr.bf16.mxu0 %v3014_v36  ;;  %v1025_v19 = vpop.permute.xlu1 %1024  ;;  %v923_v34 = vsel %vm4685_vm10, %v820_v13, %v902_v41 }
  0xf6   : > { %v1045_v16 = vsel %vm933_vm9, %v1037_v43, %v1025_v19  ;;  %v1292_v43 = vpack.c.bf16 %v3204_v50, %v1287_v18 }
  0xf7   : > { %2886 = vmatmul.mubr.msk.bf16.gmra.mrb[4].mxu0 %vm1082_vm8, %v1045_v16  ;;  %v2759_v16 = vld [vmem:[%s483_s25] ss:$0 sm:$0xff] }
  0xf8   : > { %2894 = vmatpush3.bf16.msra.mxu0 %v3014_v36  ;;  %v914_v40 = vpop.permute.xlu0 %913 }
  0xf9   : > { %2895 = vmatprep.subr.bf16.mxu0 %v3015_v33  ;;  %v904_v47 = vpop.permute.xlu1 %903  ;;  %v935_v52 = vsel %vm933_vm9, %v923_v34, %v914_v40 }
  0xfa   : > { %2901 = vmatprep.mubr.msk.bf16.mxu0 %vm1082_vm8, %v935_v52  ;;  %v926_v39 = vsel %vm4685_vm10, %v3794_v58, %v904_v47 }
  0xfc   : > { %2896 = vmatpush3.bf16.msra.mxu0 %v3015_v33  ;;  %v906_v14 = vpop.permute.xlu0 %905 }
  0xfd   : > { %2897 = vmatprep.subr.bf16.mxu0 %v3016_v5  ;;  %v916_v7 = vpop.permute.xlu1 %915  ;;  %v929_v63 = vsel %vm4688_vm15, %v3815_v53, %v906_v14  ;;  %vm4689_vm15 = vmmov %vm4685_vm10  ;;  %v3020_v53 = vld [vmem:[%s4623_s5 + $0x70] sm:$0xff]  }
  0xfe   : > { %v937_v59 = vsel %vm933_vm9, %v926_v39, %v916_v7 }
 0x100   : > { %2898 = vmatpush3.bf16.msra.mxu0 %v3016_v5  ;;  %v918_v8 = vpop.permute.xlu0 %917 }
 0x101   : > { %2899 = vmatprep.subr.bf16.mxu0 %v3017_v24  ;;  %v908_v20 = vpop.permute.xlu1 %907  ;;  %v939_v25 = vsel %vm933_vm9, %v929_v63, %v918_v8 }
 0x102   : > { %v932_v58 = vsel %vm4689_vm15, %v3817_v1, %v908_v20  ;;  %vm4690_vm15 = vmmov %vm4685_vm10 }
 0x104   : > { %2900 = vmatpush3.bf16.msra.mxu0 %v3017_v24  ;;  %v1354_v42 = vpop.permute.xlu0 %1353 }
 0x105   : > { %2909 = vmatprep.subr.bf16.mxu0 %v3018_v60  ;;  %v920_v28 = vpop.permute.xlu1 %919  ;;  %v1375_v27 = vsel %vm4685_vm10, %v3845_v54, %v1354_v42  ;;  %v3022_v54 = vld [vmem:[%s4623_s5 + $0x80] sm:$0xff]  }
 0x106   : > { %v941_v44 = vsel %vm933_vm9, %v932_v58, %v920_v28 }
 0x107   : > { %2902 = vmatmul.mubr.msk.bf16.vlgmr.msra.gmra.mrb[0].mxu0 %vm1082_vm8, %v937_v59 }
 0x108   : > { %2910 = vmatpush3.bf16.msra.mxu0 %v3018_v60  ;;  %2905 = vmatprep.mubr.msk.bf16.mxu0 %vm1082_vm8, %v939_v25  ;;  %v1366_v49 = vpop.permute.xlu0 %1365 }
 0x109   : > { %2911 = vmatprep.subr.bf16.mxu0 %v3019_v6  ;;  %v1386_v2 = vsel %vm933_vm9, %v1375_v27, %v1366_v49  ;;  %v1356_v1 = vpop.permute.xlu1 %1355 }
 0x10a   : > { %v1378_v23 = vsel %vm4685_vm10, %v3847_v57, %v1356_v1 }
 0x10c   : > { %2912 = vmatpush3.bf16.msra.mxu0 %v3019_v6  ;;  %v1358_v11 = vpop.permute.xlu0 %1357 }
 0x10d   : > { %2913 = vmatprep.subr.bf16.mxu0 %v3020_v53  ;;  %v1368_v31 = vpop.permute.xlu1 %1367  ;;  %v1381_v15 = vsel %vm4690_vm15, %v3869_v46, %v1358_v11  ;;  %vm4691_vm15 = vmmov %vm4685_vm10  ;;  %vm1611_vm10 = vcmask 7168  }
 0x10e   : > { %v1388_v13 = vsel %vm933_vm9, %v1378_v23, %v1368_v31 }
 0x10f   : > { %2906 = vmatmul.mubr.msk.bf16.gmra.mrb[4].mxu0 %vm1082_vm8, %v941_v44 }
 0x110   : > { %2914 = vmatpush3.bf16.msra.mxu0 %v3020_v53  ;;  %2921 = vmatprep.mubr.msk.bf16.mxu0 %vm1082_vm8, %v1386_v2  ;;  %v1370_v12 = vpop.permute.xlu0 %1369 }
 0x111   : > { %2915 = vmatprep.subr.bf16.mxu0 %v3021_v0  ;;  %v1360_v36 = vpop.permute.xlu1 %1359  ;;  %v1390_v9 = vsel %vm933_vm9, %v1381_v15, %v1370_v12 }
 0x112   : > { %v1384_v46 = vsel %vm4691_vm15, %v1292_v43, %v1360_v36 }
 0x114   : > { %2916 = vmatpush3.bf16.msra.mxu0 %v3021_v0 }
 0x115   : > { %2917 = vmatprep.subr.bf16.mxu0 %v3022_v54  ;;  %v1372_v41 = vpop.permute.xlu1 %1371 }
 0x116   : > { %v1392_v57 = vsel %vm933_vm9, %v1384_v46, %v1372_v41 }
 0x118   : > { %2918 = vmatpush3.bf16.msra.mxu0 %v3022_v54 }
 0x119   : > { %2919 = vmatprep.subr.bf16.mxu0 %v3023_v22 }
 0x11c   : > { %2920 = vmatpush3.bf16.msra.mxu0 %v3023_v22 }
 0x11f   : > { %2922 = vmatmul.mubr.msk.bf16.vlgmr.msra.gmra.mrb[0].mxu0 %vm1082_vm8, %v1388_v13 }
 0x120   : > { %2925 = vmatprep.mubr.msk.bf16.mxu0 %vm1082_vm8, %v1390_v9 }
 0x127   : > { %2926 = vmatmul.mubr.msk.bf16.gmra.mrb[4].mxu0 %vm1082_vm8, %v1392_v57  ;;  %vm1603_vm8 = vcmask 515072  }
 0x1f2   : > { %v2923_v19 = vpop.f32.mrb[0].mxu0 }
 0x1f3   : > { %v1519_v33 = vadd.f32 %v2923_v19, %v2758_v26  ;;  %v1471_v34 = vpop.f32.mrb[1].mxu0 }
 0x1f4   : > { %v1517_v40 = vadd.f32 %v2758_v26, %v1471_v34  ;;  %v2924_v47 = vpop.f32.mrb[2].mxu0 }
 0x1f5   : > { %v1520_v5 = vadd.f32 %v2924_v47, %v2758_v26  ;;  %v1474_v52 = vpop.f32.mrb[3].mxu0  ;;  %v3970_v14 = vadd.f32 %v2759_v16, %v1519_v33 }
 0x1f6   : > { %v3972_v24 = vadd.f32 %v2759_v16, %v1517_v40  ;;  %v1518_v7 = vadd.f32 %v2758_v26, %v1474_v52 }
 0x1f7   : > { %v3976_v60 = vadd.f32 %v2759_v16, %v1520_v5  ;;  %v1565_v39 = vmul.f32 %v3970_v14, %v3970_v14  ;;  %v1545_v59 = vsel %vm933_vm9, %v3970_v14, 0.0 }
 0x1f8   : > { %v1563_v8 = vmul.f32 %v3972_v24, %v3972_v24  ;;  %v3978_v63 = vadd.f32 %v2759_v16, %v1518_v7  ;;  %v1542_v20 = vsel %vm933_vm9, %v3972_v24, 0.0 }
 0x1f9   : > { %v1566_v49 = vmul.f32 %v3976_v60, %v3976_v60  ;;  %v1574_v31 = vsel %vm933_vm9, %v1565_v39, 0.0  ;;  %v1547_v15 = vsel %vm933_vm9, %v3976_v60, 0.0 }
 0x1fa   : > { %v1543_v42 = vsel %vm933_vm9, %v3978_v63, 0.0  ;;  %v1564_v6 = vmul.f32 %v3978_v63, %v3978_v63  ;;  %v2927_v25 = vpop.f32.mrb[4].mxu0  ;;  %v1571_v27 = vsel %vm933_vm9, %v1563_v8, 0.0 }
 0x1fb   : > { %v1544_v58 = vadd.f32 %v1543_v42, %v1542_v20  ;;  %v1523_v53 = vadd.f32 %v2927_v25, %v2758_v26  ;;  %v1487_v28 = vpop.f32.mrb[5].mxu0  ;;  %v1576_v13 = vsel %vm933_vm9, %v1566_v49, 0.0 }
 0x1fc   : > { %v1572_v44 = vsel %vm933_vm9, %v1564_v6, 0.0  ;;  %v1521_v0 = vadd.f32 %v2758_v26, %v1487_v28  ;;  %v2928_v2 = vpop.f32.mrb[6].mxu0 }
 0x1fd   : > { %v1546_v1 = vadd.f32 %v1545_v59, %v1544_v58  ;;  %v1573_v54 = vadd.f32 %v1572_v44, %v1571_v27  ;;  %v1524_v11 = vadd.f32 %v2928_v2, %v2758_v26  ;;  %v1490_v22 = vpop.f32.mrb[7].mxu0  ;;  %v3999_v36 = vadd.f32 %v2759_v16, %v1523_v53 }
 0x1fe   : > { %v3997_v12 = vadd.f32 %v2759_v16, %v1521_v0  ;;  %v1522_v23 = vadd.f32 %v2758_v26, %v1490_v22 }
 0x1ff   : > { %v1575_v18 = vadd.f32 %v1574_v31, %v1573_v54  ;;  %v1548_v9 = vadd.f32 %v1547_v15, %v1546_v1  ;;  %v4008_v33 = vadd.f32 %v2759_v16, %v1524_v11  ;;  %v1569_v40 = vmul.f32 %v3999_v36, %v3999_v36 }
 0x200   : > { %v1549_v43 = vsel %vm933_vm9, %v3997_v12, 0.0  ;;  %v1567_v46 = vmul.f32 %v3997_v12, %v3997_v12  ;;  %v4006_v41 = vadd.f32 %v2759_v16, %v1522_v23  ;;  %v1553_v7 = vsel %vm933_vm9, %v3999_v36, 0.0  ;;  %v3024_v23 = vld [vmem:[%s4627_s10 + $0x60] sm:$0xff]  }
 0x201   : > { %v1550_v57 = vadd.f32 %v1549_v43, %v1548_v9  ;;  %v1577_v19 = vadd.f32 %v1576_v13, %v1575_v18  ;;  %v1570_v16 = vmul.f32 %v4008_v33, %v4008_v33  ;;  %v1555_v20 = vsel %vm933_vm9, %v4008_v33, 0.0  ;;  %v3028_v9 = vld [vmem:[%s4627_s10 + $0xc0] sm:$0xff]   ;;  %v3025_v13 = vld [vmem:[%s4627_s10 + $0x68] sm:$0xff]  }
 0x202   : > { %v1578_v26 = vsel %vm933_vm9, %v1567_v46, 0.0  ;;  %v1551_v34 = vsel %vm933_vm9, %v4006_v41, 0.0  ;;  %v1568_v52 = vmul.f32 %v4006_v41, %v4006_v41  ;;  %v1582_v6 = vsel %vm933_vm9, %v1569_v40, 0.0  ;;  %v3030_v43 = vld [vmem:[%s4627_s10 + $0xc8] sm:$0xff]   ;;  %v3026_v46 = vld [vmem:[%s4627_s10 + $0x70] sm:$0xff]   ;;  %v3036_v40 = vld [vmem:[%s4627_s10 + $0xe0] sm:$0xff]  }
 0x203   : > { %v1579_v47 = vadd.f32 %v1578_v26, %v1577_v19  ;;  %v1552_v5 = vadd.f32 %v1551_v34, %v1550_v57  ;;  %v1584_v58 = vsel %vm933_vm9, %v1570_v16, 0.0  ;;  %v3209_v18 = vmov 0   ;;  %v3032_v57 = vld [vmem:[%s4627_s10 + $0xd0] sm:$0xff]   ;;  %v3027_v19 = vld [vmem:[%s4627_s10 + $0x78] sm:$0xff]   ;;  %v3029_v34 = vld [vmem:[%s4627_s10 + $0x80] sm:$0xff]  }
 0x204   : > { %v1580_v39 = vsel %vm933_vm9, %v1568_v52, 0.0  ;;  %2056 = vmatprep.subr.bf16.mxu1 %v3209_v18  ;;  %2418 = vmatprep.subr.bf16.mxu0 %v3209_v18  ;;  %v3034_v26 = vld [vmem:[%s4627_s10 + $0xd8] sm:$0xff]   ;;  %v3033_v52 = vld [vmem:[%s4627_s10 + $0x90] sm:$0xff]   ;;  %v1593_v16 = vand.u32 127, %v493_v48  ;;  %v3037_v48 = vld [vmem:[%s4627_s10 + $0xa0] sm:$0xff]  }
 0x205   : > { %v1554_v8 = vadd.f32 %v1553_v7, %v1552_v5  ;;  %v1581_v42 = vadd.f32 %v1580_v39, %v1579_v47  ;;  %2057 = vmatpush1.bf16.msra.mxu1 %v3024_v23  ;;  %2419 = vmatpush1.bf16.msra.mxu0 %v3028_v9  ;;  %v3031_v47 = vld [vmem:[%s4627_s10 + $0x88] sm:$0xff]   ;;  %v3040_v7 = vld [vmem:[%s4627_s10 + $0xf0] sm:$0xff]   ;;  %v3042_v39 = vld [vmem:[%s4627_s10 + $0xf8] sm:$0xff]  }
 0x206   : > { %2058 = vmatprep.subr.bf16.mxu1 %v3209_v18  ;;  %2420 = vmatprep.subr.bf16.mxu0 %v3209_v18  ;;  %v3038_v5 = vld [vmem:[%s4627_s10 + $0xe8] sm:$0xff]  }
 0x207   : > { %v1556_v25 = vadd.f32 %v1555_v20, %v1554_v8  ;;  %v1583_v59 = vadd.f32 %v1582_v6, %v1581_v42  ;;  %v3035_v8 = vld [vmem:[%s4627_s10 + $0x98] sm:$0xff]   ;;  %v1594_v20 = vand.u32 1, %v1593_v16 }
 0x209   : > { %v1557_v53 = vrot.slane %v1556_v25, 4  ;;  %v1585_v28 = vadd.f32 %v1584_v58, %v1583_v59  ;;  %2059 = vmatpush1.bf16.msra.mxu1 %v3025_v13  ;;  %2421 = vmatpush1.bf16.msra.mxu0 %v3030_v43  ;;  %vm4111_vm15 = vcmp.eq.s32.totalorder %v1594_v20, 0  ;;  %v3039_v58 = vld [vmem:[%s4627_s10 + $0xa8] sm:$0xff]   ;;  %v2760_v20 = vld [vmem:[%s4625_s7] ss:$0 sm:$0xff] }
 0x20a   : > { %2060 = vmatprep.subr.bf16.mxu1 %v3209_v18  ;;  %2422 = vmatprep.subr.bf16.mxu0 %v3209_v18 }
 0x20b   : > { %v1558_v27 = vadd.f32 %v1557_v53, %v1556_v25  ;;  %v1586_v49 = vrot.slane %v1585_v28, 4  ;;  %v3044_v25 = vld [vmem:[%s4627_s10 + $0x100] sm:$0xff]  }
 0x20d   : > { %v1559_v44 = vrot.slane %v1558_v27, 2  ;;  %v1587_v0 = vadd.f32 %v1586_v49, %v1585_v28  ;;  %2061 = vmatpush1.bf16.msra.mxu1 %v3026_v46  ;;  %2423 = vmatpush1.bf16.msra.mxu0 %v3032_v57 }
 0x20e   : > { %2062 = vmatprep.subr.bf16.mxu1 %v3209_v18  ;;  %2424 = vmatprep.subr.bf16.mxu0 %v3209_v18 }
 0x20f   : > { %v1560_v2 = vadd.f32 %v1559_v44, %v1558_v27  ;;  %v1588_v1 = vrot.slane %v1587_v0, 2 }
 0x211   : > { %v1561_v54 = vrot.slane %v1560_v2, 1  ;;  %v1589_v22 = vadd.f32 %v1588_v1, %v1587_v0  ;;  %2063 = vmatpush1.bf16.msra.mxu1 %v3027_v19  ;;  %2425 = vmatpush1.bf16.msra.mxu0 %v3034_v26  ;;  %v3041_v0 = vld [vmem:[%s4627_s10 + $0xb0] sm:$0xff]  }
 0x212   : > { %2064 = vmatprep.subr.bf16.mxu1 %v3209_v18  ;;  %2426 = vmatprep.subr.bf16.mxu0 %v3209_v18 }
 0x213   : > { %v4026_v11 = vadd.f32 %v1561_v54, %v1560_v2  ;;  %v1590_v31 = vrot.slane %v1589_v22, 1 }
 0x215   : > { %1600 = vrot.lane.b32.xlu1 %v4026_v11, %s3205_s22  ;;  %1597 = vrot.lane.b32.xlu0 %v4026_v11, %s3206_s18  ;;  %v4032_v15 = vadd.f32 %v1590_v31, %v1589_v22  ;;  %v3043_v22 = vld [vmem:[%s4627_s10 + $0xb8] sm:$0xff]  }
 0x216   : > { %2065 = vmatpush1.bf16.msra.mxu1 %v3029_v34  ;;  %2427 = vmatpush1.bf16.msra.mxu0 %v3036_v40 }
 0x217   : > { %2066 = vmatprep.subr.bf16.mxu1 %v3209_v18  ;;  %2428 = vmatprep.subr.bf16.mxu0 %v3209_v18 }
 0x219   : > { %1608 = vrot.lane.b32.xlu1 %v4026_v11, %s3207_s19  ;;  %1605 = vrot.lane.b32.xlu0 %v4026_v11, %s3208_s23 }
 0x21a   : > { %2067 = vmatpush1.bf16.msra.mxu1 %v3031_v47  ;;  %2429 = vmatpush1.bf16.msra.mxu0 %v3038_v5  ;;  %v1642_v47 = vsub.s32 0, %v3464_v55 }
 0x21b   : > { %2068 = vmatprep.subr.bf16.mxu1 %v3209_v18  ;;  %2430 = vmatprep.subr.bf16.mxu0 %v3209_v18 }
 0x21d   : > { %1619 = vrot.lane.b32.xlu1 %v4032_v15, %s3205_s22  ;;  %1616 = vrot.lane.b32.xlu0 %v4032_v15, %s3206_s18  ;;  %s4694_s22 = smov 64   ;;  %s3210_s18 = smov [#allocation4]  }
 0x21e   : > { %2069 = vmatpush1.bf16.msra.mxu1 %v3033_v52  ;;  %2431 = vmatpush1.bf16.msra.mxu0 %v3040_v7 }
 0x21f   : > { %2070 = vmatprep.subr.bf16.mxu1 %v3209_v18  ;;  %2432 = vmatprep.subr.bf16.mxu0 %v3209_v18 }
 0x221   : > { %1626 = vrot.lane.b32.xlu1 %v4032_v15, %s3207_s19  ;;  %1623 = vrot.lane.b32.xlu0 %v4032_v15, %s3208_s23  ;;  %s2832_s23 = sshll.u32 %s3309_s9, 10 }
 0x222   : > { %2071 = vmatpush1.bf16.msra.mxu1 %v3035_v8  ;;  %2433 = vmatpush1.bf16.msra.mxu0 %v3042_v39 }
 0x223   : > { %2072 = vmatprep.subr.bf16.mxu1 %v3209_v18  ;;  %2434 = vmatprep.subr.bf16.mxu0 %v3209_v18 }
 0x226   : > { %2073 = vmatpush1.bf16.msra.mxu1 %v3037_v48  ;;  %2435 = vmatpush1.bf16.msra.mxu0 %v3044_v25 }
 0x227   : > { %2074 = vmatprep.subr.bf16.mxu1 %v3209_v18  ;;  %2436 = vmatprep.subr.bf16.mxu0 %v3209_v18 }
 0x22a   : > { %2075 = vmatpush1.bf16.msra.mxu1 %v3039_v58 }
 0x22b   : > { %2076 = vmatprep.subr.bf16.mxu1 %v3209_v18 }
 0x22e   : > { %2077 = vmatpush1.bf16.msra.mxu1 %v3041_v0 }
 0x22f   : > { %2078 = vmatprep.subr.bf16.mxu1 %v3209_v18 }
 0x232   : > { %2079 = vmatpush1.bf16.msra.mxu1 %v3043_v22 }
 0x233   : > { %2205 = vmatprep.subr.bf16.mxu1 %v3209_v18 }
 0x287   : > { %v1601_v42 = vpop.permute.xlu1 %1600  ;;  %v1598_v6 = vpop.permute.xlu0 %1597 }
 0x288   : > { %v1604_v27 = vsel %vm1603_vm8, %v1598_v6, %v1601_v42 }
 0x28b   : > { %v1609_v53 = vpop.permute.xlu1 %1608  ;;  %v1606_v28 = vpop.permute.xlu0 %1605 }
 0x28c   : > { %v1612_v49 = vsel %vm1611_vm10, %v1606_v28, %v1609_v53 }
 0x28d   : > { %v1613_v44 = vsel %vm4111_vm15, %v1604_v27, %v1612_v49 }
 0x28e   : > { %v1614_v54 = vadd.f32 %v1613_v44, %v4026_v11 }
 0x28f   : > { %v1620_v2 = vpop.permute.xlu1 %1619  ;;  %v1617_v1 = vpop.permute.xlu0 %1616 }
 0x290   : > { %v1633_v9 = vmul.f32 0.0078125, %v1614_v54  ;;  %v1622_v13 = vsel %vm1603_vm8, %v1617_v1, %v1620_v2  ;;  %vm4695_vm8 = vcmp.lt.s32.totalorder %v3464_v55, 7 }
 0x292   : > { %v1635_v11 = vmul.f32 %v1633_v9, %v1633_v9  ;;  %v1643_v5 = vrot.slane %v1633_v9, %v1642_v47 }
 0x293   : > { %v1627_v31 = vpop.permute.xlu1 %1626  ;;  %v1624_v23 = vpop.permute.xlu0 %1623 }
 0x294   : > { %v1629_v43 = vsel %vm1611_vm10, %v1624_v23, %v1627_v31  ;;  %v1646_v7 = vsub.f32 %v3970_v14, %v1643_v5  ;;  %v1647_v8 = vsub.f32 %v3976_v60, %v1643_v5  ;;  %v1645_v39 = vsub.f32 %v3978_v63, %v1643_v5  ;;  %vm4696_vm10 = vmmov %vm4695_vm8 }
 0x295   : > { %v1630_v46 = vsel %vm4111_vm15, %v1622_v13, %v1629_v43  ;;  %v1650_v48 = vsub.f32 %v3999_v36, %v1643_v5  ;;  %v1651_v42 = vsub.f32 %v4008_v33, %v1643_v5  ;;  %v1648_v6 = vsub.f32 %v3997_v12, %v1643_v5  ;;  %vm4697_vm15 = vmmov %vm4695_vm8 }
 0x296   : > { %v1631_v57 = vadd.f32 %v1630_v46, %v4032_v15  ;;  %v1644_v15 = vsub.f32 %v3972_v24, %v1643_v5  ;;  %v1649_v25 = vsub.f32 %v4006_v41, %v1643_v5  ;;  %v2761_v24 = vld [vmem:[%s4626_s8] ss:$0 sm:$0xff] }
 0x298   : > { %v1634_v19 = vmul.f32 0.0078125, %v1631_v57 }
 0x29a   : > { %v1636_v26 = vsub.f32 %v1634_v19, %v1635_v11 }
 0x29c   : > { %v1637_v34 = vmax.f32 %v1636_v26, 0.0 }
 0x29e   : > { %v1638_v40 = vadd.f32 1e-05, %v1637_v34 }
 0x2a0   : > { %3096 = vrsqrt.f32 %v1638_v40 }
 0x2aa   : > { %v3097_v52 = vpop.eup %3096 }
 0x2ab   : > { %v1655_v16 = vrot.slane %v3097_v52, %v1642_v47 }
 0x2ad   : > { %v1658_v14 = vmul.f32 %v1655_v16, %v1646_v7  ;;  %v1659_v59 = vmul.f32 %v1655_v16, %v1647_v8  ;;  %v1656_v58 = vmul.f32 %v1655_v16, %v1644_v15  ;;  %v1657_v60 = vmul.f32 %v1655_v16, %v1645_v39 }
 0x2ae   : > { %v1662_v63 = vmul.f32 %v1655_v16, %v1650_v48  ;;  %v1663_v53 = vmul.f32 %v1655_v16, %v1651_v42  ;;  %v1660_v28 = vmul.f32 %v1655_v16, %v1648_v6  ;;  %v1661_v27 = vmul.f32 %v1655_v16, %v1649_v25 }
 0x2af   : > { %v1672_v49 = vmul.f32 %v2760_v20, %v1658_v14  ;;  %v1673_v36 = vmul.f32 %v2760_v20, %v1659_v59  ;;  %v1670_v44 = vmul.f32 %v2760_v20, %v1656_v58  ;;  %v1671_v33 = vmul.f32 %v2760_v20, %v1657_v60 }
 0x2b0   : > { %v1676_v0 = vmul.f32 %v2760_v20, %v1662_v63  ;;  %v1677_v12 = vmul.f32 %v2760_v20, %v1663_v53  ;;  %v1674_v2 = vmul.f32 %v2760_v20, %v1660_v28  ;;  %v1675_v41 = vmul.f32 %v2760_v20, %v1661_v27  ;;  %v3048_v27 = vld [vmem:[%s4627_s10 + $0x110] sm:$0xff]  }
 0x2b1   : > { %v1686_v1 = vadd.f32 %v2761_v24, %v1672_v49  ;;  %v1687_v54 = vadd.f32 %v2761_v24, %v1673_v36  ;;  %v1684_v22 = vadd.f32 %v2761_v24, %v1670_v44  ;;  %v1685_v31 = vadd.f32 %v2761_v24, %v1671_v33 }
 0x2b2   : > { %v4154_v23 = vadd.f32 %v2761_v24, %v1676_v0  ;;  %v4156_v9 = vadd.f32 %v2761_v24, %v1677_v12  ;;  %v4158_v57 = vadd.f32 %v2761_v24, %v1674_v2  ;;  %v4160_v19 = vadd.f32 %v2761_v24, %v1675_v41  ;;  %v3046_v24 = vld [vmem:[%s4627_s10 + $0x108] sm:$0xff]  }
 0x2b3   : > { %v2764_v13 = vmul.f32 -1.442695, %v1686_v1  ;;  %v2765_v43 = vmul.f32 -1.442695, %v1687_v54  ;;  %v2762_v46 = vmul.f32 -1.442695, %v1684_v22  ;;  %2437 = vmatpush1.bf16.msra.mxu0 %v3046_v24 }
 0x2b4   : > { %v2763_v11 = vmul.f32 -1.442695, %v1685_v31  ;;  %v2768_v26 = vmul.f32 -1.442695, %v4154_v23  ;;  %v2769_v34 = vmul.f32 -1.442695, %v4156_v9  ;;  %2438 = vmatprep.subr.bf16.mxu0 %v3209_v18 }
 0x2b5   : > { %3098 = vpow2.f32 %v2764_v13  ;;  %v2766_v40 = vmul.f32 -1.442695, %v4158_v57  ;;  %v2767_v47 = vmul.f32 -1.442695, %v4160_v19 }
 0x2b6   : > { %3100 = vpow2.f32 %v2765_v43 }
 0x2b7   : > { %3102 = vpow2.f32 %v2762_v46  ;;  %2439 = vmatpush1.bf16.msra.mxu0 %v3048_v27 }
 0x2b8   : > { %3104 = vpow2.f32 %v2763_v11  ;;  %2440 = vmatprep.subr.bf16.mxu0 %v3209_v18  ;;  %v3050_v11 = vld [vmem:[%s4627_s10 + $0x118] sm:$0xff]  }
 0x2b9   : > { %3106 = vpow2.f32 %v2768_v26 }
 0x2ba   : > { %3108 = vpow2.f32 %v2769_v34 }
 0x2bb   : > { %3110 = vpow2.f32 %v2766_v40  ;;  %2441 = vmatpush1.bf16.msra.mxu0 %v3050_v11 }
 0x2bc   : > { %3112 = vpow2.f32 %v2767_v47 }
 0x2bf   : > { %v3099_v5 = vpop.eup %3098 }
 0x2c0   : > { %v3101_v52 = vpop.eup %3100  ;;  %v1718_v7 = vadd.f32 1.0, %v3099_v5 }
 0x2c1   : > { %v3103_v16 = vpop.eup %3102  ;;  %v1719_v8 = vadd.f32 1.0, %v3101_v52 }
 0x2c2   : > { %v3105_v15 = vpop.eup %3104  ;;  %3114 = vrcp.f32 %v1718_v7  ;;  %v1716_v39 = vadd.f32 1.0, %v3103_v16 }
 0x2c3   : > { %v3107_v20 = vpop.eup %3106  ;;  %3116 = vrcp.f32 %v1719_v8  ;;  %v1717_v48 = vadd.f32 1.0, %v3105_v15 }
 0x2c4   : > { %v3109_v42 = vpop.eup %3108  ;;  %3118 = vrcp.f32 %v1716_v39  ;;  %v1722_v6 = vadd.f32 1.0, %v3107_v20 }
 0x2c5   : > { %v3111_v25 = vpop.eup %3110  ;;  %3120 = vrcp.f32 %v1717_v48  ;;  %v1723_v14 = vadd.f32 1.0, %v3109_v42 }
 0x2c6   : > { %v3113_v59 = vpop.eup %3112  ;;  %3122 = vrcp.f32 %v1722_v6  ;;  %v1720_v58 = vadd.f32 1.0, %v3111_v25 }
 0x2c7   : > { %3124 = vrcp.f32 %v1723_v14  ;;  %v1721_v60 = vadd.f32 1.0, %v3113_v59 }
 0x2c8   : > { %3126 = vrcp.f32 %v1720_v58 }
 0x2c9   : > { %3128 = vrcp.f32 %v1721_v60 }
 0x2cc   : > { %v3115_v63 = vpop.eup %3114 }
 0x2cd   : > { %v3117_v53 = vpop.eup %3116  ;;  %v1742_v28 = vmul.f32 %v3115_v63, %v1686_v1 }
 0x2ce   : > { %v3119_v49 = vpop.eup %3118  ;;  %v4173_v36 = vmul.f32 %v3117_v53, %v1687_v54 }
 0x2cf   : > { %v3121_v44 = vpop.eup %3120  ;;  %v4175_v33 = vmul.f32 %v3119_v49, %v1684_v22  ;;  %v1862_v0 = vrot.slane %v1742_v28, 1  ;;  %v1822_v46 = vrot.slane %v1742_v28, 7 }
 0x2d0   : > { %v3123_v12 = vpop.eup %3122  ;;  %v1929_v2 = vpack.c.bf16 %v4173_v36, %v1742_v28  ;;  %v1741_v41 = vmul.f32 %v3121_v44, %v1685_v31  ;;  %v1863_v13 = vrot.slane %v4173_v36, 1  ;;  %v1823_v22 = vrot.slane %v4173_v36, 7 }
 0x2d1   : > { %v3125_v1 = vpop.eup %3124  ;;  %v4181_v43 = vmul.f32 %v3123_v12, %v4154_v23  ;;  %v1860_v54 = vrot.slane %v4175_v33, 1  ;;  %v1820_v7 = vrot.slane %v4175_v33, 7  ;;  %v1856_v14 = vpack.c.bf16 %v4175_v33, %v3204_v50 }
 0x2d2   : > { %v3127_v26 = vpop.eup %3126  ;;  %1950 = vrot.lane.b32.xlu1 %v1929_v2, %s4694_s22  ;;  %v1928_v31 = vpack.c.bf16 %v1741_v41, %v4175_v33  ;;  %v4191_v34 = vmul.f32 %v3125_v1, %v4156_v9  ;;  %v1861_v40 = vrot.slane %v1741_v41, 1  ;;  %v4195_v23 = vsel %vm4695_vm8, %v1862_v0, %v1863_v13 }
 0x2d3   : > { %v3129_v47 = vpop.eup %3128  ;;  %v2295_v5 = vsel %vm3512_vm3, %v4195_v23, 0.0  ;;  %v1744_v52 = vmul.f32 %v3127_v26, %v4158_v57  ;;  %v1821_v16 = vrot.slane %v1741_v41, 7  ;;  %v1857_v25 = vpack.c.bf16 %v1742_v28, %v1741_v41 }
 0x2d4   : > { %1948 = vrot.lane.b32.xlu0 %v1928_v31, %s4694_s22  ;;  %v1931_v9 = vpack.c.bf16 %v4191_v34, %v4181_v43  ;;  %v4207_v8 = vsel %vm4696_vm10, %v1861_v40, %v1862_v0  ;;  %v4210_v15 = vmul.f32 %v3129_v47, %v4160_v19  ;;  %v4216_v57 = vsel %vm4697_vm15, %v1860_v54, %v1861_v40 }
 0x2d5   : > { %v2294_v39 = vsel %vm3506_vm2, %v4207_v8, 0.0  ;;  %v1932_v20 = vsel %vm3506_vm2, %v4216_v57, 0.0  ;;  %v1933_v48 = vsel %vm3512_vm3, %v4207_v8, 0.0  ;;  %v1827_v59 = vrot.slane %v4191_v34, 7 }
 0x2d6   : > { %1954 = vrot.lane.b32.xlu1 %v1931_v9, %s4694_s22  ;;  %v2302_v19 = vpack.c.bf16 %v2295_v5, %v2294_v39  ;;  %v1930_v42 = vpack.c.bf16 %v4210_v15, %v1744_v52  ;;  %v1940_v6 = vpack.c.bf16 %v1933_v48, %v1932_v20  ;;  %vm4698_vm2 = vcmp.lt.s32.totalorder %v3464_v55, 1 }
 0x2d7   : > { %v4236_v3 = vsel %vm4698_vm2, %v1820_v7, %v1821_v16  ;;  %v1864_v58 = vrot.slane %v1744_v52, 1  ;;  %v1934_v60 = vsel %vm3534_vm4, %v4195_v23, 0.0  ;;  %vm4699_vm8 = vmmov %vm4698_vm2  ;;  %v1858_v49 = vpack.c.bf16 %v1744_v52, %v4173_v36 }
 0x2d8   : > { %2814 = vmatprep.mubr.msk.bf16.mxu0 %vm933_vm9, %v2302_v19  ;;  %1952 = vrot.lane.b32.xlu0 %v1930_v42, %s4694_s22  ;;  %v4245_v24 = vsel %vm4699_vm8, %v1822_v46, %v1823_v22  ;;  %vm4700_vm10 = vmmov %vm4698_vm2  ;;  %v1917_v53 = vsel %vm3664_vm12, %v4236_v3, 0.0  ;;  %v1859_v2 = vpack.c.bf16 %v4181_v43, %v4210_v15  ;;  %v1866_v26 = vrot.slane %v4181_v43, 1 }
 0x2d9   : > { %2782 = vmatprep.mubr.msk.bf16.mxu1 %vm933_vm9, %v1940_v6  ;;  %v4252_v63 = vsel %vm4700_vm10, %v1827_v59, %v1820_v7  ;;  %vm4701_vm15 = vmmov %vm4698_vm2  ;;  %v1919_v27 = vsel %vm3690_vm14, %v4245_v24, 0.0  ;;  %vm4702_vm2 = vcmp.lt.s32.totalorder %v3464_v55, 7  ;;  %v2270_v40 = vsel %vm4684_vm11, %v4236_v3, 0.0 }
 0x2da   : > { %v4259_v28 = vsel %vm4701_vm15, %v1821_v16, %v1822_v46  ;;  %1894 = vrot.lane.b32.xlu1 %v1857_v25, %s4694_s22  ;;  %v1916_v44 = vsel %vm4684_vm11, %v4252_v63, 0.0  ;;  %v4271_v0 = vsel %vm4702_vm2, %v1863_v13, %v1864_v58  ;;  %v1865_v13 = vrot.slane %v4210_v15, 1  ;;  %vm4703_vm8 = vmmov %vm4702_vm2 }
 0x2db   : > { %v1918_v12 = vsel %vm3684_vm13, %v4259_v28, 0.0  ;;  %v4278_v41 = vpack.c.bf16 %v1917_v53, %v1916_v44  ;;  %v1935_v1 = vsel %vm3541_vm5, %v4271_v0, 0.0  ;;  %v2271_v31 = vsel %vm3664_vm12, %v4259_v28, 0.0  ;;  %vm4704_vm10 = vmmov %vm4702_vm2 }
 0x2dc   : > { %v4283_v46 = vpack.c.bf16 %v1919_v27, %v1918_v12  ;;  %1892 = vrot.lane.b32.xlu0 %v1856_v14, %s4694_s22  ;;  %v4286_v11 = vpack.c.bf16 %v1935_v1, %v1934_v60  ;;  %v2296_v47 = vsel %vm3534_vm4, %v4271_v0, 0.0  ;;  %v1824_v5 = vrot.slane %v1744_v52, 7  ;;  %vm4705_vm11 = vmmov %vm4701_vm15 }
 0x2dd   : > { %v1825_v7 = vrot.slane %v4210_v15, 7  ;;  %v1869_v16 = vsel %vm4703_vm8, %v1865_v13, %v1866_v26  ;;  %v1870_v9 = vsel %vm4704_vm10, %v1864_v58, %v1865_v13  ;;  %v4305_v39 = vpack.c.bf16 %v2271_v31, %v2270_v40  ;;  %vm4706_vm15 = vmmov %vm4705_vm11 }
 0x2de   : > { %1896 = vrot.lane.b32.xlu1 %v1858_v49, %s4694_s22  ;;  %v1867_v30 = vrot.slane %v4191_v34, 1  ;;  %v1936_v20 = vsel %vm3550_vm6, %v1870_v9, 0.0  ;;  %v1937_v52 = vsel %vm3572_vm7, %v1869_v16, 0.0  ;;  %v2297_v15 = vsel %vm3541_vm5, %v1870_v9, 0.0  ;;  %vm4708_vm10 = vmmov %vm4703_vm8 }
 0x2df   : > { %v1830_v48 = vsel %vm4705_vm11, %v1824_v5, %v1825_v7  ;;  %v4317_v19 = vpack.c.bf16 %v1937_v52, %v1936_v20  ;;  %v4319_v42 = vpack.c.bf16 %v2297_v15, %v2296_v47  ;;  %v1831_v6 = vsel %vm4706_vm15, %v1823_v22, %v1824_v5 }
 0x2e0   : > { %2310 = vrot.lane.b32.xlu0 %v1857_v25, %s4694_s22  ;;  %v1921_v14 = vsel %vm3723_vm1, %v1830_v48, 0.0  ;;  %vm4707_vm2 = vnez %v4677_v61  ;;  %v1868_v60 = vsel %vm4703_vm8, %v1866_v26, %v1867_v30  ;;  %v4335_v25 = vsel %vm4708_vm10, %v1867_v30, %v1860_v54 }
 0x2e1   : > { %v1920_v58 = vsel %vm4707_vm2, %v1831_v6, 0.0  ;;  %v2272_v36 = vsel %vm3684_vm13, %v4245_v24, 0.0  ;;  %vm4709_vm11 = vnez %v4665_v10  ;;  %vm4710_vm15 = vnez %v4667_v17  ;;  %v3047_v17 = vld [vmem:[%s4627_s10 + $0x8] sm:$0xff]   ;;  %v3056_v10 = vld [vmem:[%s4627_s10 + $0x40] sm:$0xff]  }
 0x2e2   : > { %1898 = vrot.lane.b32.xlu1 %v1859_v2, %s4694_s22  ;;  %v4341_v22 = vpack.c.bf16 %v1921_v14, %v1920_v58  ;;  %v1938_v53 = vsel %vm4709_vm11, %v1868_v60, 0.0  ;;  %v1939_v27 = vsel %vm4710_vm15, %v4335_v25, 0.0  ;;  %v2273_v33 = vsel %vm3690_vm14, %v1831_v6, 0.0  ;;  %v3051_v14 = vld [vmem:[%s4627_s10 + $0x18] sm:$0xff]  }
 0x2e3   : > { %v4350_v54 = vpack.c.bf16 %v1939_v27, %v1938_v53  ;;  %v4352_v44 = vpack.c.bf16 %v2273_v33, %v2272_v36  ;;  %v2298_v12 = vsel %vm3550_vm6, %v1869_v16, 0.0  ;;  %v2299_v1 = vsel %vm3572_vm7, %v1868_v60, 0.0  ;;  %v3054_v33 = vld [vmem:[%s4627_s10 + $0x30] sm:$0xff]  }
 0x2e4   : > { %2312 = vrot.lane.b32.xlu0 %v1858_v49, %s4694_s22  ;;  %v2293_v13 = vpack.c.bf16 %v3204_v50, %v4191_v34  ;;  %v4361_v26 = vpack.c.bf16 %v2299_v1, %v2298_v12  ;;  %v1826_v31 = vrot.slane %v4181_v43, 7  ;;  %v2274_v40 = vsel %vm4707_vm2, %v1830_v48, 0.0 }
 0x2e5   : > { %v1878_v47 = vsel %vm3534_vm4, %v4207_v8, 0.0  ;;  %v1879_v5 = vsel %vm3541_vm5, %v4195_v23, 0.0  ;;  %v1838_v49 = vsel %vm3684_vm13, %v4236_v3, 0.0  ;;  %vm4711_vm8 = vcmp.lt.s32.totalorder %v3464_v55, 1 }
 0x2e6   : > { %2316 = vrot.lane.b32.xlu1 %v2293_v13, %s4694_s22  ;;  %v4380_v43 = vsel %vm4711_vm8, %v1826_v31, %v1827_v59  ;;  %vm4712_vm10 = vmmov %vm4711_vm8  ;;  %v4384_v8 = vpack.c.bf16 %v1879_v5, %v1878_v47  ;;  %v1839_v38 = vsel %vm3690_vm14, %v4259_v28, 0.0  ;;  %vm4713_vm4 = vnez %v4683_v29 }
 0x2e7   : > { %v1829_v32 = vsel %vm4712_vm10, %v1825_v7, %v1826_v31  ;;  %v1923_v34 = vsel %vm4713_vm4, %v4380_v43, 0.0  ;;  %v4399_v3 = vpack.c.bf16 %v1839_v38, %v1838_v49  ;;  %v1880_v56 = vsel %vm3550_vm6, %v4271_v0, 0.0  ;;  %v3058_v49 = vld [vmem:[%s4627_s10 + $0x50] sm:$0xff]  }
 0x2e8   : > { %v1922_v37 = vsel %vm3744_vm0, %v1829_v32, 0.0  ;;  %v2275_v23 = vsel %vm3723_vm1, %v1829_v32, 0.0  ;;  %2314 = vrot.lane.b32.xlu0 %v1859_v2, %s4694_s22  ;;  %v1881_v28 = vsel %vm3572_vm7, %v1870_v9, 0.0  ;;  %v1840_v7 = vsel %vm4707_vm2, %v4245_v24, 0.0  ;;  %v3045_v24 = vld [vmem:[%s4627_s10] sm:$0xff]  }
 0x2e9   : > { %v1927_v55 = vpack.c.bf16 %v1923_v34, %v1922_v37  ;;  %v4397_v59 = vpack.c.bf16 %v2275_v23, %v2274_v40  ;;  %v1841_v30 = vsel %vm3723_vm1, %v1831_v6, 0.0  ;;  %v4411_v2 = vpack.c.bf16 %v1881_v28, %v1880_v56  ;;  %v3057_v40 = vld [vmem:[%s4627_s10 + $0x48] sm:$0xff]   ;;  %v3134_v56 = vld [vmem:[%s3344_s26 + $0x20] sm:$0xff] }
 0x2ea   : > { %v4413_v20 = vpack.c.bf16 %v1841_v30, %v1840_v7  ;;  %v1882_v52 = vsel %vm4709_vm11, %v1869_v16, 0.0  ;;  %v1883_v35 = vsel %vm4710_vm15, %v1868_v60, 0.0  ;;  %v1842_v51 = vsel %vm3744_vm0, %v1830_v48, 0.0  ;;  %v3049_v48 = vld [vmem:[%s4627_s10 + $0x10] sm:$0xff]   ;;  %v3061_v37 = vld [vmem:[%s4629_s12 + $0x8] sm:$0xff]  }
 0x2eb   : > { %v4419_v0 = vpack.c.bf16 %v1883_v35, %v1882_v52  ;;  %v1843_v61 = vsel %vm4713_vm4, %v1829_v32, 0.0  ;;  %v1877_v27 = vsel %vm3512_vm3, %v4216_v57, 0.0  ;;  %v2300_v4 = vsel %vm4709_vm11, %v4335_v25, 0.0  ;;  %v3055_v57 = vld [vmem:[%s4627_s10 + $0x38] sm:$0xff]   ;;  %v3060_v32 = vld [vmem:[%s4629_s12] sm:$0xff]   ;;  %v3135_v28 = vld [vmem:[%s3344_s26 + $0x28] sm:$0xff] }
 0x2ec   : > { %v4425_v62 = vpack.c.bf16 %v1843_v61, %v1842_v51  ;;  %v2276_v25 = vsel %vm3744_vm0, %v4380_v43, 0.0  ;;  %v1837_v43 = vsel %vm3664_vm12, %v4252_v63, 0.0  ;;  %v3130_v63 = vld [vmem:[%s3344_s26] sm:$0xff]  ;;  %vm4714_vm0 = vcmask 261120   ;;  %v3136_v30 = vld [vmem:[%s3344_s26 + $0x30] sm:$0xff] }
 0x2ed   : > { %v2281_v47 = vpack.c.bf16 %v3204_v50, %v2276_v25  ;;  %v1844_v38 = vpack.c.bf16 %v1837_v43, %v3204_v50  ;;  %v2508_v7 = vpack.c.bf16 %v3135_v28, %v3134_v56  ;;  %vm4715_vm1 = vmmov %vm4714_vm0 }
 0x2ee   : > { %vm4716_vm3 = vmmov %vm4714_vm0 }
 0x2ef   : > { %vm4717_vm5 = vmmov %vm4714_vm0 }
 0x344   : > { %v1951_v29 = vpop.permute.xlu1 %1950 }
 0x346   : > { %v1949_v9 = vpop.permute.xlu0 %1948 }
 0x347   : > { %v1958_v16 = vsel %vm933_vm9, %v4278_v41, %v1949_v9  ;;  %v1962_v41 = vsel %vm933_vm9, %v4283_v46, %v1951_v29  ;;  %v3052_v46 = vld [vmem:[%s4627_s10 + $0x20] sm:$0xff]  }
 0x348   : > { %2089 = vmatmul.mubr.bf16.vlgmr.msra.gmra.mrb[0].mxu1 %v1958_v16 }
 0x349   : > { %2206 = vmatpush1.bf16.msra.mxu1 %v3045_v24  ;;  %2783 = vmatprep.mubr.msk.bf16.mxu1 %vm933_vm9, %v4286_v11  ;;  %v1955_v11 = vpop.permute.xlu1 %1954 }
 0x34a   : > { %v1953_v15 = vpop.permute.xlu0 %1952  ;;  %2207 = vmatprep.subr.bf16.mxu1 %v3209_v18 }
 0x34b   : > { %v1966_v36 = vsel %vm933_vm9, %v4341_v22, %v1953_v15 }
 0x34d   : > { %2208 = vmatpush1.bf16.msra.mxu1 %v3047_v17 }
 0x34e   : > { %v4441_v6 = vpop.permute.xlu0 %1892  ;;  %2209 = vmatprep.subr.bf16.mxu1 %v3209_v18 }
 0x34f   : > { %v1902_v45 = vsel %vm933_vm9, %v1844_v38, %v4441_v6 }
 0x350   : > { %2097 = vmatmul.mubr.bf16.gmra.mrb[4].mxu1 %v1962_v41 }
 0x351   : > { %2210 = vmatpush1.bf16.msra.mxu1 %v3049_v48  ;;  %2784 = vmatprep.mubr.msk.bf16.mxu1 %vm933_vm9, %v4317_v19  ;;  %v1895_v19 = vpop.permute.xlu1 %1894 }
 0x352   : > { %v2311_v58 = vpop.permute.xlu0 %2310  ;;  %2211 = vmatprep.subr.bf16.mxu1 %v3209_v18 }
 0x353   : > { %v2320_v60 = vsel %vm933_vm9, %v4305_v39, %v2311_v58  ;;  %v3053_v39 = vld [vmem:[%s4627_s10 + $0x28] sm:$0xff]  }
 0x354   : > { %2451 = vmatmul.mubr.bf16.vlgmr.msra.gmra.mrb[8].mxu0 %v2320_v60 }
 0x355   : > { %2212 = vmatpush1.bf16.msra.mxu1 %v3051_v14  ;;  %2815 = vmatprep.mubr.msk.bf16.mxu0 %vm933_vm9, %v4319_v42  ;;  %v1897_v22 = vpop.permute.xlu1 %1896 }
 0x356   : > { %2213 = vmatprep.subr.bf16.mxu1 %v3209_v18  ;;  %v2313_v53 = vpop.permute.xlu0 %2312 }
 0x357   : > { %v2324_v42 = vsel %vm933_vm9, %v4352_v44, %v2313_v53  ;;  %v1970_v44 = vsel %vm933_vm9, %v1927_v55, %v1955_v11  ;;  %v3132_v55 = vld [vmem:[%s3344_s26 + $0x10] sm:$0xff] }
 0x358   : > { %2105 = vmatmul.mubr.bf16.gmra.mrb[8].mxu1 %v1966_v36 }
 0x359   : > { %2214 = vmatpush1.bf16.msra.mxu1 %v3052_v46  ;;  %2785 = vmatprep.mubr.msk.bf16.mxu1 %vm933_vm9, %v4350_v54  ;;  %v1884_v54 = vpack.c.bf16 %v1877_v27, %v3204_v50  ;;  %v1899_v1 = vpop.permute.xlu1 %1898 }
 0x35a   : > { %2215 = vmatprep.subr.bf16.mxu1 %v3209_v18  ;;  %v2315_v12 = vpop.permute.xlu0 %2314  ;;  %v1914_v23 = vsel %vm933_vm9, %v4425_v62, %v1899_v1 }
 0x35b   : > { %v2328_v13 = vsel %vm933_vm9, %v4397_v59, %v2315_v12  ;;  %v3133_v59 = vld [vmem:[%s3344_s26 + $0x18] sm:$0xff] }
 0x35c   : > { %2459 = vmatmul.mubr.bf16.gmra.mrb[12].mxu0 %v2324_v42 }
 0x35d   : > { %2216 = vmatpush1.bf16.msra.mxu1 %v3053_v39  ;;  %2816 = vmatprep.mubr.msk.bf16.mxu0 %vm933_vm9, %v4361_v26  ;;  %v2305_v26 = vpack.c.bf16 %v3204_v50, %v2300_v4  ;;  %v2317_v31 = vpop.permute.xlu1 %2316  ;;  %v1906_v50 = vsel %vm933_vm9, %v4399_v3, %v1895_v19  ;;  %v2507_v3 = vpack.c.bf16 %v3133_v59, %v3132_v55 }
 0x35e   : > { %2217 = vmatprep.subr.bf16.mxu1 %v3209_v18  ;;  %v2332_v5 = vsel %vm933_vm9, %v2281_v47, %v2317_v31 }
 0x360   : > { %2113 = vmatmul.mubr.bf16.gmra.mrb[12].mxu1 %v1970_v44 }
 0x361   : > { %2218 = vmatpush1.bf16.msra.mxu1 %v3054_v33  ;;  %2798 = vmatprep.mubr.msk.bf16.mxu1 %vm933_vm9, %v1884_v54 }
 0x362   : > { %2219 = vmatprep.subr.bf16.mxu1 %v3209_v18 }
 0x364   : > { %2467 = vmatmul.mubr.bf16.gmra.mrb[16].mxu0 %v2328_v13 }
 0x365   : > { %2220 = vmatpush1.bf16.msra.mxu1 %v3055_v57  ;;  %2817 = vmatprep.mubr.msk.bf16.mxu0 %vm933_vm9, %v2305_v26 }
 0x366   : > { %2221 = vmatprep.subr.bf16.mxu1 %v3209_v18 }
 0x369   : > { %2222 = vmatpush1.bf16.msra.mxu1 %v3056_v10 }
 0x36a   : > { %2223 = vmatprep.subr.bf16.mxu1 %v3209_v18 }
 0x36c   : > { %2475 = vmatmul.mubr.bf16.gmra.mrb[20].mxu0 %v2332_v5 }
 0x36d   : > { %2224 = vmatpush1.bf16.msra.mxu1 %v3057_v40 }
 0x36e   : > { %2225 = vmatprep.subr.bf16.mxu1 %v3209_v18 }
 0x371   : > { %2226 = vmatpush1.bf16.msra.mxu1 %v3058_v49 }
 0x372   : > { %2227 = vmatprep.subr.bf16.mxu1 %v3209_v18  ;;  %v1910_v18 = vsel %vm933_vm9, %v4413_v20, %v1897_v22 }
 0x375   : > { %2228 = vmatpush1.bf16.msra.mxu1 %v3059_v21 }
 0x376   : > { %2929 = vmatprep.subr.bf16.mxu1 %v3060_v32 }
 0x378   : > { %2238 = vmatmul.mubr.bf16.vlgmr.msra.gmra.mrb[16].mxu1 %v1902_v45 }
 0x379   : > { %2799 = vmatprep.mubr.msk.bf16.mxu1 %vm933_vm9, %v4384_v8  ;;  %2930 = vmatpush3.bf16.msra.mxu1 %v3060_v32  ;;  %v3131_v8 = vld [vmem:[%s3344_s26 + $0x8] sm:$0xff] }
 0x37a   : > { %2931 = vmatprep.subr.bf16.mxu1 %v3061_v37  ;;  %v2506_v34 = vpack.c.bf16 %v3131_v8, %v3130_v63 }
 0x37d   : > { %2932 = vmatpush3.bf16.msra.mxu1 %v3061_v37 }
 0x380   : > { %2246 = vmatmul.mubr.bf16.gmra.mrb[20].mxu1 %v1906_v50 }
 0x381   : > { %2800 = vmatprep.mubr.msk.bf16.mxu1 %vm933_vm9, %v4411_v2  ;;  %v3137_v2 = vld [vmem:[%s3344_s26 + $0x38] sm:$0xff]  ;;  %s473_s26 = sand.u32 1, %s3192_s29  }
 0x382   : > { %v2509_v20 = vpack.c.bf16 %v3137_v2, %v3136_v30  ;;  %s2715_s16 = sshll.u32 %s473_s26, 6  ;;  %s4577_s9 = scalar_lea.sflag [#allocation5], %s473_s26 }
 0x383   : > { %s475_s19 = scalar_lea.vmem [#allocation4], %s2715_s16  ;;  %s4568_s16 = scalar_lea.hbm %s4631_s14, %s2832_s23 }
 0x384   : > { %s2640_s25 = sshll.u32 %s475_s19, 4  ;;  %s3142_s23 = sshll.u32 %s3210_s18, 4  ;;  %s4570_s25 = int_to_ptr.vmem [resolvable:$true] %s2640_s25  ;;  %s3143_s23 = int_to_ptr.vmem [resolvable:$false] %s3142_s23 }
 0x385   : > { %s3138_s22 = scalar_lea.vmem %s4570_s25, 1024  ;;  %s3144_s27 = scalar_lea.vmem %s3143_s23, 2048 }
 0x386   : > { %p3139_p11 = scmp.ne.s32.totalorder %s4570_s25, %s3138_s22  ;;  %p3145_p0 = scmp.lt.s32.totalorder %s4570_s25, %s3143_s23 }
 0x387   : > { %p3146_p1 = scmp.lt.s32.totalorder %s3144_s27, %s3138_s22 }
 0x388   : > { %2254 = vmatmul.mubr.bf16.gmra.mrb[24].mxu1 %v1910_v18  ;;  %p3140_p12 = pnand %p3139_p11, %p3326_p5 }
 0x389   : > { %2801 = vmatprep.mubr.msk.bf16.mxu1 %vm933_vm9, %v4419_v0  ;;  %p3147_p2 = por %p3146_p1, %p3145_p0 }
 0x38a   : > { %p3141_p13 = pneg %p3140_p12 }
 0x38c   : > { %p3148_p3 = pnand %p3147_p2, %p3141_p13 }
 0x390   : > { %2262 = vmatmul.mubr.bf16.gmra.mrb[28].mxu1 %v1914_v23 }
 0x391   : > { %2933 = vmatprep.mubr.msk.bf16.mxu1 %vm4714_vm0, %v2506_v34 }
 0x398   : > { %2934 = vmatmul.mubr.msk.bf16.vlgmr.msra.gmra.mrb[32].mxu1 %vm4715_vm1, %v2507_v3 }
 0x399   : > { %2937 = vmatprep.mubr.msk.bf16.mxu1 %vm4716_vm3, %v2508_v7 }
 0x3a0   : > { %2938 = vmatmul.mubr.msk.bf16.gmra.mrb[36].mxu1 %vm4717_vm5, %v2509_v20 }
 0x41b   : > { %v2090_v52 = vpop.f32.mrb[0].mxu1 }
 0x41c   : > { %v2092_v35 = vpop.f32.mrb[1].mxu1 }
 0x41d   : > { %v2093_v0 = vpop.f32.mrb[2].mxu1  ;;  %v2818_v35 = vld [vmem:[%s4628_s11] ss:$0 sm:$0xff] }
 0x41e   : > { %v2095_v51 = vpop.f32.mrb[3].mxu1 }
 0x423   : > { %v2098_v61 = vpop.f32.mrb[4].mxu1 }
 0x424   : > { %v2100_v62 = vpop.f32.mrb[5].mxu1 }
 0x425   : > { %v2101_v24 = vpop.f32.mrb[6].mxu1 }
 0x426   : > { %v2103_v9 = vpop.f32.mrb[7].mxu1 }
 0x427   : > { %v2452_v16 = vpop.f32.mrb[8].mxu0 }
 0x428   : > { %v2454_v17 = vpop.f32.mrb[9].mxu0 }
 0x429   : > { %v2455_v29 = vpop.f32.mrb[10].mxu0 }
 0x42a   : > { %v2457_v15 = vpop.f32.mrb[11].mxu0 }
 0x42b   : > { %v2106_v48 = vpop.f32.mrb[8].mxu1 }
 0x42c   : > { %v2108_v6 = vpop.f32.mrb[9].mxu1 }
 0x42d   : > { %v2109_v41 = vpop.f32.mrb[10].mxu1 }
 0x42e   : > { %v2111_v11 = vpop.f32.mrb[11].mxu1 }
 0x42f   : > { %v2460_v14 = vpop.f32.mrb[12].mxu0 }
 0x430   : > { %v2462_v58 = vpop.f32.mrb[13].mxu0 }
 0x431   : > { %v2463_v60 = vpop.f32.mrb[14].mxu0 }
 0x432   : > { %v2465_v46 = vpop.f32.mrb[15].mxu0 }
 0x433   : > { %v2114_v19 = vpop.f32.mrb[12].mxu1 }
 0x434   : > { %v2116_v36 = vpop.f32.mrb[13].mxu1 }
 0x435   : > { %v2117_v53 = vpop.f32.mrb[14].mxu1 }
 0x436   : > { %v2119_v39 = vpop.f32.mrb[15].mxu1 }
 0x437   : > { %v2468_v42 = vpop.f32.mrb[16].mxu0 }
 0x438   : > { %v2470_v27 = vpop.f32.mrb[17].mxu0 }
 0x439   : > { %v2471_v22 = vpop.f32.mrb[18].mxu0 }
 0x43a   : > { %v2473_v33 = vpop.f32.mrb[19].mxu0 }
 0x43f   : > { %v2476_v54 = vpop.f32.mrb[20].mxu0 }
 0x440   : > { %v2478_v44 = vpop.f32.mrb[21].mxu0 }
 0x441   : > { %v2479_v12 = vpop.f32.mrb[22].mxu0 }
 0x442   : > { %v2481_v4 = vpop.f32.mrb[23].mxu0 }
 0x44b   : > { %v2239_v57 = vpop.f32.mrb[16].mxu1 }
 0x44c   : > { %v2240_v1 = vadd.f32 %v2239_v57, %v2090_v52  ;;  %v2241_v13 = vpop.f32.mrb[17].mxu1  ;;  %v2819_v52 = vld [vmem:[%s4630_s13] ss:$0 sm:$0xff] }
 0x44d   : > { %v2242_v26 = vpop.f32.mrb[18].mxu1 }
 0x44e   : > { %v2483_v10 = vadd.f32 %v2452_v16, %v2240_v1  ;;  %v2243_v25 = vadd.f32 %v2242_v26, %v2093_v0  ;;  %v2244_v31 = vpop.f32.mrb[19].mxu1 }
 0x450   : > { %v2484_v40 = vadd.f32 %v2455_v29, %v2243_v25 }
 0x453   : > { %v2247_v47 = vpop.f32.mrb[20].mxu1 }
 0x454   : > { %v2248_v5 = vadd.f32 %v2247_v47, %v2098_v61  ;;  %v2249_v49 = vpop.f32.mrb[21].mxu1 }
 0x455   : > { %v2250_v21 = vpop.f32.mrb[22].mxu1 }
 0x456   : > { %v2485_v43 = vadd.f32 %v2460_v14, %v2248_v5  ;;  %v2251_v32 = vadd.f32 %v2250_v21, %v2101_v24  ;;  %v2252_v38 = vpop.f32.mrb[23].mxu1  ;;  %v2498_v24 = vadd.f32 %v2818_v35, %v2483_v10 }
 0x458   : > { %v2486_v37 = vadd.f32 %v2463_v60, %v2251_v32  ;;  %v2500_v51 = vadd.f32 %v2818_v35, %v2485_v43 }
 0x45a   : > { %v2501_v29 = vadd.f32 %v2818_v35, %v2486_v37 }
 0x45b   : > { %v2255_v45 = vpop.f32.mrb[24].mxu1 }
 0x45c   : > { %v2256_v50 = vadd.f32 %v2255_v45, %v2106_v48  ;;  %v2257_v18 = vpop.f32.mrb[25].mxu1 }
 0x45d   : > { %v2258_v63 = vpop.f32.mrb[26].mxu1 }
 0x45e   : > { %v2487_v8 = vadd.f32 %v2468_v42, %v2256_v50  ;;  %v2259_v34 = vadd.f32 %v2258_v63, %v2109_v41  ;;  %v2260_v23 = vpop.f32.mrb[27].mxu1  ;;  %v2499_v41 = vadd.f32 %v2818_v35, %v2484_v40 }
 0x460   : > { %v2488_v55 = vadd.f32 %v2471_v22, %v2259_v34 }
 0x463   : > { %v2263_v59 = vpop.f32.mrb[28].mxu1 }
 0x464   : > { %v2264_v3 = vadd.f32 %v2263_v59, %v2114_v19  ;;  %v2265_v56 = vpop.f32.mrb[29].mxu1 }
 0x465   : > { %v2266_v28 = vpop.f32.mrb[30].mxu1 }
 0x466   : > { %v2489_v7 = vadd.f32 %v2476_v54, %v2264_v3  ;;  %v2267_v30 = vadd.f32 %v2266_v28, %v2117_v53  ;;  %v2268_v2 = vpop.f32.mrb[31].mxu1  ;;  %v2502_v53 = vadd.f32 %v2818_v35, %v2487_v8 }
 0x468   : > { %v2490_v20 = vadd.f32 %v2479_v12, %v2267_v30  ;;  %v2504_v46 = vadd.f32 %v2818_v35, %v2489_v7  ;;  %v2503_v12 = vadd.f32 %v2818_v35, %v2488_v55 }
 0x46a   : > { %v2505_v22 = vadd.f32 %v2818_v35, %v2490_v20 }
 0x46b   : > { %v2935_v0 = vpop.f32.mrb[32].mxu1 }
 0x46c   : > { %v2588_v61 = vadd.f32 %v2935_v0, %v2819_v52  ;;  %v2579_v62 = vpop.f32.mrb[33].mxu1 }
 0x46d   : > { %v2580_v9 = vadd.f32 %v2819_v52, %v2579_v62  ;;  %v2936_v16 = vpop.f32.mrb[34].mxu1 }
 0x46e   : > { %v2612_v17 = vadd.f32 %v2588_v61, %v2500_v51  ;;  %v2591_v15 = vadd.f32 %v2936_v16, %v2819_v52  ;;  %v2582_v48 = vpop.f32.mrb[35].mxu1 }
 0x46f   : > { %v2610_v6 = vadd.f32 %v2580_v9, %v2498_v24  ;;  %v2583_v11 = vadd.f32 %v2819_v52, %v2582_v48 }
 0x470   : > { %2620 = vst.msk [vmem:[%s475_s19 + $0x10] sm:$0xff] %vm933_vm9, %v2612_v17  ;;  %v2613_v14 = vadd.f32 %v2591_v15, %v2501_v29 }
 0x471   : > { %2618 = vst.msk [vmem:[%s475_s19] sm:$0xff] %vm933_vm9, %v2610_v6  ;;  %v2611_v58 = vadd.f32 %v2583_v11, %v2499_v41 }
 0x472   : > { %2621 = vst.msk [vmem:[%s475_s19 + $0x18] sm:$0xff] %vm933_vm9, %v2613_v14 }
 0x473   : > { %2619 = vst.msk [vmem:[%s475_s19 + $0x8] sm:$0xff] %vm933_vm9, %v2611_v58  ;;  %v2939_v60 = vpop.f32.mrb[36].mxu1 }
 0x474   : > { %v2604_v19 = vadd.f32 %v2939_v60, %v2819_v52  ;;  %v2595_v36 = vpop.f32.mrb[37].mxu1 }
 0x475   : > { %v2596_v39 = vadd.f32 %v2819_v52, %v2595_v36  ;;  %v2940_v42 = vpop.f32.mrb[38].mxu1 }
 0x476   : > { %v2616_v27 = vadd.f32 %v2604_v19, %v2504_v46  ;;  %v2607_v33 = vadd.f32 %v2940_v42, %v2819_v52  ;;  %v2598_v54 = vpop.f32.mrb[39].mxu1 }
 0x477   : > { %v2614_v44 = vadd.f32 %v2596_v39, %v2502_v53  ;;  %v2599_v4 = vadd.f32 %v2819_v52, %v2598_v54 }
 0x478   : > { %2624 = vst.msk [vmem:[%s475_s19 + $0x30] sm:$0xff] %vm933_vm9, %v2616_v27  ;;  %v2617_v57 = vadd.f32 %v2607_v33, %v2505_v22 }
 0x479   : > { %2622 = vst.msk [vmem:[%s475_s19 + $0x20] sm:$0xff] %vm933_vm9, %v2614_v44  ;;  %v2615_v1 = vadd.f32 %v2599_v4, %v2503_v12 }
 0x47a   : > { %2625 = vst.msk [vmem:[%s475_s19 + $0x38] sm:$0xff] %vm933_vm9, %v2617_v57 }
 0x47b   : > { %2623 = vst.msk [vmem:[%s475_s19 + $0x28] sm:$0xff] %vm933_vm9, %v2615_v1 }
 0x47c   : > { %3151 = shalt.err (!%p3148_p3)
}
 0x47d   : > { %s3152_s26 = scalar_lea.hbm %s4568_s16, 1024  ;;  %s3156_s18 = scalar_lea.hbm %s4631_s14, 2048 }
 0x47e   : > { %p3153_p4 = scmp.ne.s32.totalorder %s4568_s16, %s3152_s26  ;;  %p3157_p9 = scmp.lt.u32.totalorder %s4568_s16, %s4631_s14 }
 0x47f   : > { %p3158_p10 = scmp.lt.u32.totalorder %s3156_s18, %s3152_s26  ;;  %p3160_p12 = scmp.lt.u32.totalorder %s3152_s26, %s4568_s16 }
 0x480   : > { %p3154_p7 = pnand %p3153_p4, %p3326_p5 }
 0x481   : > { %p3159_p11 = por %p3158_p10, %p3157_p9 }
 0x482   : > { %p3155_p8 = pneg %p3154_p7 }
 0x483   : > { %p3161_p13 = por %p3160_p12, %p3159_p11 }
 0x485   : > { %p3162_p0 = pnand %p3161_p13, %p3155_p8 }
 0x487   : > { %3165 = shalt.err (!%p3162_p0)
}
 0x488   : > { %s3211_s22 = smov 128   ;;  %s3212_s27 = smov 8  }
 0x489   : > { %2957 = dma.vmem_to_hbm [thread:$0]  (%p3326_p5), %s4570_s25, 1024, %s4568_s16, %s4577_s9, %s3211_s22, %s3211_s22, %s3212_s27  }
 0x48a PF: > { %p2963_p1 = scmp.ge.s32.totalorder %s3200_s15, 2  ;;  %s2655_s0 = sand.u32 1, %s3188_s28  }
 0x48b   : > { %s2656_s26 = scalar_lea.sflag [#allocation5], %s2655_s0 }
 0x48c   : > { %p2960_p2 = pnand %p2963_p1, %p3330_p6 }
 0x48e   : > { %3183 = dma.done.wait (!%p2960_p2), %s2656_s26, 1024  }
 0x48f   : > { %3185 = vsyncadd (!%p2960_p2), %s2656_s26, 4294966272  ;;  %p28_p3 = scmp.ge.s32.totalorder %s3313_s17, 4   ;;  %s4718_s28 = smov %s3192_s29 }
 0x490   : > { %s4719_s29 = smov %s3196_s30  ;;  %s4720_s30 = smov %s3324_s20 }
 0x491   : > { %s4721_s15 = smov %s3313_s17  ;;  %30 = sbr.rel (!%p28_p3) target bundleno = 5 (0x5), region = 114 }
 0x498   :  { %2661 = vsyncpa [#allocation5], 1 }
 0x499   :  { %2663 = vsyncpa [#allocation5 + $0x1], 1 }

// kernel: tpu_custom_call.1
= control target key start
LH: loop header
LB: loop body
LE: loop exit
PB: predicated region body
PF: predicated region fallthrough
CT: control target
= control target key end

     0   :  { %s4638_s0 = inlined_call_operand.vmem [shape: f32[2,64,32], index: 0, kind: input, shape index: {}]   ;;  %s4639_s1 = inlined_call_operand.vmem [shape: f32[2,1,64], index: 1, kind: input, shape index: {}]   ;;  %s4640_s2 = inlined_call_operand.vmem [shape: f32[1,32], index: 2, kind: input, shape index: {}]   ;;  %s4641_s3 = inlined_call_operand.vmem [shape: f32[1,32], index: 3, kind: input, shape index: {}]   ;;  %s4642_s4 = inlined_call_operand.<no memory space> [shape: f32[1,1], index: 4, kind: input, shape index: {}]   ;;  %s4643_s5 = inlined_call_operand.vmem [shape: bf16[288,64], index: 5, kind: input, shape index: {}]   ;;  %s4644_s6 = inlined_call_operand.vmem [shape: f32[1,64], index: 6, kind: input, shape index: {}]   ;;  %s4645_s7 = inlined_call_operand.vmem [shape: f32[1,64], index: 7, kind: input, shape index: {}]   ;;  %s4646_s8 = inlined_call_operand.vmem [shape: f32[1,64], index: 8, kind: input, shape index: {}]   ;;  %s4647_s10 = inlined_call_operand.vmem [shape: bf16[576,64], index: 10, kind: input, shape index: {}]   ;;  %s4648_s11 = inlined_call_operand.vmem [shape: f32[1,64], index: 11, kind: input, shape index: {}]   ;;  %s4649_s12 = inlined_call_operand.vmem [shape: bf16[32,64], index: 12, kind: input, shape index: {}]   ;;  %s4650_s13 = inlined_call_operand.vmem [shape: f32[1,64], index: 13, kind: input, shape index: {}]   ;;  %s4651_s14 = inlined_call_operand.hbm [shape: f32[2,64,64], index: 14, kind: output, shape index: {}]   ;;  %s4652_s9 = inlined_call_operand.<no memory space> [shape: f32[1,1], index: 9, kind: input, shape index: {}]  }
   0x1   :  { %4668 = sst [smem:[#allocation7_spill]] %s4638_s0 }
   0x2   :  { %23 = vsyncpa [#allocation5], 0 }
   0x3   :  { %25 = vsyncpa [#allocation5 + $0x1], 0  ;;  %s3340_s28 = smov 0   ;;  %s3342_s29 = smov 0  }
   0x4   :  { %s3344_s30 = smov 0   ;;  %s3346_s15 = smov 0  }
   0x5 LB: > { %s3361_s9 = sadd.s32 4294967295, %s3252_s15   ;;  %s2763_s16 = sadd.s32 4294967294, %s3252_s15   ;;  %s3252_s15 = sphi %s3346_s15, %s4740_s15   ;;  %s3248_s30 = sphi %s3344_s30, %s4739_s30   ;;  %s3244_s29 = sphi %s3342_s29, %s4738_s29   ;;  %s3240_s28 = sphi %s3340_s28, %s4737_s28  }
   0x6   : > { %s3365_s17 = sadd.s32 1, %s3252_s15   ;;  %s342_s18 = sadd.s32 1, %s3248_s30 }
   0x7   : > { %s339_s19 = ssub.s32 %s3252_s15, %s3365_s17  ;;  %p352_p0 = scmp.ne.s32.totalorder %s3248_s30, %s3244_s29 }
   0x8   : > { %p340_p1 = scmp.eq.s32.totalorder %s339_s19, 0  ;;  %p353_p2 = scmp.eq.s32.totalorder %s3361_s9, 1 }
   0x9   : > { %p358_p3 = scmp.ne.s32.totalorder %s3244_s29, %s3240_s28  ;;  %p359_p4 = scmp.eq.s32.totalorder %s2763_s16, 1 }
   0xa   : > { %s3376_s20 = scalar_select %p340_p1, %s3248_s30, %s342_s18  }
   0xb   : > { %p3378_p5 = por %p353_p2, %p352_p0  ;;  %p3382_p6 = por %p359_p4, %p358_p3 }
   0xc   : > { %p2766_p7 = scmp.ge.s32.totalorder %s3252_s15, 1  ;;  %p427_p8 = scmp.lt.s32.totalorder %s3252_s15, 3 }
   0xe   : > { %p428_p9 = pnand %p2766_p7, %p427_p8 }
   0xf   : > { %p476_p10 = scmp.lt.s32.totalorder (!%p428_p9), %s3361_s9, 1  ;;  %vm4654_vm0 = vcmask (!%p428_p9), 261120   ;;  %s4671_s0 = sld [smem:[#allocation7_spill]] (!%p428_p9)  ;;  %v3058_v34 = vld [vmem:[%s4643_s5 + $0x30] sm:$0xff] (!%p428_p9)   ;;  %v3059_v35 = vld [vmem:[%s4643_s5 + $0x38] sm:$0xff] (!%p428_p9)   ;;  %v3060_v44 = vld [vmem:[%s4643_s5 + $0x40] sm:$0xff] (!%p428_p9)  }
  0x10   : > { %431 = sbr.rel (%p428_p9) target bundleno = 1162 (0x48a), region = 76  ;;  %2921 = vmatprep.subr.bf16.mxu0 (!%p428_p9), %v3058_v34  ;;  %v3061_v49 = vld [vmem:[%s4643_s5 + $0x48] sm:$0xff] (!%p428_p9)   ;;  %v3062_v52 = vld [vmem:[%s4643_s5 + $0x50] sm:$0xff] (!%p428_p9)   ;;  %vm4653_vm1 = vcmask (!%p428_p9), 1046528   ;;  %s4666_s24 = smov (!%p428_p9), 64   ;;  %vm4657_vm10 = vcmask (!%p428_p9), 1040384  }
  0x11   : > { %2922 = vmatpush3.bf16.msra.mxu0 (!%p428_p9), %v3058_v34  ;;  %s3258_s18 = smov (!%p428_p9), 127   ;;  %s3259_s19 = smov (!%p428_p9), 1  }
  0x12   : > { %2923 = vmatprep.subr.bf16.mxu0 (!%p428_p9), %v3059_v35 }
  0x15   : > { %2924 = vmatpush3.bf16.msra.mxu0 (!%p428_p9), %v3059_v35 }
  0x16   : > { %2925 = vmatprep.subr.bf16.mxu0 (!%p428_p9), %v3060_v44 }
  0x17   : > { %s3390_s22 = scalar_select %p476_p10, %s3361_s9, 1 }
  0x19   : > { %s2883_s23 = sshll.u32 %s3390_s22, 6  ;;  %2926 = vmatpush3.bf16.msra.mxu0 %v3060_v44  ;;  %s483_s25 = scalar_lea.vmem %s4639_s1, %s3390_s22 }
  0x1a   : > { %s3396_s26 = scalar_lea.vmem %s4671_s0, %s2883_s23  ;;  %2927 = vmatprep.subr.bf16.mxu0 %v3061_v49  ;;  %s3254_s23 = smov 32  }
  0x1b   : > { %v3399_v0 = vld [vmem:[%s3396_s26] sm:$0xff]  ;;  %v3402_v1 = vld [vmem:[%s3396_s26 + $0x8] sm:$0xff]  ;;  %v3405_v2 = vld [vmem:[%s3396_s26 + $0x10] sm:$0xff]  ;;  %s3257_s22 = smov 63  }
  0x1c   : > { %v3408_v3 = vld [vmem:[%s3396_s26 + $0x18] sm:$0xff]  ;;  %v3411_v4 = vld [vmem:[%s3396_s26 + $0x20] sm:$0xff]  ;;  %v585_v5 = vsel %vm4654_vm0, %v3399_v0, 0.0  ;;  %v586_v6 = vsel %vm4654_vm0, %v3402_v1, 0.0  ;;  %v588_v7 = vsel %vm4654_vm0, %v3405_v2, 0.0  ;;  %v606_v8 = vmul.f32 %v3399_v0, %v3399_v0  ;;  %v3422_v9 = vld [vmem:[%s3396_s26 + $0x28] sm:$0xff] }
  0x1d   : > { %v587_v10 = vadd.f32 %v586_v6, %v585_v5  ;;  %v3425_v11 = vld [vmem:[%s3396_s26 + $0x30] sm:$0xff]  ;;  %v590_v12 = vsel %vm4654_vm0, %v3408_v3, 0.0  ;;  %v592_v13 = vsel %vm4654_vm0, %v3411_v4, 0.0  ;;  %v607_v14 = vmul.f32 %v3402_v1, %v3402_v1  ;;  %v3442_v21 = vld [vmem:[%s3396_s26 + $0x38] sm:$0xff]  ;;  %2928 = vmatpush3.bf16.msra.mxu0 %v3061_v49 }
  0x1e   : > { %v608_v15 = vmul.f32 %v3405_v2, %v3405_v2  ;;  %v609_v17 = vmul.f32 %v3408_v3, %v3408_v3  ;;  %v610_v18 = vmul.f32 %v3411_v4, %v3411_v4  ;;  %v614_v19 = vsel %vm4654_vm0, %v606_v8, 0.0  ;;  %2929 = vmatprep.subr.bf16.mxu0 %v3062_v52 }
  0x1f   : > { %v589_v16 = vadd.f32 %v588_v7, %v587_v10  ;;  %v615_v20 = vsel %vm4654_vm0, %v607_v14, 0.0  ;;  %v594_v25 = vsel %vm4654_vm0, %v3422_v9, 0.0  ;;  %v611_v26 = vmul.f32 %v3422_v9, %v3422_v9 }
  0x20   : > { %v616_v23 = vadd.f32 %v615_v20, %v614_v19  ;;  %v617_v24 = vsel %vm4654_vm0, %v608_v15, 0.0  ;;  %v619_v27 = vsel %vm4654_vm0, %v609_v17, 0.0  ;;  %v612_v29 = vmul.f32 %v3425_v11, %v3425_v11 }
  0x21   : > { %v591_v22 = vadd.f32 %v590_v12, %v589_v16  ;;  %v596_v31 = vsel %vm4654_vm0, %v3425_v11, 0.0  ;;  %v613_v32 = vmul.f32 %v3442_v21, %v3442_v21  ;;  %v621_v33 = vsel %vm4654_vm0, %v610_v18, 0.0  ;;  %2930 = vmatpush3.bf16.msra.mxu0 %v3062_v52 }
  0x22   : > { %v618_v30 = vadd.f32 %v617_v24, %v616_v23  ;;  %v598_v38 = vsel %vm4654_vm0, %v3442_v21, 0.0  ;;  %v623_v39 = vsel %vm4654_vm0, %v611_v26, 0.0  ;;  %v625_v42 = vsel %vm4654_vm0, %v612_v29, 0.0 }
  0x23   : > { %v593_v28 = vadd.f32 %v592_v13, %v591_v22  ;;  %v627_v43 = vsel %vm4654_vm0, %v613_v32, 0.0  ;;  %v2770_v22 = vld [vmem:[%s4640_s2] ss:$0 sm:$0xff] }
  0x24   : > { %v620_v37 = vadd.f32 %v619_v27, %v618_v30 }
  0x25   : > { %v595_v36 = vadd.f32 %v594_v25, %v593_v28 }
  0x26   : > { %v622_v41 = vadd.f32 %v621_v33, %v620_v37 }
  0x27   : > { %v597_v40 = vadd.f32 %v596_v31, %v595_v36 }
  0x28   : > { %v624_v46 = vadd.f32 %v623_v39, %v622_v41 }
  0x29   : > { %v599_v45 = vadd.f32 %v598_v38, %v597_v40 }
  0x2a   : > { %v626_v48 = vadd.f32 %v625_v42, %v624_v46 }
  0x2b   : > { %v600_v47 = vrot.slane %v599_v45, 4 }
  0x2c   : > { %v628_v51 = vadd.f32 %v627_v43, %v626_v48  ;;  %v493_v48 = vlaneseq }
  0x2d   : > { %v601_v50 = vadd.f32 %v600_v47, %v599_v45 }
  0x2e   : > { %v629_v54 = vrot.slane %v628_v51, 4 }
  0x2f   : > { %v602_v53 = vrot.slane %v601_v50, 2 }
  0x30   : > { %v630_v56 = vadd.f32 %v629_v54, %v628_v51 }
  0x31   : > { %v603_v55 = vadd.f32 %v602_v53, %v601_v50 }
  0x32   : > { %v631_v58 = vrot.slane %v630_v56, 2 }
  0x33   : > { %v604_v57 = vrot.slane %v603_v55, 1 }
  0x34   : > { %v632_v60 = vadd.f32 %v631_v58, %v630_v56 }
  0x35   : > { %v605_v59 = vadd.f32 %v604_v57, %v603_v55  ;;  %v3516_v55 = vshrl.u32 %v493_v48, 7 }
  0x36   : > { %v633_v61 = vrot.slane %v632_v60, 1 }
  0x37   : > { %v636_v62 = vmul.f32 0.015625, %v605_v59 }
  0x38   : > { %v634_v63 = vadd.f32 %v633_v61, %v632_v60 }
  0x39   : > { %v638_v5 = vmul.f32 %v636_v62, %v636_v62  ;;  %v643_v12 = vsub.f32 %v3399_v0, %v636_v62  ;;  %v644_v13 = vsub.f32 %v3402_v1, %v636_v62  ;;  %v645_v14 = vsub.f32 %v3405_v2, %v636_v62  ;;  %v2771_v2 = vld [vmem:[%s4641_s3] ss:$0 sm:$0xff] }
  0x3a   : > { %v637_v6 = vmul.f32 0.015625, %v634_v63  ;;  %v646_v15 = vsub.f32 %v3408_v3, %v636_v62  ;;  %v647_v16 = vsub.f32 %v3411_v4, %v636_v62  ;;  %v648_v17 = vsub.f32 %v3422_v9, %v636_v62 }
  0x3b   : > { %v649_v18 = vsub.f32 %v3425_v11, %v636_v62  ;;  %v650_v19 = vsub.f32 %v3442_v21, %v636_v62 }
  0x3c   : > { %v639_v7 = vsub.f32 %v637_v6, %v638_v5  ;;  %v3519_v5 = vadd.s32 8, %v3516_v55 }
  0x3e   : > { %v640_v8 = vmax.f32 %v639_v7, 0.0 }
  0x40   : > { %v641_v10 = vadd.f32 1e-05, %v640_v8  ;;  %v3063_v8 = vld [vmem:[%s4643_s5 + $0x58] sm:$0xff]  }
  0x41   : > { %2931 = vmatprep.subr.bf16.mxu0 %v3063_v8 }
  0x42   : > { %3114 = vrsqrt.f32 %v641_v10  ;;  %v3525_v10 = vadd.s32 16, %v3516_v55  ;;  %2932 = vmatpush3.bf16.msra.mxu0 %v3063_v8  ;;  %v4684_v8 = vmov 0 }
  0x4c   : > { %v3115_v20 = vpop.eup %3114 }
  0x4d   : > { %v651_v0 = vmul.f32 %v3115_v20, %v643_v12  ;;  %v652_v23 = vmul.f32 %v3115_v20, %v644_v13  ;;  %v653_v1 = vmul.f32 %v3115_v20, %v645_v14  ;;  %v654_v24 = vmul.f32 %v3115_v20, %v646_v15 }
  0x4e   : > { %v655_v3 = vmul.f32 %v3115_v20, %v647_v16  ;;  %v656_v4 = vmul.f32 %v3115_v20, %v648_v17  ;;  %v657_v9 = vmul.f32 %v3115_v20, %v649_v18  ;;  %v658_v25 = vmul.f32 %v3115_v20, %v650_v19  ;;  %v3547_v20 = vld [vmem:[%s4643_s5] sm:$0xff]  }
  0x4f   : > { %v665_v11 = vmul.f32 %v2770_v22, %v651_v0  ;;  %v666_v26 = vmul.f32 %v2770_v22, %v652_v23  ;;  %v667_v21 = vmul.f32 %v2770_v22, %v653_v1  ;;  %v668_v27 = vmul.f32 %v2770_v22, %v654_v24  ;;  %2941 = vmatprep.subr.bf16.mxu0 %v3547_v20 }
  0x50   : > { %v669_v28 = vmul.f32 %v2770_v22, %v655_v3  ;;  %v670_v29 = vmul.f32 %v2770_v22, %v656_v4  ;;  %v671_v30 = vmul.f32 %v2770_v22, %v657_v9  ;;  %v672_v31 = vmul.f32 %v2770_v22, %v658_v25 }
  0x51   : > { %v3491_v32 = vadd.f32 %v2771_v2, %v665_v11  ;;  %v3493_v33 = vadd.f32 %v2771_v2, %v666_v26  ;;  %v3495_v34 = vadd.f32 %v2771_v2, %v667_v21  ;;  %v3497_v35 = vadd.f32 %v2771_v2, %v668_v27 }
  0x52   : > { %v3499_v36 = vadd.f32 %v2771_v2, %v669_v28  ;;  %v3501_v37 = vadd.f32 %v2771_v2, %v670_v29  ;;  %v3506_v41 = vadd.f32 %v2771_v2, %v671_v30  ;;  %v3509_v43 = vadd.f32 %v2771_v2, %v672_v31 }
  0x53   : > { %v2772_v38 = vmul.f32 -1.442695, %v3491_v32  ;;  %v2773_v39 = vmul.f32 -1.442695, %v3493_v33  ;;  %v2774_v40 = vmul.f32 -1.442695, %v3495_v34 }
  0x54   : > { %v2775_v42 = vmul.f32 -1.442695, %v3497_v35  ;;  %v2776_v44 = vmul.f32 -1.442695, %v3499_v36  ;;  %v2777_v45 = vmul.f32 -1.442695, %v3501_v37 }
  0x55   : > { %3116 = vpow2.f32 %v2772_v38  ;;  %v2778_v46 = vmul.f32 -1.442695, %v3506_v41  ;;  %v2779_v47 = vmul.f32 -1.442695, %v3509_v43  ;;  %v3528_v12 = vadd.s32 24, %v3516_v55 }
  0x56   : > { %3118 = vpow2.f32 %v2773_v39  ;;  %v510_v13 = vand.u32 7, %v3516_v55  ;;  %v511_v14 = vand.u32 7, %v3519_v5  ;;  %v3533_v15 = vadd.s32 32, %v3516_v55 }
  0x57   : > { %3120 = vpow2.f32 %v2774_v40  ;;  %v3536_v16 = vadd.s32 40, %v3516_v55  ;;  %v3539_v17 = vadd.s32 48, %v3516_v55  ;;  %v3542_v19 = vadd.s32 56, %v3516_v55 }
  0x58   : > { %3122 = vpow2.f32 %v2775_v42  ;;  %v512_v23 = vand.u32 7, %v3525_v10  ;;  %v513_v1 = vand.u32 7, %v3528_v12  ;;  %vm3559_vm2 = vcmp.ne.s32.totalorder %v510_v13, 7 }
  0x59   : > { %3124 = vpow2.f32 %v2776_v44  ;;  %vm3565_vm3 = vcmp.ne.s32.totalorder %v511_v14, 7  ;;  %v514_v9 = vand.u32 7, %v3533_v15  ;;  %v515_v21 = vand.u32 7, %v3536_v16 }
  0x5a   : > { %3126 = vpow2.f32 %v2777_v45  ;;  %v516_v27 = vand.u32 7, %v3539_v17  ;;  %vm3587_vm4 = vcmp.ne.s32.totalorder %v512_v23, 7  ;;  %vm3593_vm5 = vcmp.ne.s32.totalorder %v513_v1, 7 }
  0x5b   : > { %3128 = vpow2.f32 %v2778_v46  ;;  %vm3616_vm6 = vcmp.ne.s32.totalorder %v514_v9, 7  ;;  %vm3631_vm7 = vcmp.ne.s32.totalorder %v515_v21, 7  ;;  %vm3701_vm11 = vcmp.ne.s32.totalorder %v510_v13, 0 }
  0x5c   : > { %3130 = vpow2.f32 %v2779_v47  ;;  %vm3662_vm8 = vcmp.ne.s32.totalorder %v516_v27, 7  ;;  %vm3707_vm12 = vcmp.ne.s32.totalorder %v511_v14, 0  ;;  %v3256_v13 = vmov 0.0  }
  0x5d   : > { %v4685_v8 = vsel %vm3662_vm8, 4294967295, %v4684_v8  ;;  %vm3726_vm13 = vcmp.ne.s32.totalorder %v512_v23, 0  ;;  %vm3732_vm14 = vcmp.ne.s32.totalorder %v513_v1, 0  ;;  %vm3758_vm15 = vcmp.ne.s32.totalorder %v514_v9, 0 }
  0x5e   : > { %vm3780_vm0 = vcmp.ne.s32.totalorder %v516_v27, 0  ;;  %v4702_v16 = vmov 0 }
  0x5f   : > { %v3117_v49 = vpop.eup %3116 }
  0x60   : > { %v3119_v50 = vpop.eup %3118  ;;  %v711_v51 = vadd.f32 1.0, %v3117_v49 }
  0x61   : > { %v3121_v52 = vpop.eup %3120  ;;  %v712_v53 = vadd.f32 1.0, %v3119_v50 }
  0x62   : > { %v3123_v54 = vpop.eup %3122  ;;  %3132 = vrcp.f32 %v711_v51  ;;  %v713_v56 = vadd.f32 1.0, %v3121_v52 }
  0x63   : > { %v3125_v57 = vpop.eup %3124  ;;  %3134 = vrcp.f32 %v712_v53  ;;  %v714_v58 = vadd.f32 1.0, %v3123_v54 }
  0x64   : > { %v3127_v59 = vpop.eup %3126  ;;  %3136 = vrcp.f32 %v713_v56  ;;  %v715_v60 = vadd.f32 1.0, %v3125_v57 }
  0x65   : > { %v3129_v61 = vpop.eup %3128  ;;  %3138 = vrcp.f32 %v714_v58  ;;  %v716_v62 = vadd.f32 1.0, %v3127_v59 }
  0x66   : > { %v3131_v63 = vpop.eup %3130  ;;  %3140 = vrcp.f32 %v715_v60  ;;  %v717_v6 = vadd.f32 1.0, %v3129_v61 }
  0x67   : > { %3142 = vrcp.f32 %v716_v62  ;;  %v718_v7 = vadd.f32 1.0, %v3131_v63 }
  0x68   : > { %3144 = vrcp.f32 %v717_v6 }
  0x69   : > { %3146 = vrcp.f32 %v718_v7 }
  0x6c   : > { %v3133_v18 = vpop.eup %3132 }
  0x6d   : > { %v3135_v22 = vpop.eup %3134  ;;  %v3550_v0 = vmul.f32 %v3133_v18, %v3491_v32  ;;  %v517_v32 = vand.u32 7, %v3542_v19  ;;  %v4686_v18 = vmov 0 }
  0x6e   : > { %v3137_v24 = vpop.eup %3136  ;;  %v3555_v2 = vmul.f32 %v3135_v22, %v3493_v33 }
  0x6f   : > { %v3139_v25 = vpop.eup %3138  ;;  %v3572_v11 = vmul.f32 %v3137_v24, %v3495_v34  ;;  %v872_v26 = vrot.slane %v3550_v0, 1  ;;  %vm3668_vm9 = vcmp.ne.s32.totalorder %v517_v32, 7 }
  0x70   : > { %v3141_v28 = vpop.eup %3140  ;;  %v996_v29 = vpack.c.bf16 %v3555_v2, %v3550_v0  ;;  %v873_v30 = vrot.slane %v3555_v2, 1  ;;  %v3581_v31 = vmul.f32 %v3139_v25, %v3497_v35  ;;  %v4687_v18 = vsel %vm3668_vm9, 4294967295, %v4686_v18 }
  0x71   : > { %v3143_v33 = vpop.eup %3142  ;;  %v875_v34 = vrot.slane %v3572_v11, 1  ;;  %v3598_v35 = vmul.f32 %v3141_v28, %v3499_v36  ;;  %v3722_v5 = vpack.c.bf16 %v3572_v11, %v3555_v2 }
  0x72   : > { %v3145_v40 = vpop.eup %3144  ;;  %1032 = vrot.lane.b32.xlu0 %v996_v29, %s3254_s23  ;;  %v874_v42 = vsel %vm4653_vm1, %v872_v26, %v873_v30  ;;  %v997_v44 = vpack.c.bf16 %v3581_v31, %v3572_v11  ;;  %v877_v45 = vrot.slane %v3581_v31, 1  ;;  %v3606_v46 = vmul.f32 %v3143_v33, %v3501_v37 }
  0x73   : > { %v3147_v47 = vpop.eup %3146  ;;  %v3609_v49 = vsel %vm4653_vm1, %v873_v30, %v875_v34  ;;  %v1016_v36 = vsel %vm3559_vm2, %v874_v42, 0.0  ;;  %v879_v50 = vrot.slane %v3598_v35, 1  ;;  %v3627_v53 = vmul.f32 %v3145_v40, %v3506_v41 }
  0x74   : > { %v1017_v37 = vsel %vm3565_vm3, %v3609_v49, 0.0  ;;  %v3624_v52 = vsel %vm4653_vm1, %v875_v34, %v877_v45  ;;  %v3642_v59 = vmul.f32 %v3147_v47, %v3509_v43  ;;  %v998_v60 = vpack.c.bf16 %v3606_v46, %v3598_v35 }
  0x75   : > { %v1024_v56 = vpack.c.bf16 %v1017_v37, %v1016_v36  ;;  %v3636_v57 = vsel %vm4653_vm1, %v877_v45, %v879_v50  ;;  %v1018_v58 = vsel %vm3587_vm4, %v3624_v52, 0.0  ;;  %v881_v61 = vrot.slane %v3606_v46, 1 }
  0x76   : > { %1034 = vrot.lane.b32.xlu0 %v997_v44, %s3254_s23  ;;  %v1019_v41 = vsel %vm3593_vm5, %v3636_v57, 0.0  ;;  %v883_v62 = vrot.slane %v3627_v53, 1  ;;  %v869_v43 = vrot.slane %v3642_v59, 1  ;;  %v999_v30 = vpack.c.bf16 %v3642_v59, %v3627_v53 }
  0x77   : > { %1044 = vrot.lane.b32.xlu1 %v1024_v56, %s4666_s24  ;;  %v1025_v63 = vpack.c.bf16 %v1019_v41, %v1018_v58  ;;  %v3655_v6 = vsel %vm4653_vm1, %v879_v50, %v881_v61  ;;  %v794_v33 = vrot.slane %v3555_v2, 7  ;;  %v793_v34 = vrot.slane %v3550_v0, 7 }
  0x78   : > { %v3658_v7 = vsel %vm4653_vm1, %v881_v61, %v883_v62  ;;  %v1020_v22 = vsel %vm3616_vm6, %v3655_v6, 0.0  ;;  %v3679_v25 = vsel %vm4653_vm1, %v883_v62, %v869_v43  ;;  %v3682_v28 = vsel %vm4653_vm1, %v869_v43, %v872_v26 }
  0x79   : > { %v1021_v24 = vsel %vm3631_vm7, %v3658_v7, 0.0  ;;  %v912_v40 = vsel %vm3565_vm3, %v874_v42, 0.0  ;;  %v1022_v26 = vsel %vm3662_vm8, %v3679_v25, 0.0  ;;  %v1023_v44 = vsel %vm3668_vm9, %v3682_v28, 0.0 }
  0x7a   : > { %1036 = vrot.lane.b32.xlu0 %v998_v60, %s3254_s23  ;;  %v1026_v29 = vpack.c.bf16 %v1021_v24, %v1020_v22  ;;  %v796_v45 = vrot.slane %v3572_v11, 7  ;;  %v4688_v47 = vmov 0  ;;  %v913_v36 = vsel %vm3587_vm4, %v3609_v49, 0.0  ;;  %v3111_v24 = vld [vmem:[%s4647_s10 + $0x58] sm:$0xff]  }
  0x7b   : > { %1046 = vrot.lane.b32.xlu1 %v1025_v63, %s4666_s24  ;;  %v4689_v47 = vsel %vm3701_vm11, 4294967295, %v4688_v47  ;;  %v914_v50 = vsel %vm3593_vm5, %v3624_v52, 0.0  ;;  %v865_v37 = vpack.c.bf16 %v3550_v0, %v3256_v13  ;;  %v1027_v58 = vpack.c.bf16 %v1023_v44, %v1022_v26 }
  0x7c   : > { %v919_v0 = vpack.c.bf16 %v912_v40, %v3256_v13  ;;  %v783_v2 = vrot.slane %v3642_v59, 7  ;;  %v3740_v11 = vsel %vm4657_vm10, %v793_v34, %v794_v33  ;;  %v920_v10 = vpack.c.bf16 %v914_v50, %v913_v36 }
  0x7d   : > { %v3744_v23 = vpack.c.bf16 %v3598_v35, %v3581_v31  ;;  %v985_v12 = vsel %vm3707_vm12, %v3740_v11, 0.0  ;;  %v797_v1 = vsel %vm4657_vm10, %v794_v33, %v796_v45  ;;  %v798_v60 = vrot.slane %v3581_v31, 7 }
  0x7e   : > { %1048 = vrot.lane.b32.xlu0 %v1026_v29, %s4666_s24  ;;  %v3751_v41 = vsel %vm4657_vm10, %v783_v2, %v793_v34  ;;  %v986_v61 = vsel %vm3726_vm13, %v797_v1, 0.0  ;;  %vm3768_vm1 = vcmp.ne.s32.totalorder %v515_v21, 0  ;;  %v4698_v43 = vmov 0 }
  0x7f   : > { %1038 = vrot.lane.b32.xlu1 %v999_v30, %s3254_s23  ;;  %v984_v63 = vsel %vm3701_vm11, %v3751_v41, 0.0  ;;  %v4699_v43 = vsel %vm3768_vm1, 4294967295, %v4698_v43  ;;  %v800_v31 = vrot.slane %v3598_v35, 7  ;;  %v802_v15 = vrot.slane %v3606_v46, 7 }
  0x80   : > { %v3775_v9 = vpack.c.bf16 %v985_v12, %v984_v63  ;;  %v799_v22 = vsel %vm4657_vm10, %v796_v45, %v798_v60  ;;  %vm3786_vm11 = vcmp.ne.s32.totalorder %v517_v32, 0  ;;  %v782_v30 = vrot.slane %v3627_v53, 7 }
  0x81   : > { %v4703_v16 = vsel %vm3786_vm11, 4294967295, %v4702_v16  ;;  %v987_v21 = vsel %vm3732_vm14, %v799_v22, 0.0  ;;  %v801_v35 = vsel %vm4657_vm10, %v798_v60, %v800_v31  ;;  %v803_v29 = vsel %vm4657_vm10, %v800_v31, %v802_v15 }
  0x82   : > { %927 = vrot.lane.b32.xlu0 %v865_v37, %s3254_s23  ;;  %v915_v17 = vsel %vm3616_vm6, %v3636_v57, 0.0  ;;  %v3798_v27 = vpack.c.bf16 %v987_v21, %v986_v61  ;;  %v988_v19 = vsel %vm3758_vm15, %v801_v35, 0.0  ;;  %v989_v32 = vsel %vm3768_vm1, %v803_v29, 0.0 }
  0x83   : > { %1050 = vrot.lane.b32.xlu1 %v1027_v58, %s4666_s24  ;;  %v916_v33 = vsel %vm3631_vm7, %v3655_v6, 0.0  ;;  %v3808_v34 = vpack.c.bf16 %v989_v32, %v988_v19  ;;  %v3811_v40 = vsel %vm4657_vm10, %v782_v30, %v783_v2  ;;  %v804_v26 = vsel %vm4657_vm10, %v802_v15, %v782_v30 }
  0x84   : > { %v990_v44 = vsel %vm3780_vm0, %v804_v26, 0.0  ;;  %v991_v45 = vsel %vm3786_vm11, %v3811_v40, 0.0  ;;  %v832_v36 = vsel %vm3732_vm14, %v797_v1, 0.0  ;;  %v831_v50 = vsel %vm3726_vm13, %v3740_v11, 0.0 }
  0x85   : > { %v3826_v37 = vpack.c.bf16 %v991_v45, %v990_v44  ;;  %v3828_v58 = vpack.c.bf16 %v832_v36, %v831_v50  ;;  %v868_v2 = vpack.c.bf16 %v3627_v53, %v3606_v46  ;;  %v917_v12 = vsel %vm3662_vm8, %v3658_v7, 0.0 }
  0x86   : > { %939 = vrot.lane.b32.xlu0 %v919_v0, %s4666_s24  ;;  %v921_v0 = vpack.c.bf16 %v916_v33, %v915_v17  ;;  %v918_v60 = vsel %vm3668_vm9, %v3679_v25, 0.0  ;;  %v833_v61 = vsel %vm3758_vm15, %v799_v22, 0.0  ;;  %v834_v63 = vsel %vm3768_vm1, %v801_v35, 0.0 }
  0x87   : > { %929 = vrot.lane.b32.xlu1 %v3722_v5, %s3254_s23  ;;  %v836_v46 = vsel %vm3786_vm11, %v804_v26, 0.0  ;;  %v3849_v53 = vpack.c.bf16 %v834_v63, %v833_v61  ;;  %v922_v15 = vpack.c.bf16 %v918_v60, %v917_v12  ;;  %v1363_v21 = vsel %vm3559_vm2, %v3609_v49, 0.0  ;;  %v3065_v60 = vld [vmem:[%s4643_s5 + $0x8] sm:$0xff]  }
  0x88   : > { %v1364_v30 = vsel %vm3565_vm3, %v3624_v52, 0.0  ;;  %v1365_v19 = vsel %vm3587_vm4, %v3636_v57, 0.0  ;;  %v1366_v32 = vsel %vm3593_vm5, %v3655_v6, 0.0  ;;  %v1308_v49 = vsel %vm3707_vm12, %v797_v1, 0.0 }
  0x89   : > { %v1371_v17 = vpack.c.bf16 %v1364_v30, %v1363_v21  ;;  %vm4704_vm10 = vnez %v4689_v47  ;;  %v1310_v33 = vsel %vm3732_vm14, %v801_v35, 0.0  ;;  %v1372_v6 = vpack.c.bf16 %v1366_v32, %v1365_v19  ;;  %v3067_v30 = vld [vmem:[%s4643_s5 + $0x18] sm:$0xff]  }
  0x8a   : > { %931 = vrot.lane.b32.xlu0 %v3744_v23, %s3254_s23  ;;  %v1307_v52 = vsel %vm4704_vm10, %v3740_v11, 0.0  ;;  %v1367_v11 = vsel %vm3616_vm6, %v3658_v7, 0.0  ;;  %v1368_v1 = vsel %vm3631_vm7, %v3679_v25, 0.0  ;;  %v1346_v35 = vpack.c.bf16 %v3256_v13, %v3642_v59 }
  0x8b   : > { %941 = vrot.lane.b32.xlu1 %v920_v10, %s4666_s24  ;;  %v835_v10 = vsel %vm3780_vm0, %v803_v29, 0.0  ;;  %v3879_v44 = vpack.c.bf16 %v1308_v49, %v1307_v52  ;;  %v1311_v45 = vsel %vm3758_vm15, %v803_v29, 0.0  ;;  %v1312_v7 = vsel %vm3768_vm1, %v804_v26, 0.0 }
  0x8c   : > { %v3851_v31 = vpack.c.bf16 %v836_v46, %v835_v10  ;;  %v3903_v36 = vpack.c.bf16 %v1312_v7, %v1311_v45  ;;  %vm4705_vm11 = vcmask 261120   ;;  %vm959_vm9 = vcmask 523264   ;;  %v3066_v46 = vld [vmem:[%s4643_s5 + $0x10] sm:$0xff]   ;;  %v3071_v7 = vld [vmem:[%s4643_s5 + $0x68] sm:$0xff]  }
  0x8d   : > { %vm4706_vm1 = vmmov %vm4705_vm11  ;;  %v830_v63 = vsel %vm3707_vm12, %v3751_v41, 0.0 }
  0x8e   : > { %943 = vrot.lane.b32.xlu0 %v921_v0, %s4666_s24 }
  0x8f   : > { %933 = vrot.lane.b32.xlu1 %v868_v2, %s3254_s23 }
  0x92   : > { %1379 = vrot.lane.b32.xlu0 %v3722_v5, %s3254_s23  ;;  %v1309_v5 = vsel %vm3726_vm13, %v799_v22, 0.0  ;;  %v1373_v22 = vpack.c.bf16 %v1368_v1, %v1367_v11  ;;  %v3070_v1 = vld [vmem:[%s4643_s5 + $0x60] sm:$0xff]  }
  0x93   : > { %945 = vrot.lane.b32.xlu1 %v922_v15, %s4666_s24  ;;  %v3881_v57 = vpack.c.bf16 %v1310_v33, %v1309_v5  ;;  %v3069_v33 = vld [vmem:[%s4643_s5 + $0x28] sm:$0xff]  }
  0x96   : > { %1391 = vrot.lane.b32.xlu0 %v1371_v17, %s4666_s24 }
  0x97   : > { %1381 = vrot.lane.b32.xlu1 %v3744_v23, %s3254_s23  ;;  %v1369_v23 = vsel %vm3662_vm8, %v3682_v28, 0.0  ;;  %vm1108_vm8 = vcmask 785408  }
  0x98   : > { %v1374_v25 = vpack.c.bf16 %v3256_v13, %v1369_v23 }
  0x9a   : > { %1383 = vrot.lane.b32.xlu0 %v868_v2, %s3254_s23 }
  0x9b   : > { %1393 = vrot.lane.b32.xlu1 %v1372_v6, %s4666_s24 }
  0x9e   : > { %1395 = vrot.lane.b32.xlu0 %v1373_v22, %s4666_s24 }
  0x9f   : > { %1385 = vrot.lane.b32.xlu1 %v1346_v35, %s3254_s23  ;;  %s3260_s23 = smov 65  }
  0xa3   : > { %1397 = vrot.lane.b32.xlu1 %v1374_v25, %s4666_s24 }
  0xe4   : > { %v1033_v59 = vpop.permute.xlu0 %1032 }
  0xe5   : > { %v1054_v28 = vsel %vm4705_vm11, %v3775_v9, %v1033_v59  ;;  %vm4707_vm11 = vmmov %vm4706_vm1 }
  0xe8   : > { %v1035_v29 = vpop.permute.xlu0 %1034 }
  0xe9   : > { %v1045_v50 = vpop.permute.xlu1 %1044  ;;  %v1057_v0 = vsel %vm4706_vm1, %v3798_v27, %v1035_v29 }
  0xea   : > { %v1065_v26 = vsel %vm959_vm9, %v1054_v28, %v1045_v50 }
  0xeb   : > { %2933 = vmatprep.mubr.msk.bf16.mxu0 %vm1108_vm8, %v1065_v26 }
  0xec   : > { %v1037_v2 = vpop.permute.xlu0 %1036 }
  0xed   : > { %v1047_v12 = vpop.permute.xlu1 %1046  ;;  %v1060_v9 = vsel %vm4707_vm11, %v3808_v34, %v1037_v2  ;;  %v837_v34 = vpack.c.bf16 %v830_v63, %v3256_v13  ;;  %vm4708_vm11 = vmmov %vm4706_vm1 }
  0xee   : > { %v1067_v61 = vsel %vm959_vm9, %v1057_v0, %v1047_v12  ;;  %v3073_v0 = vld [vmem:[%s4643_s5 + $0x78] sm:$0xff]  }
  0xef   : > { %2934 = vmatmul.mubr.msk.bf16.vlgmr.msra.gmra.mrb[0].mxu0 %vm1108_vm8, %v1067_v61 }
  0xf0   : > { %2942 = vmatpush3.bf16.msra.mxu0 %v3547_v20  ;;  %v1049_v27 = vpop.permute.xlu0 %1048 }
  0xf1   : > { %2943 = vmatprep.subr.bf16.mxu0 %v3065_v60  ;;  %v1039_v10 = vpop.permute.xlu1 %1038  ;;  %v1069_v15 = vsel %vm959_vm9, %v1060_v9, %v1049_v27 }
  0xf2   : > { %2937 = vmatprep.mubr.msk.bf16.mxu0 %vm1108_vm8, %v1069_v15  ;;  %v1063_v21 = vsel %vm4706_vm1, %v3826_v37, %v1039_v10  ;;  %v3068_v37 = vld [vmem:[%s4643_s5 + $0x20] sm:$0xff]   ;;  %v1313_v10 = vsel %vm3780_vm0, %v3811_v40, 0.0 }
  0xf3   : > { %v2810_v40 = vld [vmem:[%s4644_s6] ss:$0 sm:$0xff] }
  0xf4   : > { %2944 = vmatpush3.bf16.msra.mxu0 %v3065_v60  ;;  %v928_v41 = vpop.permute.xlu0 %927  ;;  %v3075_v60 = vld [vmem:[%s4643_s5 + $0x88] sm:$0xff]  }
  0xf5   : > { %2945 = vmatprep.subr.bf16.mxu0 %v3066_v46  ;;  %v1051_v20 = vpop.permute.xlu1 %1050  ;;  %v949_v19 = vsel %vm4708_vm11, %v837_v34, %v928_v41  ;;  %vm4709_vm11 = vmmov %vm4706_vm1 }
  0xf6   : > { %v1071_v17 = vsel %vm959_vm9, %v1063_v21, %v1051_v20  ;;  %v1318_v21 = vpack.c.bf16 %v3256_v13, %v1313_v10 }
  0xf7   : > { %2938 = vmatmul.mubr.msk.bf16.gmra.mrb[4].mxu0 %vm1108_vm8, %v1071_v17  ;;  %v2811_v17 = vld [vmem:[%s483_s25] ss:$0 sm:$0xff] }
  0xf8   : > { %2946 = vmatpush3.bf16.msra.mxu0 %v3066_v46  ;;  %v940_v32 = vpop.permute.xlu0 %939 }
  0xf9   : > { %2947 = vmatprep.subr.bf16.mxu0 %v3067_v30  ;;  %v930_v49 = vpop.permute.xlu1 %929  ;;  %v961_v52 = vsel %vm959_vm9, %v949_v19, %v940_v32 }
  0xfa   : > { %2953 = vmatprep.mubr.msk.bf16.mxu0 %vm1108_vm8, %v961_v52  ;;  %v952_v35 = vsel %vm4709_vm11, %v3828_v58, %v930_v49  ;;  %vm4710_vm11 = vmmov %vm4706_vm1 }
  0xfc   : > { %2948 = vmatpush3.bf16.msra.mxu0 %v3067_v30  ;;  %v932_v5 = vpop.permute.xlu0 %931 }
  0xfd   : > { %2949 = vmatprep.subr.bf16.mxu0 %v3068_v37  ;;  %v942_v6 = vpop.permute.xlu1 %941  ;;  %v955_v22 = vsel %vm4706_vm1, %v3849_v53, %v932_v5  ;;  %v3072_v53 = vld [vmem:[%s4643_s5 + $0x70] sm:$0xff]  }
  0xfe   : > { %v963_v59 = vsel %vm959_vm9, %v952_v35, %v942_v6 }
 0x100   : > { %2950 = vmatpush3.bf16.msra.mxu0 %v3068_v37  ;;  %v944_v11 = vpop.permute.xlu0 %943 }
 0x101   : > { %2951 = vmatprep.subr.bf16.mxu0 %v3069_v33  ;;  %v934_v23 = vpop.permute.xlu1 %933  ;;  %v965_v25 = vsel %vm959_vm9, %v955_v22, %v944_v11 }
 0x102   : > { %v958_v58 = vsel %vm4706_vm1, %v3851_v31, %v934_v23 }
 0x104   : > { %2952 = vmatpush3.bf16.msra.mxu0 %v3069_v33  ;;  %v1380_v45 = vpop.permute.xlu0 %1379 }
 0x105   : > { %2961 = vmatprep.subr.bf16.mxu0 %v3070_v1  ;;  %v946_v28 = vpop.permute.xlu1 %945  ;;  %v1401_v29 = vsel %vm4710_vm11, %v3879_v44, %v1380_v45  ;;  %v3074_v44 = vld [vmem:[%s4643_s5 + $0x80] sm:$0xff]   ;;  %vm4711_vm11 = vmmov %vm4706_vm1 }
 0x106   : > { %v967_v26 = vsel %vm959_vm9, %v958_v58, %v946_v28 }
 0x107   : > { %2954 = vmatmul.mubr.msk.bf16.vlgmr.msra.gmra.mrb[0].mxu0 %vm1108_vm8, %v963_v59 }
 0x108   : > { %2962 = vmatpush3.bf16.msra.mxu0 %v3070_v1  ;;  %2957 = vmatprep.mubr.msk.bf16.mxu0 %vm1108_vm8, %v965_v25  ;;  %v1392_v50 = vpop.permute.xlu0 %1391 }
 0x109   : > { %2963 = vmatprep.subr.bf16.mxu0 %v3071_v7  ;;  %v1412_v2 = vsel %vm959_vm9, %v1401_v29, %v1392_v50  ;;  %v1382_v31 = vpop.permute.xlu1 %1381 }
 0x10a   : > { %v1404_v27 = vsel %vm4711_vm11, %v3881_v57, %v1382_v31  ;;  %vm1637_vm11 = vcmask 7168  }
 0x10c   : > { %2964 = vmatpush3.bf16.msra.mxu0 %v3071_v7  ;;  %v1384_v12 = vpop.permute.xlu0 %1383 }
 0x10d   : > { %2965 = vmatprep.subr.bf16.mxu0 %v3072_v53  ;;  %v1394_v61 = vpop.permute.xlu1 %1393  ;;  %v1407_v9 = vsel %vm4706_vm1, %v3903_v36, %v1384_v12 }
 0x10e   : > { %v1414_v34 = vsel %vm959_vm9, %v1404_v27, %v1394_v61 }
 0x10f   : > { %2958 = vmatmul.mubr.msk.bf16.gmra.mrb[4].mxu0 %vm1108_vm8, %v967_v26 }
 0x110   : > { %2966 = vmatpush3.bf16.msra.mxu0 %v3072_v53  ;;  %2973 = vmatprep.mubr.msk.bf16.mxu0 %vm1108_vm8, %v1412_v2  ;;  %v1396_v63 = vpop.permute.xlu0 %1395 }
 0x111   : > { %2967 = vmatprep.subr.bf16.mxu0 %v3073_v0  ;;  %v1386_v46 = vpop.permute.xlu1 %1385  ;;  %v1416_v15 = vsel %vm959_vm9, %v1407_v9, %v1396_v63 }
 0x112   : > { %v1410_v36 = vsel %vm4706_vm1, %v1318_v21, %v1386_v46 }
 0x114   : > { %2968 = vmatpush3.bf16.msra.mxu0 %v3073_v0 }
 0x115   : > { %2969 = vmatprep.subr.bf16.mxu0 %v3074_v44  ;;  %v1398_v41 = vpop.permute.xlu1 %1397 }
 0x116   : > { %v1418_v57 = vsel %vm959_vm9, %v1410_v36, %v1398_v41 }
 0x118   : > { %2970 = vmatpush3.bf16.msra.mxu0 %v3074_v44 }
 0x119   : > { %2971 = vmatprep.subr.bf16.mxu0 %v3075_v60 }
 0x11c   : > { %2972 = vmatpush3.bf16.msra.mxu0 %v3075_v60 }
 0x11f   : > { %2974 = vmatmul.mubr.msk.bf16.vlgmr.msra.gmra.mrb[0].mxu0 %vm1108_vm8, %v1414_v34 }
 0x120   : > { %2977 = vmatprep.mubr.msk.bf16.mxu0 %vm1108_vm8, %v1416_v15 }
 0x127   : > { %2978 = vmatmul.mubr.msk.bf16.gmra.mrb[4].mxu0 %vm1108_vm8, %v1418_v57  ;;  %vm1629_vm8 = vcmask 515072  }
 0x1f2   : > { %v2975_v20 = vpop.f32.mrb[0].mxu0 }
 0x1f3   : > { %v1545_v30 = vadd.f32 %v2975_v20, %v2810_v40  ;;  %v1497_v19 = vpop.f32.mrb[1].mxu0 }
 0x1f4   : > { %v1543_v32 = vadd.f32 %v2810_v40, %v1497_v19  ;;  %v2976_v49 = vpop.f32.mrb[2].mxu0 }
 0x1f5   : > { %v1546_v37 = vadd.f32 %v2976_v49, %v2810_v40  ;;  %v1500_v52 = vpop.f32.mrb[3].mxu0  ;;  %v4004_v5 = vadd.f32 %v2811_v17, %v1545_v30 }
 0x1f6   : > { %v4006_v33 = vadd.f32 %v2811_v17, %v1543_v32  ;;  %v1544_v6 = vadd.f32 %v2810_v40, %v1500_v52 }
 0x1f7   : > { %v4010_v1 = vadd.f32 %v2811_v17, %v1546_v37  ;;  %v1591_v35 = vmul.f32 %v4004_v5, %v4004_v5  ;;  %v1571_v59 = vsel %vm959_vm9, %v4004_v5, 0.0 }
 0x1f8   : > { %v1589_v11 = vmul.f32 %v4006_v33, %v4006_v33  ;;  %v4012_v22 = vadd.f32 %v2811_v17, %v1544_v6  ;;  %v1568_v23 = vsel %vm959_vm9, %v4006_v33, 0.0 }
 0x1f9   : > { %v1592_v50 = vmul.f32 %v4010_v1, %v4010_v1  ;;  %v1600_v61 = vsel %vm959_vm9, %v1591_v35, 0.0  ;;  %v1573_v9 = vsel %vm959_vm9, %v4010_v1, 0.0 }
 0x1fa   : > { %v1569_v45 = vsel %vm959_vm9, %v4012_v22, 0.0  ;;  %v1590_v7 = vmul.f32 %v4012_v22, %v4012_v22  ;;  %v2979_v25 = vpop.f32.mrb[4].mxu0  ;;  %v1597_v29 = vsel %vm959_vm9, %v1589_v11, 0.0 }
 0x1fb   : > { %v1570_v58 = vadd.f32 %v1569_v45, %v1568_v23  ;;  %v1549_v53 = vadd.f32 %v2979_v25, %v2810_v40  ;;  %v1513_v28 = vpop.f32.mrb[5].mxu0  ;;  %v1602_v34 = vsel %vm959_vm9, %v1592_v50, 0.0 }
 0x1fc   : > { %v1598_v26 = vsel %vm959_vm9, %v1590_v7, 0.0  ;;  %v1547_v0 = vadd.f32 %v2810_v40, %v1513_v28  ;;  %v2980_v2 = vpop.f32.mrb[6].mxu0 }
 0x1fd   : > { %v1572_v31 = vadd.f32 %v1571_v59, %v1570_v58  ;;  %v1599_v44 = vadd.f32 %v1598_v26, %v1597_v29  ;;  %v1550_v12 = vadd.f32 %v2980_v2, %v2810_v40  ;;  %v1516_v60 = vpop.f32.mrb[7].mxu0  ;;  %v4033_v46 = vadd.f32 %v2811_v17, %v1549_v53 }
 0x1fe   : > { %v4031_v63 = vadd.f32 %v2811_v17, %v1547_v0  ;;  %v1548_v27 = vadd.f32 %v2810_v40, %v1516_v60 }
 0x1ff   : > { %v1601_v10 = vadd.f32 %v1600_v61, %v1599_v44  ;;  %v1574_v15 = vadd.f32 %v1573_v9, %v1572_v31  ;;  %v4042_v30 = vadd.f32 %v2811_v17, %v1550_v12  ;;  %v1595_v32 = vmul.f32 %v4033_v46, %v4033_v46 }
 0x200   : > { %v1575_v21 = vsel %vm959_vm9, %v4031_v63, 0.0  ;;  %v1593_v36 = vmul.f32 %v4031_v63, %v4031_v63  ;;  %v4040_v41 = vadd.f32 %v2811_v17, %v1548_v27  ;;  %v1579_v6 = vsel %vm959_vm9, %v4033_v46, 0.0  ;;  %v3076_v27 = vld [vmem:[%s4647_s10 + $0x60] sm:$0xff]  }
 0x201   : > { %v1576_v57 = vadd.f32 %v1575_v21, %v1574_v15  ;;  %v1603_v20 = vadd.f32 %v1602_v34, %v1601_v10  ;;  %v1596_v17 = vmul.f32 %v4042_v30, %v4042_v30  ;;  %v1581_v23 = vsel %vm959_vm9, %v4042_v30, 0.0  ;;  %v3080_v15 = vld [vmem:[%s4647_s10 + $0xc0] sm:$0xff]   ;;  %v3077_v34 = vld [vmem:[%s4647_s10 + $0x68] sm:$0xff]  }
 0x202   : > { %v1604_v40 = vsel %vm959_vm9, %v1593_v36, 0.0  ;;  %v1577_v19 = vsel %vm959_vm9, %v4040_v41, 0.0  ;;  %v1594_v52 = vmul.f32 %v4040_v41, %v4040_v41  ;;  %v1608_v7 = vsel %vm959_vm9, %v1595_v32, 0.0  ;;  %v3082_v21 = vld [vmem:[%s4647_s10 + $0xc8] sm:$0xff]   ;;  %v3078_v36 = vld [vmem:[%s4647_s10 + $0x70] sm:$0xff]   ;;  %v3088_v32 = vld [vmem:[%s4647_s10 + $0xe0] sm:$0xff]  }
 0x203   : > { %v1605_v49 = vadd.f32 %v1604_v40, %v1603_v20  ;;  %v1578_v37 = vadd.f32 %v1577_v19, %v1576_v57  ;;  %v1610_v58 = vsel %vm959_vm9, %v1596_v17, 0.0  ;;  %v3261_v10 = vmov 0   ;;  %v3084_v57 = vld [vmem:[%s4647_s10 + $0xd0] sm:$0xff]   ;;  %v3079_v20 = vld [vmem:[%s4647_s10 + $0x78] sm:$0xff]   ;;  %v3081_v19 = vld [vmem:[%s4647_s10 + $0x80] sm:$0xff]  }
 0x204   : > { %v1606_v35 = vsel %vm959_vm9, %v1594_v52, 0.0  ;;  %2108 = vmatprep.subr.bf16.mxu1 %v3261_v10  ;;  %2470 = vmatprep.subr.bf16.mxu0 %v3261_v10  ;;  %v3086_v40 = vld [vmem:[%s4647_s10 + $0xd8] sm:$0xff]   ;;  %v3085_v52 = vld [vmem:[%s4647_s10 + $0x90] sm:$0xff]   ;;  %v1619_v17 = vand.u32 127, %v493_v48  ;;  %v3089_v48 = vld [vmem:[%s4647_s10 + $0xa0] sm:$0xff]  }
 0x205   : > { %v1580_v11 = vadd.f32 %v1579_v6, %v1578_v37  ;;  %v1607_v45 = vadd.f32 %v1606_v35, %v1605_v49  ;;  %2109 = vmatpush1.bf16.msra.mxu1 %v3076_v27  ;;  %2471 = vmatpush1.bf16.msra.mxu0 %v3080_v15  ;;  %v3083_v49 = vld [vmem:[%s4647_s10 + $0x88] sm:$0xff]   ;;  %v3092_v6 = vld [vmem:[%s4647_s10 + $0xf0] sm:$0xff]   ;;  %v3094_v35 = vld [vmem:[%s4647_s10 + $0xf8] sm:$0xff]  }
 0x206   : > { %2110 = vmatprep.subr.bf16.mxu1 %v3261_v10  ;;  %2472 = vmatprep.subr.bf16.mxu0 %v3261_v10  ;;  %v3090_v37 = vld [vmem:[%s4647_s10 + $0xe8] sm:$0xff]  }
 0x207   : > { %v1582_v25 = vadd.f32 %v1581_v23, %v1580_v11  ;;  %v1609_v59 = vadd.f32 %v1608_v7, %v1607_v45  ;;  %v3087_v11 = vld [vmem:[%s4647_s10 + $0x98] sm:$0xff]   ;;  %v1620_v23 = vand.u32 1, %v1619_v17 }
 0x209   : > { %v1583_v53 = vrot.slane %v1582_v25, 4  ;;  %v1611_v28 = vadd.f32 %v1610_v58, %v1609_v59  ;;  %2111 = vmatpush1.bf16.msra.mxu1 %v3077_v34  ;;  %2473 = vmatpush1.bf16.msra.mxu0 %v3082_v21  ;;  %vm4145_vm1 = vcmp.eq.s32.totalorder %v1620_v23, 0  ;;  %v3091_v58 = vld [vmem:[%s4647_s10 + $0xa8] sm:$0xff]   ;;  %v2812_v23 = vld [vmem:[%s4645_s7] ss:$0 sm:$0xff] }
 0x20a   : > { %2112 = vmatprep.subr.bf16.mxu1 %v3261_v10  ;;  %2474 = vmatprep.subr.bf16.mxu0 %v3261_v10 }
 0x20b   : > { %v1584_v29 = vadd.f32 %v1583_v53, %v1582_v25  ;;  %v1612_v50 = vrot.slane %v1611_v28, 4  ;;  %v3096_v25 = vld [vmem:[%s4647_s10 + $0x100] sm:$0xff]  }
 0x20d   : > { %v1585_v26 = vrot.slane %v1584_v29, 2  ;;  %v1613_v0 = vadd.f32 %v1612_v50, %v1611_v28  ;;  %2113 = vmatpush1.bf16.msra.mxu1 %v3078_v36  ;;  %2475 = vmatpush1.bf16.msra.mxu0 %v3084_v57 }
 0x20e   : > { %2114 = vmatprep.subr.bf16.mxu1 %v3261_v10  ;;  %2476 = vmatprep.subr.bf16.mxu0 %v3261_v10 }
 0x20f   : > { %v1586_v2 = vadd.f32 %v1585_v26, %v1584_v29  ;;  %v1614_v31 = vrot.slane %v1613_v0, 2 }
 0x211   : > { %v1587_v44 = vrot.slane %v1586_v2, 1  ;;  %v1615_v60 = vadd.f32 %v1614_v31, %v1613_v0  ;;  %2115 = vmatpush1.bf16.msra.mxu1 %v3079_v20  ;;  %2477 = vmatpush1.bf16.msra.mxu0 %v3086_v40  ;;  %v3093_v0 = vld [vmem:[%s4647_s10 + $0xb0] sm:$0xff]  }
 0x212   : > { %2116 = vmatprep.subr.bf16.mxu1 %v3261_v10  ;;  %2478 = vmatprep.subr.bf16.mxu0 %v3261_v10 }
 0x213   : > { %v4060_v12 = vadd.f32 %v1587_v44, %v1586_v2  ;;  %v1616_v61 = vrot.slane %v1615_v60, 1 }
 0x215   : > { %1626 = vrot.lane.b32.xlu1 %v4060_v12, %s3257_s22  ;;  %1623 = vrot.lane.b32.xlu0 %v4060_v12, %s3258_s18  ;;  %v4066_v9 = vadd.f32 %v1616_v61, %v1615_v60  ;;  %v3095_v60 = vld [vmem:[%s4647_s10 + $0xb8] sm:$0xff]  }
 0x216   : > { %2117 = vmatpush1.bf16.msra.mxu1 %v3081_v19  ;;  %2479 = vmatpush1.bf16.msra.mxu0 %v3088_v32 }
 0x217   : > { %2118 = vmatprep.subr.bf16.mxu1 %v3261_v10  ;;  %2480 = vmatprep.subr.bf16.mxu0 %v3261_v10 }
 0x219   : > { %1634 = vrot.lane.b32.xlu1 %v4060_v12, %s3259_s19  ;;  %1631 = vrot.lane.b32.xlu0 %v4060_v12, %s3260_s23 }
 0x21a   : > { %2119 = vmatpush1.bf16.msra.mxu1 %v3083_v49  ;;  %2481 = vmatpush1.bf16.msra.mxu0 %v3090_v37  ;;  %v1668_v49 = vsub.s32 0, %v3516_v55 }
 0x21b   : > { %2120 = vmatprep.subr.bf16.mxu1 %v3261_v10  ;;  %2482 = vmatprep.subr.bf16.mxu0 %v3261_v10 }
 0x21d   : > { %1645 = vrot.lane.b32.xlu1 %v4066_v9, %s3257_s22  ;;  %1642 = vrot.lane.b32.xlu0 %v4066_v9, %s3258_s18  ;;  %s4714_s22 = smov 64   ;;  %s3262_s18 = smov [#allocation4]  }
 0x21e   : > { %2121 = vmatpush1.bf16.msra.mxu1 %v3085_v52  ;;  %2483 = vmatpush1.bf16.msra.mxu0 %v3092_v6 }
 0x21f   : > { %2122 = vmatprep.subr.bf16.mxu1 %v3261_v10  ;;  %2484 = vmatprep.subr.bf16.mxu0 %v3261_v10 }
 0x221   : > { %1652 = vrot.lane.b32.xlu1 %v4066_v9, %s3259_s19  ;;  %1649 = vrot.lane.b32.xlu0 %v4066_v9, %s3260_s23  ;;  %s2884_s23 = sshll.u32 %s3361_s9, 10 }
 0x222   : > { %2123 = vmatpush1.bf16.msra.mxu1 %v3087_v11  ;;  %2485 = vmatpush1.bf16.msra.mxu0 %v3094_v35 }
 0x223   : > { %2124 = vmatprep.subr.bf16.mxu1 %v3261_v10  ;;  %2486 = vmatprep.subr.bf16.mxu0 %v3261_v10 }
 0x226   : > { %2125 = vmatpush1.bf16.msra.mxu1 %v3089_v48  ;;  %2487 = vmatpush1.bf16.msra.mxu0 %v3096_v25 }
 0x227   : > { %2126 = vmatprep.subr.bf16.mxu1 %v3261_v10  ;;  %2488 = vmatprep.subr.bf16.mxu0 %v3261_v10 }
 0x22a   : > { %2127 = vmatpush1.bf16.msra.mxu1 %v3091_v58 }
 0x22b   : > { %2128 = vmatprep.subr.bf16.mxu1 %v3261_v10 }
 0x22e   : > { %2129 = vmatpush1.bf16.msra.mxu1 %v3093_v0 }
 0x22f   : > { %2130 = vmatprep.subr.bf16.mxu1 %v3261_v10 }
 0x232   : > { %2131 = vmatpush1.bf16.msra.mxu1 %v3095_v60 }
 0x233   : > { %2257 = vmatprep.subr.bf16.mxu1 %v3261_v10 }
 0x287   : > { %v1627_v45 = vpop.permute.xlu1 %1626  ;;  %v1624_v7 = vpop.permute.xlu0 %1623 }
 0x288   : > { %v1630_v29 = vsel %vm1629_vm8, %v1624_v7, %v1627_v45 }
 0x28b   : > { %v1635_v53 = vpop.permute.xlu1 %1634  ;;  %v1632_v28 = vpop.permute.xlu0 %1631 }
 0x28c   : > { %v1638_v50 = vsel %vm1637_vm11, %v1632_v28, %v1635_v53 }
 0x28d   : > { %v1639_v26 = vsel %vm4145_vm1, %v1630_v29, %v1638_v50 }
 0x28e   : > { %v1640_v44 = vadd.f32 %v1639_v26, %v4060_v12 }
 0x28f   : > { %v1646_v2 = vpop.permute.xlu1 %1645  ;;  %v1643_v31 = vpop.permute.xlu0 %1642 }
 0x290   : > { %v1659_v15 = vmul.f32 0.0078125, %v1640_v44  ;;  %v1648_v34 = vsel %vm1629_vm8, %v1643_v31, %v1646_v2  ;;  %vm4715_vm8 = vcmask 1046528  }
 0x292   : > { %v1661_v12 = vmul.f32 %v1659_v15, %v1659_v15  ;;  %v1669_v37 = vrot.slane %v1659_v15, %v1668_v49 }
 0x293   : > { %v1653_v61 = vpop.permute.xlu1 %1652  ;;  %v1650_v27 = vpop.permute.xlu0 %1649 }
 0x294   : > { %v1655_v21 = vsel %vm1637_vm11, %v1650_v27, %v1653_v61  ;;  %v1672_v6 = vsub.f32 %v4004_v5, %v1669_v37  ;;  %v1673_v11 = vsub.f32 %v4010_v1, %v1669_v37  ;;  %v1671_v35 = vsub.f32 %v4012_v22, %v1669_v37  ;;  %vm4716_vm11 = vmmov %vm4715_vm8 }
 0x295   : > { %v1656_v36 = vsel %vm4145_vm1, %v1648_v34, %v1655_v21  ;;  %v1676_v48 = vsub.f32 %v4033_v46, %v1669_v37  ;;  %v1677_v45 = vsub.f32 %v4042_v30, %v1669_v37  ;;  %v1674_v55 = vsub.f32 %v4031_v63, %v1669_v37  ;;  %vm4717_vm1 = vmmov %vm4715_vm8 }
 0x296   : > { %v1657_v57 = vadd.f32 %v1656_v36, %v4066_v9  ;;  %v1670_v9 = vsub.f32 %v4006_v33, %v1669_v37  ;;  %v1675_v7 = vsub.f32 %v4040_v41, %v1669_v37  ;;  %v2813_v33 = vld [vmem:[%s4646_s8] ss:$0 sm:$0xff] }
 0x298   : > { %v1660_v20 = vmul.f32 0.0078125, %v1657_v57 }
 0x29a   : > { %v1662_v40 = vsub.f32 %v1660_v20, %v1661_v12 }
 0x29c   : > { %v1663_v19 = vmax.f32 %v1662_v40, 0.0 }
 0x29e   : > { %v1664_v32 = vadd.f32 1e-05, %v1663_v19 }
 0x2a0   : > { %3148 = vrsqrt.f32 %v1664_v32 }
 0x2aa   : > { %v3149_v52 = vpop.eup %3148 }
 0x2ab   : > { %v1681_v17 = vrot.slane %v3149_v52, %v1668_v49 }
 0x2ad   : > { %v1684_v5 = vmul.f32 %v1681_v17, %v1672_v6  ;;  %v1685_v25 = vmul.f32 %v1681_v17, %v1673_v11  ;;  %v1682_v59 = vmul.f32 %v1681_v17, %v1670_v9  ;;  %v1683_v1 = vmul.f32 %v1681_v17, %v1671_v35 }
 0x2ae   : > { %v1688_v22 = vmul.f32 %v1681_v17, %v1676_v48  ;;  %v1689_v58 = vmul.f32 %v1681_v17, %v1677_v45  ;;  %v1686_v53 = vmul.f32 %v1681_v17, %v1674_v55  ;;  %v1687_v28 = vmul.f32 %v1681_v17, %v1675_v7 }
 0x2af   : > { %v1698_v29 = vmul.f32 %v2812_v23, %v1684_v5  ;;  %v1699_v46 = vmul.f32 %v2812_v23, %v1685_v25  ;;  %v1696_v50 = vmul.f32 %v2812_v23, %v1682_v59  ;;  %v1697_v30 = vmul.f32 %v2812_v23, %v1683_v1  ;;  %v3098_v1 = vld [vmem:[%s4647_s10 + $0x108] sm:$0xff]  }
 0x2b0   : > { %v1702_v26 = vmul.f32 %v2812_v23, %v1688_v22  ;;  %v1703_v63 = vmul.f32 %v2812_v23, %v1689_v58  ;;  %v1700_v0 = vmul.f32 %v2812_v23, %v1686_v53  ;;  %v1701_v41 = vmul.f32 %v2812_v23, %v1687_v28  ;;  %2489 = vmatpush1.bf16.msra.mxu0 %v3098_v1  ;;  %v3100_v53 = vld [vmem:[%s4647_s10 + $0x110] sm:$0xff]  }
 0x2b1   : > { %v1712_v2 = vadd.f32 %v2813_v33, %v1698_v29  ;;  %v1713_v31 = vadd.f32 %v2813_v33, %v1699_v46  ;;  %v1710_v44 = vadd.f32 %v2813_v33, %v1696_v50  ;;  %v1711_v60 = vadd.f32 %v2813_v33, %v1697_v30  ;;  %2490 = vmatprep.subr.bf16.mxu0 %v3261_v10 }
 0x2b2   : > { %v4188_v61 = vadd.f32 %v2813_v33, %v1702_v26  ;;  %v4190_v27 = vadd.f32 %v2813_v33, %v1703_v63  ;;  %v4192_v36 = vadd.f32 %v2813_v33, %v1700_v0  ;;  %v4194_v12 = vadd.f32 %v2813_v33, %v1701_v41 }
 0x2b3   : > { %v2816_v15 = vmul.f32 -1.442695, %v1712_v2  ;;  %v2817_v34 = vmul.f32 -1.442695, %v1713_v31  ;;  %v2814_v21 = vmul.f32 -1.442695, %v1710_v44 }
 0x2b4   : > { %v2815_v57 = vmul.f32 -1.442695, %v1711_v60  ;;  %v2820_v20 = vmul.f32 -1.442695, %v4188_v61  ;;  %v2821_v40 = vmul.f32 -1.442695, %v4190_v27  ;;  %2491 = vmatpush1.bf16.msra.mxu0 %v3100_v53 }
 0x2b5   : > { %3150 = vpow2.f32 %v2816_v15  ;;  %v2818_v19 = vmul.f32 -1.442695, %v4192_v36  ;;  %v2819_v32 = vmul.f32 -1.442695, %v4194_v12  ;;  %2492 = vmatprep.subr.bf16.mxu0 %v3261_v10 }
 0x2b6   : > { %3152 = vpow2.f32 %v2817_v34 }
 0x2b7   : > { %3154 = vpow2.f32 %v2814_v21 }
 0x2b8   : > { %3156 = vpow2.f32 %v2815_v57 }
 0x2b9   : > { %3158 = vpow2.f32 %v2820_v20 }
 0x2ba   : > { %3160 = vpow2.f32 %v2821_v40 }
 0x2bb   : > { %3162 = vpow2.f32 %v2818_v19 }
 0x2bc   : > { %3164 = vpow2.f32 %v2819_v32 }
 0x2bf   : > { %v3151_v49 = vpop.eup %3150 }
 0x2c0   : > { %v3153_v37 = vpop.eup %3152  ;;  %v1744_v52 = vadd.f32 1.0, %v3151_v49 }
 0x2c1   : > { %v3155_v6 = vpop.eup %3154  ;;  %v1745_v17 = vadd.f32 1.0, %v3153_v37 }
 0x2c2   : > { %v3157_v11 = vpop.eup %3156  ;;  %3166 = vrcp.f32 %v1744_v52  ;;  %v1742_v9 = vadd.f32 1.0, %v3155_v6 }
 0x2c3   : > { %v3159_v35 = vpop.eup %3158  ;;  %3168 = vrcp.f32 %v1745_v17  ;;  %v1743_v23 = vadd.f32 1.0, %v3157_v11 }
 0x2c4   : > { %v3161_v48 = vpop.eup %3160  ;;  %3170 = vrcp.f32 %v1742_v9  ;;  %v1748_v45 = vadd.f32 1.0, %v3159_v35 }
 0x2c5   : > { %v3163_v55 = vpop.eup %3162  ;;  %3172 = vrcp.f32 %v1743_v23  ;;  %v1749_v7 = vadd.f32 1.0, %v3161_v48 }
 0x2c6   : > { %v3165_v5 = vpop.eup %3164  ;;  %3174 = vrcp.f32 %v1748_v45  ;;  %v1746_v25 = vadd.f32 1.0, %v3163_v55 }
 0x2c7   : > { %3176 = vrcp.f32 %v1749_v7  ;;  %v1747_v59 = vadd.f32 1.0, %v3165_v5 }
 0x2c8   : > { %3178 = vrcp.f32 %v1746_v25 }
 0x2c9   : > { %3180 = vrcp.f32 %v1747_v59 }
 0x2cc   : > { %v3167_v33 = vpop.eup %3166 }
 0x2cd   : > { %v3169_v22 = vpop.eup %3168  ;;  %v1768_v58 = vmul.f32 %v3167_v33, %v1712_v2 }
 0x2ce   : > { %v3171_v28 = vpop.eup %3170  ;;  %v4207_v29 = vmul.f32 %v3169_v22, %v1713_v31 }
 0x2cf   : > { %v3173_v46 = vpop.eup %3172  ;;  %v4209_v50 = vmul.f32 %v3171_v28, %v1710_v44  ;;  %v1908_v30 = vrot.slane %v1768_v58, 1  ;;  %v1862_v34 = vrot.slane %v1768_v58, 7  ;;  %v3102_v44 = vld [vmem:[%s4647_s10 + $0x118] sm:$0xff]  }
 0x2d0   : > { %v3175_v26 = vpop.eup %3174  ;;  %v1981_v63 = vpack.c.bf16 %v4207_v29, %v1768_v58  ;;  %v1767_v0 = vmul.f32 %v3173_v46, %v1711_v60  ;;  %v1910_v41 = vrot.slane %v4207_v29, 1  ;;  %2493 = vmatpush1.bf16.msra.mxu0 %v3102_v44 }
 0x2d1   : > { %v3177_v2 = vpop.eup %3176  ;;  %v4215_v15 = vmul.f32 %v3175_v26, %v4188_v61  ;;  %v1905_v31 = vrot.slane %v4209_v50, 1  ;;  %v1859_v49 = vrot.slane %v4209_v50, 7  ;;  %v1899_v55 = vpack.c.bf16 %v4209_v50, %v3256_v13 }
 0x2d2   : > { %v3179_v21 = vpop.eup %3178  ;;  %2002 = vrot.lane.b32.xlu1 %v1981_v63, %s4714_s22  ;;  %v1980_v60 = vpack.c.bf16 %v1767_v0, %v4209_v50  ;;  %v4224_v57 = vmul.f32 %v3177_v2, %v4190_v27  ;;  %v1906_v20 = vrot.slane %v1767_v0, 1  ;;  %v4227_v40 = vsel %vm4715_vm8, %v1908_v30, %v1910_v41 }
 0x2d3   : > { %v3181_v61 = vpop.eup %3180  ;;  %v2347_v19 = vsel %vm3565_vm3, %v4227_v40, 0.0  ;;  %v4233_v32 = vmul.f32 %v3179_v21, %v4192_v36  ;;  %v1860_v37 = vrot.slane %v1767_v0, 7  ;;  %v1900_v45 = vpack.c.bf16 %v1768_v58, %v1767_v0 }
 0x2d4   : > { %2000 = vrot.lane.b32.xlu0 %v1980_v60, %s4714_s22  ;;  %v1983_v27 = vpack.c.bf16 %v4224_v57, %v4215_v15  ;;  %v4240_v52 = vsel %vm4716_vm11, %v1906_v20, %v1908_v30  ;;  %v4243_v6 = vmul.f32 %v3181_v61, %v4194_v12  ;;  %v4248_v36 = vsel %vm4717_vm1, %v1905_v31, %v1906_v20 }
 0x2d5   : > { %v2346_v17 = vsel %vm3559_vm2, %v4240_v52, 0.0  ;;  %v1984_v11 = vsel %vm3559_vm2, %v4248_v36, 0.0  ;;  %v1985_v9 = vsel %vm3565_vm3, %v4240_v52, 0.0  ;;  %v1864_v12 = vrot.slane %v4207_v29, 7 }
 0x2d6   : > { %2006 = vrot.lane.b32.xlu1 %v1983_v27, %s4714_s22  ;;  %v2354_v35 = vpack.c.bf16 %v2347_v19, %v2346_v17  ;;  %v1982_v23 = vpack.c.bf16 %v4243_v6, %v4233_v32  ;;  %v1992_v48 = vpack.c.bf16 %v1985_v9, %v1984_v11  ;;  %v1849_v3 = vrot.slane %v4224_v57, 7 }
 0x2d7   : > { %vm4718_vm2 = vcmask 1040384   ;;  %v1912_v5 = vrot.slane %v4233_v32, 1  ;;  %v1986_v25 = vsel %vm3587_vm4, %v4227_v40, 0.0  ;;  %v1901_v53 = vpack.c.bf16 %v4233_v32, %v4207_v29 }
 0x2d8   : > { %2866 = vmatprep.mubr.msk.bf16.mxu0 %vm959_vm9, %v2354_v35  ;;  %2004 = vrot.lane.b32.xlu0 %v1982_v23, %s4714_s22  ;;  %v4269_v7 = vsel %vm4718_vm2, %v1859_v49, %v1860_v37  ;;  %vm4719_vm8 = vmmov %vm4718_vm2  ;;  %v1902_v26 = vpack.c.bf16 %v4215_v15, %v4243_v6  ;;  %v1866_v20 = vrot.slane %v4233_v32, 7  ;;  %v1868_v61 = vrot.slane %v4243_v6, 7 }
 0x2d9   : > { %v4276_v59 = vsel %vm4719_vm8, %v1860_v37, %v1862_v34  ;;  %2834 = vmatprep.mubr.msk.bf16.mxu1 %vm959_vm9, %v1992_v48  ;;  %vm4720_vm11 = vmmov %vm4718_vm2  ;;  %v1969_v33 = vsel %vm3707_vm12, %v4269_v7, 0.0  ;;  %v2322_v21 = vsel %vm4704_vm10, %v4269_v7, 0.0  ;;  %v1903_v27 = vrot.slane %v4224_v57, 1 }
 0x2da   : > { %v4282_v1 = vsel %vm4720_vm11, %v1849_v3, %v1859_v49  ;;  %vm4721_vm1 = vmmov %vm4718_vm2  ;;  %v1970_v58 = vsel %vm3726_vm13, %v4276_v59, 0.0  ;;  %1946 = vrot.lane.b32.xlu1 %v1900_v45, %s4714_s22  ;;  %vm4722_vm2 = vcmask 1046528   ;;  %v2323_v44 = vsel %vm3707_vm12, %v4276_v59, 0.0 }
 0x2db   : > { %v4288_v22 = vsel %vm4721_vm1, %v1862_v34, %v1864_v12  ;;  %v1968_v28 = vsel %vm4704_vm10, %v4282_v1, 0.0  ;;  %v4300_v46 = vsel %vm4722_vm2, %v1910_v41, %v1912_v5  ;;  %v1914_v41 = vrot.slane %v4243_v6, 1  ;;  %vm4723_vm8 = vmmov %vm4722_vm2 }
 0x2dc   : > { %v1971_v30 = vsel %vm3732_vm14, %v4288_v22, 0.0  ;;  %v4307_v63 = vpack.c.bf16 %v1969_v33, %v1968_v28  ;;  %v1987_v29 = vsel %vm3593_vm5, %v4300_v46, 0.0  ;;  %1944 = vrot.lane.b32.xlu0 %v1899_v55, %s4714_s22  ;;  %v1916_v34 = vrot.slane %v4215_v15, 1  ;;  %vm4724_vm11 = vmmov %vm4722_vm2 }
 0x2dd   : > { %v4312_v0 = vpack.c.bf16 %v1971_v30, %v1970_v58  ;;  %v4315_v2 = vpack.c.bf16 %v1987_v29, %v1986_v25  ;;  %v2348_v60 = vsel %vm3587_vm4, %v4300_v46, 0.0  ;;  %v1915_v19 = vsel %vm4723_vm8, %v1912_v5, %v1914_v41  ;;  %vm4725_vm10 = vmmov %vm4721_vm1 }
 0x2de   : > { %1948 = vrot.lane.b32.xlu1 %v1901_v53, %s4714_s22  ;;  %v1917_v49 = vsel %vm4724_vm11, %v1914_v41, %v1916_v34  ;;  %v4333_v37 = vpack.c.bf16 %v2323_v44, %v2322_v21  ;;  %v1988_v47 = vsel %vm3616_vm6, %v1915_v19, 0.0  ;;  %v2349_v32 = vsel %vm3593_vm5, %v1915_v19, 0.0  ;;  %vm4727_vm11 = vmmov %vm4723_vm8 }
 0x2df   : > { %v1989_v17 = vsel %vm3631_vm7, %v1917_v49, 0.0  ;;  %v1867_v6 = vsel %vm4725_vm10, %v1864_v12, %v1866_v20  ;;  %v4346_v9 = vpack.c.bf16 %v2349_v32, %v2348_v60  ;;  %v1869_v35 = vsel %vm4721_vm1, %v1866_v20, %v1868_v61 }
 0x2e0   : > { %2362 = vrot.lane.b32.xlu0 %v1900_v45, %s4714_s22  ;;  %v4344_v11 = vpack.c.bf16 %v1989_v17, %v1988_v47  ;;  %v1972_v23 = vsel %vm3758_vm15, %v1867_v6, 0.0  ;;  %vm4726_vm2 = vnez %v4699_v43  ;;  %v1918_v55 = vsel %vm4723_vm8, %v1916_v34, %v1903_v27 }
 0x2e1   : > { %v1973_v48 = vsel %vm4726_vm2, %v1869_v35, 0.0  ;;  %v4357_v12 = vsel %vm4727_vm11, %v1903_v27, %v1905_v31  ;;  %v2324_v45 = vsel %vm3726_vm13, %v4288_v22, 0.0  ;;  %vm4728_vm10 = vnez %v4685_v8  ;;  %v3108_v8 = vld [vmem:[%s4647_s10 + $0x40] sm:$0xff]  }
 0x2e2   : > { %1950 = vrot.lane.b32.xlu1 %v1902_v26, %s4714_s22  ;;  %v4363_v5 = vpack.c.bf16 %v1973_v48, %v1972_v23  ;;  %v1990_v25 = vsel %vm4728_vm10, %v1918_v55, 0.0  ;;  %vm4729_vm1 = vnez %v4687_v18  ;;  %v2325_v50 = vsel %vm3732_vm14, %v1867_v6, 0.0  ;;  %v3099_v18 = vld [vmem:[%s4647_s10 + $0x8] sm:$0xff]   ;;  %v3103_v23 = vld [vmem:[%s4647_s10 + $0x18] sm:$0xff]  }
 0x2e3   : > { %v1991_v33 = vsel %vm4729_vm1, %v4357_v12, 0.0  ;;  %v4374_v58 = vpack.c.bf16 %v2325_v50, %v2324_v45  ;;  %v2350_v28 = vsel %vm3616_vm6, %v1917_v49, 0.0  ;;  %v2351_v30 = vsel %vm3631_vm7, %v1918_v55, 0.0  ;;  %v3106_v50 = vld [vmem:[%s4647_s10 + $0x30] sm:$0xff]  }
 0x2e4   : > { %v4372_v31 = vpack.c.bf16 %v1991_v33, %v1990_v25  ;;  %2364 = vrot.lane.b32.xlu0 %v1901_v53, %s4714_s22  ;;  %v2345_v29 = vpack.c.bf16 %v3256_v13, %v4224_v57  ;;  %v4383_v41 = vpack.c.bf16 %v2351_v30, %v2350_v28  ;;  %v1848_v34 = vrot.slane %v4215_v15, 7 }
 0x2e5   : > { %v2326_v44 = vsel %vm3758_vm15, %v1869_v35, 0.0  ;;  %v1930_v21 = vsel %vm3587_vm4, %v4240_v52, 0.0  ;;  %v1931_v60 = vsel %vm3593_vm5, %v4227_v40, 0.0  ;;  %v1881_v53 = vsel %vm3726_vm13, %v4269_v7, 0.0 }
 0x2e6   : > { %2368 = vrot.lane.b32.xlu1 %v2345_v29, %s4714_s22  ;;  %vm4730_vm8 = vcmask 1040384   ;;  %v4404_v27 = vpack.c.bf16 %v1931_v60, %v1930_v21  ;;  %v1882_v38 = vsel %vm3732_vm14, %v4276_v59, 0.0  ;;  %vm4732_vm4 = vnez %v4703_v16 }
 0x2e7   : > { %v4401_v15 = vsel %vm4730_vm8, %v1848_v34, %v1849_v3  ;;  %vm4731_vm11 = vmmov %vm4730_vm8  ;;  %v4419_v3 = vpack.c.bf16 %v1882_v38, %v1881_v53  ;;  %v1932_v56 = vsel %vm3616_vm6, %v4300_v46, 0.0  ;;  %v1933_v7 = vsel %vm3631_vm7, %v1915_v19, 0.0  ;;  %v3110_v53 = vld [vmem:[%s4647_s10 + $0x50] sm:$0xff]  }
 0x2e8   : > { %v1870_v20 = vsel %vm4731_vm11, %v1868_v61, %v1848_v34  ;;  %v1975_v14 = vsel %vm4732_vm4, %v4401_v15, 0.0  ;;  %2366 = vrot.lane.b32.xlu0 %v1902_v26, %s4714_s22  ;;  %v1883_v59 = vsel %vm3758_vm15, %v4288_v22, 0.0  ;;  %v1884_v61 = vsel %vm4726_vm2, %v1867_v6, 0.0  ;;  %v3097_v22 = vld [vmem:[%s4647_s10] sm:$0xff]   ;;  %v3101_v6 = vld [vmem:[%s4647_s10 + $0x10] sm:$0xff]  }
 0x2e9   : > { %v1974_v39 = vsel %vm3780_vm0, %v1870_v20, 0.0  ;;  %v2327_v57 = vsel %vm4726_vm2, %v1870_v20, 0.0  ;;  %v4431_v26 = vpack.c.bf16 %v1933_v7, %v1932_v56  ;;  %v4433_v47 = vpack.c.bf16 %v1884_v61, %v1883_v59  ;;  %v3186_v56 = vld [vmem:[%s3396_s26 + $0x20] sm:$0xff]  ;;  %v3187_v7 = vld [vmem:[%s3396_s26 + $0x28] sm:$0xff]  ;;  %v3188_v61 = vld [vmem:[%s3396_s26 + $0x30] sm:$0xff] }
 0x2ea   : > { %v1979_v40 = vpack.c.bf16 %v1975_v14, %v1974_v39  ;;  %v4417_v52 = vpack.c.bf16 %v2327_v57, %v2326_v44  ;;  %v1934_v17 = vsel %vm4728_vm10, %v1917_v49, 0.0  ;;  %v1935_v51 = vsel %vm4729_vm1, %v1918_v55, 0.0  ;;  %v3109_v44 = vld [vmem:[%s4647_s10 + $0x48] sm:$0xff]  }
 0x2eb   : > { %v4439_v46 = vpack.c.bf16 %v1935_v51, %v1934_v17  ;;  %v1885_v54 = vsel %vm3780_vm0, %v1869_v35, 0.0  ;;  %v1886_v62 = vsel %vm4732_vm4, %v1870_v20, 0.0  ;;  %v1929_v33 = vsel %vm3565_vm3, %v4248_v36, 0.0  ;;  %v3107_v36 = vld [vmem:[%s4647_s10 + $0x38] sm:$0xff]   ;;  %v3112_v20 = vld [vmem:[%s4649_s12] sm:$0xff]   ;;  %v3113_v39 = vld [vmem:[%s4649_s12 + $0x8] sm:$0xff]  }
 0x2ec   : > { %v4445_v43 = vpack.c.bf16 %v1886_v62, %v1885_v54  ;;  %v2352_v4 = vsel %vm4728_vm10, %v4357_v12, 0.0  ;;  %v2328_v12 = vsel %vm3780_vm0, %v4401_v15, 0.0  ;;  %v1880_v15 = vsel %vm3707_vm12, %v4282_v1, 0.0  ;;  %v3182_v1 = vld [vmem:[%s3396_s26] sm:$0xff] }
 0x2ed   : > { %v2333_v21 = vpack.c.bf16 %v3256_v13, %v2328_v12  ;;  %v1887_v38 = vpack.c.bf16 %v1880_v15, %v3256_v13  ;;  %vm4733_vm0 = vcmask 261120   ;;  %v2560_v59 = vpack.c.bf16 %v3187_v7, %v3186_v56 }
 0x2ee   : > { %vm4734_vm3 = vmmov %vm4733_vm0 }
 0x2ef   : > { %vm4735_vm5 = vmmov %vm4733_vm0 }
 0x2f0   : > { %vm4736_vm6 = vmmov %vm4733_vm0 }
 0x344   : > { %v2003_v16 = vpop.permute.xlu1 %2002 }
 0x346   : > { %v2001_v19 = vpop.permute.xlu0 %2000 }
 0x347   : > { %v2010_v49 = vsel %vm959_vm9, %v4307_v63, %v2001_v19  ;;  %v2014_v63 = vsel %vm959_vm9, %v4312_v0, %v2003_v16  ;;  %v3104_v0 = vld [vmem:[%s4647_s10 + $0x20] sm:$0xff]  }
 0x348   : > { %2141 = vmatmul.mubr.bf16.vlgmr.msra.gmra.mrb[0].mxu1 %v2010_v49 }
 0x349   : > { %2258 = vmatpush1.bf16.msra.mxu1 %v3097_v22  ;;  %2835 = vmatprep.mubr.msk.bf16.mxu1 %vm959_vm9, %v4315_v2  ;;  %v2007_v2 = vpop.permute.xlu1 %2006 }
 0x34a   : > { %v2005_v32 = vpop.permute.xlu0 %2004  ;;  %2259 = vmatprep.subr.bf16.mxu1 %v3261_v10 }
 0x34b   : > { %v2018_v45 = vsel %vm959_vm9, %v4363_v5, %v2005_v32 }
 0x34d   : > { %2260 = vmatpush1.bf16.msra.mxu1 %v3099_v18 }
 0x34e   : > { %v4461_v35 = vpop.permute.xlu0 %1944  ;;  %2261 = vmatprep.subr.bf16.mxu1 %v3261_v10 }
 0x34f   : > { %v1954_v42 = vsel %vm959_vm9, %v1887_v38, %v4461_v35 }
 0x350   : > { %2149 = vmatmul.mubr.bf16.gmra.mrb[4].mxu1 %v2014_v63 }
 0x351   : > { %2262 = vmatpush1.bf16.msra.mxu1 %v3101_v6  ;;  %2836 = vmatprep.mubr.msk.bf16.mxu1 %vm959_vm9, %v4344_v11  ;;  %v1947_v11 = vpop.permute.xlu1 %1946 }
 0x352   : > { %v2363_v48 = vpop.permute.xlu0 %2362  ;;  %2263 = vmatprep.subr.bf16.mxu1 %v3261_v10 }
 0x353   : > { %v2372_v55 = vsel %vm959_vm9, %v4333_v37, %v2363_v48  ;;  %v3105_v37 = vld [vmem:[%s4647_s10 + $0x28] sm:$0xff]  }
 0x354   : > { %2503 = vmatmul.mubr.bf16.vlgmr.msra.gmra.mrb[8].mxu0 %v2372_v55 }
 0x355   : > { %2264 = vmatpush1.bf16.msra.mxu1 %v3103_v23  ;;  %2867 = vmatprep.mubr.msk.bf16.mxu0 %vm959_vm9, %v4346_v9  ;;  %v1949_v5 = vpop.permute.xlu1 %1948 }
 0x356   : > { %2265 = vmatprep.subr.bf16.mxu1 %v3261_v10  ;;  %v2365_v25 = vpop.permute.xlu0 %2364 }
 0x357   : > { %v2376_v9 = vsel %vm959_vm9, %v4374_v58, %v2365_v25  ;;  %v2022_v58 = vsel %vm959_vm9, %v1979_v40, %v2007_v2  ;;  %v3184_v40 = vld [vmem:[%s3396_s26 + $0x10] sm:$0xff] }
 0x358   : > { %2157 = vmatmul.mubr.bf16.gmra.mrb[8].mxu1 %v2018_v45 }
 0x359   : > { %2266 = vmatpush1.bf16.msra.mxu1 %v3104_v0  ;;  %2837 = vmatprep.mubr.msk.bf16.mxu1 %vm959_vm9, %v4372_v31  ;;  %v1936_v31 = vpack.c.bf16 %v1929_v33, %v3256_v13  ;;  %v1951_v30 = vpop.permute.xlu1 %1950 }
 0x35a   : > { %2267 = vmatprep.subr.bf16.mxu1 %v3261_v10  ;;  %v2367_v28 = vpop.permute.xlu0 %2366  ;;  %v1966_v57 = vsel %vm959_vm9, %v4445_v43, %v1951_v30 }
 0x35b   : > { %v2380_v29 = vsel %vm959_vm9, %v4417_v52, %v2367_v28  ;;  %v3185_v52 = vld [vmem:[%s3396_s26 + $0x18] sm:$0xff] }
 0x35c   : > { %2511 = vmatmul.mubr.bf16.gmra.mrb[12].mxu0 %v2376_v9 }
 0x35d   : > { %2268 = vmatpush1.bf16.msra.mxu1 %v3105_v37  ;;  %2868 = vmatprep.mubr.msk.bf16.mxu0 %vm959_vm9, %v4383_v41  ;;  %v2357_v41 = vpack.c.bf16 %v3256_v13, %v2352_v4  ;;  %v2369_v34 = vpop.permute.xlu1 %2368  ;;  %v1958_v13 = vsel %vm959_vm9, %v4419_v3, %v1947_v11  ;;  %v2559_v3 = vpack.c.bf16 %v3185_v52, %v3184_v40 }
 0x35e   : > { %2269 = vmatprep.subr.bf16.mxu1 %v3261_v10  ;;  %v2384_v60 = vsel %vm959_vm9, %v2333_v21, %v2369_v34 }
 0x360   : > { %2165 = vmatmul.mubr.bf16.gmra.mrb[12].mxu1 %v2022_v58 }
 0x361   : > { %2270 = vmatpush1.bf16.msra.mxu1 %v3106_v50  ;;  %2850 = vmatprep.mubr.msk.bf16.mxu1 %vm959_vm9, %v1936_v31 }
 0x362   : > { %2271 = vmatprep.subr.bf16.mxu1 %v3261_v10 }
 0x364   : > { %2519 = vmatmul.mubr.bf16.gmra.mrb[16].mxu0 %v2380_v29 }
 0x365   : > { %2272 = vmatpush1.bf16.msra.mxu1 %v3107_v36  ;;  %2869 = vmatprep.mubr.msk.bf16.mxu0 %vm959_vm9, %v2357_v41 }
 0x366   : > { %2273 = vmatprep.subr.bf16.mxu1 %v3261_v10 }
 0x369   : > { %2274 = vmatpush1.bf16.msra.mxu1 %v3108_v8 }
 0x36a   : > { %2275 = vmatprep.subr.bf16.mxu1 %v3261_v10 }
 0x36c   : > { %2527 = vmatmul.mubr.bf16.gmra.mrb[20].mxu0 %v2384_v60 }
 0x36d   : > { %2276 = vmatpush1.bf16.msra.mxu1 %v3109_v44 }
 0x36e   : > { %2277 = vmatprep.subr.bf16.mxu1 %v3261_v10 }
 0x371   : > { %2278 = vmatpush1.bf16.msra.mxu1 %v3110_v53 }
 0x372   : > { %2279 = vmatprep.subr.bf16.mxu1 %v3261_v10  ;;  %v1962_v10 = vsel %vm959_vm9, %v4433_v47, %v1949_v5 }
 0x375   : > { %2280 = vmatpush1.bf16.msra.mxu1 %v3111_v24 }
 0x376   : > { %2981 = vmatprep.subr.bf16.mxu1 %v3112_v20 }
 0x378   : > { %2290 = vmatmul.mubr.bf16.vlgmr.msra.gmra.mrb[16].mxu1 %v1954_v42 }
 0x379   : > { %2851 = vmatprep.mubr.msk.bf16.mxu1 %vm959_vm9, %v4404_v27  ;;  %2982 = vmatpush3.bf16.msra.mxu1 %v3112_v20  ;;  %v3183_v27 = vld [vmem:[%s3396_s26 + $0x8] sm:$0xff] }
 0x37a   : > { %2983 = vmatprep.subr.bf16.mxu1 %v3113_v39  ;;  %v2558_v14 = vpack.c.bf16 %v3183_v27, %v3182_v1 }
 0x37d   : > { %2984 = vmatpush3.bf16.msra.mxu1 %v3113_v39 }
 0x380   : > { %2298 = vmatmul.mubr.bf16.gmra.mrb[20].mxu1 %v1958_v13 }
 0x381   : > { %2852 = vmatprep.mubr.msk.bf16.mxu1 %vm959_vm9, %v4431_v26  ;;  %v3189_v26 = vld [vmem:[%s3396_s26 + $0x38] sm:$0xff]  ;;  %s473_s26 = sand.u32 1, %s3244_s29  }
 0x382   : > { %v2561_v47 = vpack.c.bf16 %v3189_v26, %v3188_v61  ;;  %s2767_s16 = sshll.u32 %s473_s26, 6  ;;  %s4597_s9 = scalar_lea.sflag [#allocation5], %s473_s26 }
 0x383   : > { %s475_s19 = scalar_lea.vmem [#allocation4], %s2767_s16  ;;  %s4588_s16 = scalar_lea.hbm %s4651_s14, %s2884_s23 }
 0x384   : > { %s2692_s25 = sshll.u32 %s475_s19, 4  ;;  %s3194_s23 = sshll.u32 %s3262_s18, 4  ;;  %s4590_s25 = int_to_ptr.vmem [resolvable:$true] %s2692_s25  ;;  %s3195_s23 = int_to_ptr.vmem [resolvable:$false] %s3194_s23 }
 0x385   : > { %s3190_s22 = scalar_lea.vmem %s4590_s25, 1024  ;;  %s3196_s27 = scalar_lea.vmem %s3195_s23, 2048 }
 0x386   : > { %p3191_p11 = scmp.ne.s32.totalorder %s4590_s25, %s3190_s22  ;;  %p3197_p0 = scmp.lt.s32.totalorder %s4590_s25, %s3195_s23 }
 0x387   : > { %p3198_p1 = scmp.lt.s32.totalorder %s3196_s27, %s3190_s22 }
 0x388   : > { %2306 = vmatmul.mubr.bf16.gmra.mrb[24].mxu1 %v1962_v10  ;;  %p3192_p12 = pnand %p3191_p11, %p3378_p5 }
 0x389   : > { %2853 = vmatprep.mubr.msk.bf16.mxu1 %vm959_vm9, %v4439_v46  ;;  %p3199_p2 = por %p3198_p1, %p3197_p0 }
 0x38a   : > { %p3193_p13 = pneg %p3192_p12 }
 0x38c   : > { %p3200_p3 = pnand %p3199_p2, %p3193_p13 }
 0x390   : > { %2314 = vmatmul.mubr.bf16.gmra.mrb[28].mxu1 %v1966_v57 }
 0x391   : > { %2985 = vmatprep.mubr.msk.bf16.mxu1 %vm4733_vm0, %v2558_v14 }
 0x398   : > { %2986 = vmatmul.mubr.msk.bf16.vlgmr.msra.gmra.mrb[32].mxu1 %vm4734_vm3, %v2559_v3 }
 0x399   : > { %2989 = vmatprep.mubr.msk.bf16.mxu1 %vm4735_vm5, %v2560_v59 }
 0x3a0   : > { %2990 = vmatmul.mubr.msk.bf16.gmra.mrb[36].mxu1 %vm4736_vm6, %v2561_v47 }
 0x41b   : > { %v2142_v17 = vpop.f32.mrb[0].mxu1 }
 0x41c   : > { %v2144_v51 = vpop.f32.mrb[1].mxu1 }
 0x41d   : > { %v2145_v46 = vpop.f32.mrb[2].mxu1  ;;  %v2870_v51 = vld [vmem:[%s4648_s11] ss:$0 sm:$0xff] }
 0x41e   : > { %v2147_v54 = vpop.f32.mrb[3].mxu1 }
 0x423   : > { %v2150_v62 = vpop.f32.mrb[4].mxu1 }
 0x424   : > { %v2152_v43 = vpop.f32.mrb[5].mxu1 }
 0x425   : > { %v2153_v22 = vpop.f32.mrb[6].mxu1 }
 0x426   : > { %v2155_v19 = vpop.f32.mrb[7].mxu1 }
 0x427   : > { %v2504_v49 = vpop.f32.mrb[8].mxu0 }
 0x428   : > { %v2506_v18 = vpop.f32.mrb[9].mxu0 }
 0x429   : > { %v2507_v16 = vpop.f32.mrb[10].mxu0 }
 0x42a   : > { %v2509_v32 = vpop.f32.mrb[11].mxu0 }
 0x42b   : > { %v2158_v6 = vpop.f32.mrb[8].mxu1 }
 0x42c   : > { %v2160_v35 = vpop.f32.mrb[9].mxu1 }
 0x42d   : > { %v2161_v63 = vpop.f32.mrb[10].mxu1 }
 0x42e   : > { %v2163_v2 = vpop.f32.mrb[11].mxu1 }
 0x42f   : > { %v2512_v23 = vpop.f32.mrb[12].mxu0 }
 0x430   : > { %v2514_v48 = vpop.f32.mrb[13].mxu0 }
 0x431   : > { %v2515_v55 = vpop.f32.mrb[14].mxu0 }
 0x432   : > { %v2517_v0 = vpop.f32.mrb[15].mxu0 }
 0x433   : > { %v2166_v11 = vpop.f32.mrb[12].mxu1 }
 0x434   : > { %v2168_v45 = vpop.f32.mrb[13].mxu1 }
 0x435   : > { %v2169_v25 = vpop.f32.mrb[14].mxu1 }
 0x436   : > { %v2171_v37 = vpop.f32.mrb[15].mxu1 }
 0x437   : > { %v2520_v9 = vpop.f32.mrb[16].mxu0 }
 0x438   : > { %v2522_v33 = vpop.f32.mrb[17].mxu0 }
 0x439   : > { %v2523_v5 = vpop.f32.mrb[18].mxu0 }
 0x43a   : > { %v2525_v50 = vpop.f32.mrb[19].mxu0 }
 0x43f   : > { %v2528_v31 = vpop.f32.mrb[20].mxu0 }
 0x440   : > { %v2530_v58 = vpop.f32.mrb[21].mxu0 }
 0x441   : > { %v2531_v28 = vpop.f32.mrb[22].mxu0 }
 0x442   : > { %v2533_v4 = vpop.f32.mrb[23].mxu0 }
 0x44b   : > { %v2291_v36 = vpop.f32.mrb[16].mxu1 }
 0x44c   : > { %v2292_v30 = vadd.f32 %v2291_v36, %v2142_v17  ;;  %v2293_v29 = vpop.f32.mrb[17].mxu1  ;;  %v2871_v17 = vld [vmem:[%s4650_s13] ss:$0 sm:$0xff] }
 0x44d   : > { %v2294_v41 = vpop.f32.mrb[18].mxu1 }
 0x44e   : > { %v2535_v8 = vadd.f32 %v2504_v49, %v2292_v30  ;;  %v2295_v12 = vadd.f32 %v2294_v41, %v2145_v46  ;;  %v2296_v34 = vpop.f32.mrb[19].mxu1 }
 0x450   : > { %v2536_v44 = vadd.f32 %v2507_v16, %v2295_v12 }
 0x453   : > { %v2299_v21 = vpop.f32.mrb[20].mxu1 }
 0x454   : > { %v2300_v60 = vadd.f32 %v2299_v21, %v2150_v62  ;;  %v2301_v53 = vpop.f32.mrb[21].mxu1 }
 0x455   : > { %v2302_v24 = vpop.f32.mrb[22].mxu1 }
 0x456   : > { %v2537_v15 = vadd.f32 %v2512_v23, %v2300_v60  ;;  %v2303_v20 = vadd.f32 %v2302_v24, %v2153_v22  ;;  %v2304_v38 = vpop.f32.mrb[23].mxu1  ;;  %v2550_v22 = vadd.f32 %v2870_v51, %v2535_v8 }
 0x458   : > { %v2538_v39 = vadd.f32 %v2515_v55, %v2303_v20  ;;  %v2552_v54 = vadd.f32 %v2870_v51, %v2537_v15 }
 0x45a   : > { %v2553_v16 = vadd.f32 %v2870_v51, %v2538_v39 }
 0x45b   : > { %v2307_v42 = vpop.f32.mrb[24].mxu1 }
 0x45c   : > { %v2308_v13 = vadd.f32 %v2307_v42, %v2158_v6  ;;  %v2309_v10 = vpop.f32.mrb[25].mxu1 }
 0x45d   : > { %v2310_v1 = vpop.f32.mrb[26].mxu1 }
 0x45e   : > { %v2539_v27 = vadd.f32 %v2520_v9, %v2308_v13  ;;  %v2311_v14 = vadd.f32 %v2310_v1, %v2161_v63  ;;  %v2312_v57 = vpop.f32.mrb[27].mxu1  ;;  %v2551_v63 = vadd.f32 %v2870_v51, %v2536_v44 }
 0x460   : > { %v2540_v40 = vadd.f32 %v2523_v5, %v2311_v14 }
 0x463   : > { %v2315_v52 = vpop.f32.mrb[28].mxu1 }
 0x464   : > { %v2316_v3 = vadd.f32 %v2315_v52, %v2166_v11  ;;  %v2317_v56 = vpop.f32.mrb[29].mxu1 }
 0x465   : > { %v2318_v7 = vpop.f32.mrb[30].mxu1 }
 0x466   : > { %v2541_v59 = vadd.f32 %v2528_v31, %v2316_v3  ;;  %v2319_v61 = vadd.f32 %v2318_v7, %v2169_v25  ;;  %v2320_v26 = vpop.f32.mrb[31].mxu1  ;;  %v2554_v25 = vadd.f32 %v2870_v51, %v2539_v27 }
 0x468   : > { %v2542_v47 = vadd.f32 %v2531_v28, %v2319_v61  ;;  %v2556_v0 = vadd.f32 %v2870_v51, %v2541_v59  ;;  %v2555_v28 = vadd.f32 %v2870_v51, %v2540_v40 }
 0x46a   : > { %v2557_v5 = vadd.f32 %v2870_v51, %v2542_v47 }
 0x46b   : > { %v2987_v46 = vpop.f32.mrb[32].mxu1 }
 0x46c   : > { %v2640_v62 = vadd.f32 %v2987_v46, %v2871_v17  ;;  %v2631_v43 = vpop.f32.mrb[33].mxu1 }
 0x46d   : > { %v2632_v19 = vadd.f32 %v2871_v17, %v2631_v43  ;;  %v2988_v49 = vpop.f32.mrb[34].mxu1 }
 0x46e   : > { %v2664_v18 = vadd.f32 %v2640_v62, %v2552_v54  ;;  %v2643_v32 = vadd.f32 %v2988_v49, %v2871_v17  ;;  %v2634_v6 = vpop.f32.mrb[35].mxu1 }
 0x46f   : > { %v2662_v35 = vadd.f32 %v2632_v19, %v2550_v22  ;;  %v2635_v2 = vadd.f32 %v2871_v17, %v2634_v6 }
 0x470   : > { %2672 = vst.msk [vmem:[%s475_s19 + $0x10] sm:$0xff] %vm959_vm9, %v2664_v18  ;;  %v2665_v23 = vadd.f32 %v2643_v32, %v2553_v16 }
 0x471   : > { %2670 = vst.msk [vmem:[%s475_s19] sm:$0xff] %vm959_vm9, %v2662_v35  ;;  %v2663_v48 = vadd.f32 %v2635_v2, %v2551_v63 }
 0x472   : > { %2673 = vst.msk [vmem:[%s475_s19 + $0x18] sm:$0xff] %vm959_vm9, %v2665_v23 }
 0x473   : > { %2671 = vst.msk [vmem:[%s475_s19 + $0x8] sm:$0xff] %vm959_vm9, %v2663_v48  ;;  %v2991_v55 = vpop.f32.mrb[36].mxu1 }
 0x474   : > { %v2656_v11 = vadd.f32 %v2991_v55, %v2871_v17  ;;  %v2647_v45 = vpop.f32.mrb[37].mxu1 }
 0x475   : > { %v2648_v37 = vadd.f32 %v2871_v17, %v2647_v45  ;;  %v2992_v9 = vpop.f32.mrb[38].mxu1 }
 0x476   : > { %v2668_v33 = vadd.f32 %v2656_v11, %v2556_v0  ;;  %v2659_v50 = vadd.f32 %v2992_v9, %v2871_v17  ;;  %v2650_v31 = vpop.f32.mrb[39].mxu1 }
 0x477   : > { %v2666_v58 = vadd.f32 %v2648_v37, %v2554_v25  ;;  %v2651_v4 = vadd.f32 %v2871_v17, %v2650_v31 }
 0x478   : > { %2676 = vst.msk [vmem:[%s475_s19 + $0x30] sm:$0xff] %vm959_vm9, %v2668_v33  ;;  %v2669_v36 = vadd.f32 %v2659_v50, %v2557_v5 }
 0x479   : > { %2674 = vst.msk [vmem:[%s475_s19 + $0x20] sm:$0xff] %vm959_vm9, %v2666_v58  ;;  %v2667_v30 = vadd.f32 %v2651_v4, %v2555_v28 }
 0x47a   : > { %2677 = vst.msk [vmem:[%s475_s19 + $0x38] sm:$0xff] %vm959_vm9, %v2669_v36 }
 0x47b   : > { %2675 = vst.msk [vmem:[%s475_s19 + $0x28] sm:$0xff] %vm959_vm9, %v2667_v30 }
 0x47c   : > { %3203 = shalt.err (!%p3200_p3)
}
 0x47d   : > { %s3204_s26 = scalar_lea.hbm %s4588_s16, 1024  ;;  %s3208_s18 = scalar_lea.hbm %s4651_s14, 2048 }
 0x47e   : > { %p3205_p4 = scmp.ne.s32.totalorder %s4588_s16, %s3204_s26  ;;  %p3209_p9 = scmp.lt.u32.totalorder %s4588_s16, %s4651_s14 }
 0x47f   : > { %p3210_p10 = scmp.lt.u32.totalorder %s3208_s18, %s3204_s26  ;;  %p3212_p12 = scmp.lt.u32.totalorder %s3204_s26, %s4588_s16 }
 0x480   : > { %p3206_p7 = pnand %p3205_p4, %p3378_p5 }
 0x481   : > { %p3211_p11 = por %p3210_p10, %p3209_p9 }
 0x482   : > { %p3207_p8 = pneg %p3206_p7 }
 0x483   : > { %p3213_p13 = por %p3212_p12, %p3211_p11 }
 0x485   : > { %p3214_p0 = pnand %p3213_p13, %p3207_p8 }
 0x487   : > { %3217 = shalt.err (!%p3214_p0)
}
 0x488   : > { %s3263_s22 = smov 128   ;;  %s3264_s27 = smov 8  }
 0x489   : > { %3009 = dma.vmem_to_hbm [thread:$0]  (%p3378_p5), %s4590_s25, 1024, %s4588_s16, %s4597_s9, %s3263_s22, %s3263_s22, %s3264_s27  }
 0x48a PF: > { %p3015_p1 = scmp.ge.s32.totalorder %s3252_s15, 2  ;;  %s2707_s0 = sand.u32 1, %s3240_s28  }
 0x48b   : > { %s2708_s26 = scalar_lea.sflag [#allocation5], %s2707_s0 }
 0x48c   : > { %p3012_p2 = pnand %p3015_p1, %p3382_p6 }
 0x48e   : > { %3235 = dma.done.wait (!%p3012_p2), %s2708_s26, 1024  }
 0x48f   : > { %3237 = vsyncadd (!%p3012_p2), %s2708_s26, 4294966272  ;;  %p28_p3 = scmp.ge.s32.totalorder %s3365_s17, 4   ;;  %s4737_s28 = smov %s3244_s29 }
 0x490   : > { %s4738_s29 = smov %s3248_s30  ;;  %s4739_s30 = smov %s3376_s20 }
 0x491   : > { %s4740_s15 = smov %s3365_s17  ;;  %30 = sbr.rel (!%p28_p3) target bundleno = 5 (0x5), region = 114 }
 0x498   :  { %2713 = vsyncpa [#allocation5], 1 }
 0x499   :  { %2715 = vsyncpa [#allocation5 + $0x1], 1 }

</bundles_post_ra>
